<compile_context>
chip_gen: v7x
topology: tpu7x:2x2x1
jax: 0.10.0
libtpu: 0.0.40
codegen_flags: <defaults>
</compile_context>

<pallas_src>
import jax
import jax.numpy as jnp
from jax.experimental import pallas as pl
from jax.experimental.pallas import tpu as pltpu


def residual_block_kernel(x_ref, w1_ref, b1_ref, w2_ref, b2_ref, o_ref):
    # x_ref  : (1, H, W, Cp)   NHWC input tile, one batch element, Cp lane-dense
    # w1_ref : (9*Cp, Cp)      im2col conv1 weights, rows ordered (kh, kw, cin)
    # b1_ref : (1, Cp)
    # w2_ref : (9*Cp, Cp)
    # b2_ref : (1, Cp)
    # o_ref  : (1, H, W, Cp)
    _, H, W, Cp = o_ref.shape

    def pad_hw(a):
        # (H, W, Cp) -> (H+2, W+2, Cp) zero halo, as pure value ops
        # (no scratch zero/store/reload round trip).
        zr = jnp.zeros((1, W, Cp), jnp.float32)
        a = jnp.concatenate([zr, a, zr], axis=0)          # (H+2, W, Cp)
        zc = jnp.zeros((H + 2, 1, Cp), jnp.float32)
        return jnp.concatenate([zc, a, zc], axis=1)       # (H+2, W+2, Cp)

    def conv3x3(apad, w_flat, b_row):
        # im2col slab: 9 statically shifted windows concatenated on the lane
        # axis -> (H*W, 9*Cp), then ONE big MXU matmul with K = 9*Cp.
        cols = [apad[kh:kh + H, kw:kw + W, :].reshape(H * W, Cp)
                for kh in range(3) for kw in range(3)]
        slab = jnp.concatenate(cols, axis=1)              # (H*W, 9*Cp)
        acc = jnp.dot(slab, w_flat, preferred_element_type=jnp.float32)
        return acc + b_row                                # (H*W, Cp)

    x = x_ref[0].astype(jnp.float32)                      # (H, W, Cp)

    # conv1 + bias + relu
    y = jnp.maximum(conv3x3(pad_hw(x), w1_ref[...], b1_ref[...]), 0.0)

    # conv2 + bias
    z = conv3x3(pad_hw(y.reshape(H, W, Cp)), w2_ref[...], b2_ref[...])

    # residual + relu  (lane-dense full-width store)
    out = jnp.maximum(x.reshape(H * W, Cp) + z, 0.0)
    o_ref[...] = out.reshape(1, H, W, Cp).astype(o_ref.dtype)


def _round_up(v, m):
    return ((v + m - 1) // m) * m


@jax.jit
def residual_block(x_nchw, w1, b1, w2, b2):
    """x_nchw: (N, C, H, W); w*: (C, C, 3, 3) PyTorch OIHW; b*: (C,)."""
    N, C, H, W = x_nchw.shape
    Cp = _round_up(C, 128)          # lane-dense channel count
    dtype = x_nchw.dtype

    # NCHW -> NHWC (glue for the PyTorch-convention API); channel pad is a
    # no-op when C is already a multiple of 128.  The spatial halo is built
    # inside the kernel, so no jnp.pad HBM pass over the activations here.
    # All of this fuses with the pallas_call under the surrounding jit.
    x = jnp.transpose(x_nchw, (0, 2, 3, 1))
    if Cp != C:
        x = jnp.pad(x, ((0, 0), (0, 0), (0, 0), (0, Cp - C)))

    def prep_w(w):
        # OIHW -> (kh, kw, Cin, Cout) -> zero-pad channels -> (9*Cp, Cp)
        wt = jnp.transpose(w, (2, 3, 1, 0))
        wt = jnp.pad(wt, ((0, 0), (0, 0), (0, Cp - C), (0, Cp - C)))
        return wt.reshape(9 * Cp, Cp).astype(dtype)

    def prep_b(b):
        return jnp.pad(b, (0, Cp - C)).reshape(1, Cp).astype(jnp.float32)

    # Advisory cost model (2 convs, each one (H*W, 9*Cp) x (9*Cp, Cp) matmul
    # per image) so XLA's scheduler treats the custom call sensibly.
    flops = 2 * N * 2 * (H * W) * (9 * Cp) * Cp
    bytes_accessed = 4 * (2 * N * H * W * Cp + 2 * 9 * Cp * Cp + 2 * Cp)
    cost = pl.CostEstimate(flops=flops, transcendentals=0,
                           bytes_accessed=bytes_accessed)

    out_nhwc = pl.pallas_call(
        residual_block_kernel,
        out_shape=jax.ShapeDtypeStruct((N, H, W, Cp), dtype),
        grid_spec=pltpu.PrefetchScalarGridSpec(
            num_scalar_prefetch=0,
            grid=(N,),
            in_specs=[
                pl.BlockSpec((1, H, W, Cp), lambda n: (n, 0, 0, 0)),
                pl.BlockSpec((9 * Cp, Cp), lambda n: (0, 0)),
                pl.BlockSpec((1, Cp), lambda n: (0, 0)),
                pl.BlockSpec((9 * Cp, Cp), lambda n: (0, 0)),
                pl.BlockSpec((1, Cp), lambda n: (0, 0)),
            ],
            out_specs=pl.BlockSpec((1, H, W, Cp), lambda n: (n, 0, 0, 0)),
        ),
        compiler_params=pltpu.CompilerParams(
            dimension_semantics=("parallel",),
            vmem_limit_bytes=32 * 1024 * 1024),
        cost_estimate=cost,
    )(x, prep_w(w1), prep_b(b1), prep_w(w2), prep_b(b2))

    # drop channel padding, back to NCHW
    return jnp.transpose(out_nhwc[..., :C], (0, 3, 1, 2))


def residual_block_ref(x, w1, b1, w2, b2):
    """Pure-JAX reference (NCHW, same semantics as the PyTorch module)."""
    dn = ("NCHW", "OIHW", "NCHW")
    y = jax.lax.conv_general_dilated(x, w1, (1, 1), "SAME",
                                     dimension_numbers=dn)
    y = jnp.maximum(y + b1[None, :, None, None], 0.0)
    y = jax.lax.conv_general_dilated(y, w2, (1, 1), "SAME",
                                     dimension_numbers=dn)
    y = y + b2[None, :, None, None]
    return jnp.maximum(x + y, 0.0)


if __name__ == "__main__":
    key = jax.random.PRNGKey(0)
    k_x, k_w1, k_b1, k_w2, k_b2 = jax.random.split(key, 5)

    N, C, H, W = 2, 4, 16, 16
    x = jax.random.normal(k_x, (N, C, H, W), jnp.float32)

    # Deterministic init matching PyTorch Conv2d's uniform(-bound, bound),
    # bound = 1/sqrt(fan_in) with fan_in = C * 3 * 3.
    bound = 1.0 / (C * 3 * 3) ** 0.5
    w1 = jax.random.uniform(k_w1, (C, C, 3, 3), jnp.float32, -bound, bound)
    b1 = jax.random.uniform(k_b1, (C,), jnp.float32, -bound, bound)
    w2 = jax.random.uniform(k_w2, (C, C, 3, 3), jnp.float32, -bound, bound)
    b2 = jax.random.uniform(k_b2, (C,), jnp.float32, -bound, bound)

    out = residual_block(x, w1, b1, w2, b2)
    jax.block_until_ready(out)

    ref = residual_block_ref(x, w1, b1, w2, b2)
    assert out.shape == (N, C, H, W)
    assert jnp.allclose(out, ref, atol=1e-5, rtol=1e-5), "mismatch vs reference"

    print("KERNEL_OK")
</pallas_src>

<mosaic_0001>
module attributes {stable_mosaic.version = 11 : i64} {
  func.func @residual_block_kernel(%arg0: i32, %arg1: memref<1x16x16x128xf32, #tpu.memory_space<vmem>>, %arg2: memref<1152x128xf32, #tpu.memory_space<vmem>>, %arg3: memref<1x128xf32, #tpu.memory_space<vmem>>, %arg4: memref<1152x128xf32, #tpu.memory_space<vmem>>, %arg5: memref<1x128xf32, #tpu.memory_space<vmem>>, %arg6: memref<1x16x16x128xf32, #tpu.memory_space<vmem>>) attributes {dimension_semantics = [#tpu.dimension_semantics<parallel>], iteration_bounds = array<i64: 2>, scalar_prefetch = 0 : i64, scratch_operands = 0 : i64, tpu.core_type = #tpu.core_type<tc>, window_params = [{transform_indices = @transform_0, window_bounds = array<i64: 1, 16, 16, 128>}, {pipeline_mode = #tpu.pipeline_mode<synchronous>, transform_indices = @transform_1, window_bounds = array<i64: 1152, 128>}, {pipeline_mode = #tpu.pipeline_mode<synchronous>, transform_indices = @transform_2, window_bounds = array<i64: 1, 128>}, {pipeline_mode = #tpu.pipeline_mode<synchronous>, transform_indices = @transform_3, window_bounds = array<i64: 1152, 128>}, {pipeline_mode = #tpu.pipeline_mode<synchronous>, transform_indices = @transform_4, window_bounds = array<i64: 1, 128>}, {transform_indices = @transform_5, window_bounds = array<i64: 1, 16, 16, 128>}]} {
    %c0 = arith.constant 0 : index
    %c0_0 = arith.constant 0 : index
    %c0_1 = arith.constant 0 : index
    %c0_2 = arith.constant 0 : index
    %0 = vector.load %arg1[%c0, %c0_0, %c0_1, %c0_2] : memref<1x16x16x128xf32, #tpu.memory_space<vmem>>, vector<1x16x16x128xf32>
    %1 = vector.shape_cast %0 : vector<1x16x16x128xf32> to vector<16x16x128xf32>
    %cst = arith.constant 0.000000e+00 : f32
    %2 = vector.broadcast %cst : f32 to vector<1x16x128xf32>
    %3 = tpu.concatenate %2, %1, %2 in 0 : vector<1x16x128xf32>, vector<16x16x128xf32>, vector<1x16x128xf32> -> vector<18x16x128xf32>
    %cst_3 = arith.constant 0.000000e+00 : f32
    %4 = vector.broadcast %cst_3 : f32 to vector<18x1x128xf32>
    %5 = tpu.concatenate %4, %3, %4 in 1 : vector<18x1x128xf32>, vector<18x16x128xf32>, vector<18x1x128xf32> -> vector<18x18x128xf32>
    %c0_4 = arith.constant 0 : index
    %c0_5 = arith.constant 0 : index
    %6 = vector.load %arg2[%c0_4, %c0_5] : memref<1152x128xf32, #tpu.memory_space<vmem>>, vector<1152x128xf32>
    %c0_6 = arith.constant 0 : index
    %c0_7 = arith.constant 0 : index
    %7 = vector.load %arg3[%c0_6, %c0_7] : memref<1x128xf32, #tpu.memory_space<vmem>>, vector<1x128xf32>
    %8 = vector.extract_strided_slice %5 {offsets = [0, 0, 0], sizes = [16, 16, 128], strides = [1, 1, 1]} : vector<18x18x128xf32> to vector<16x16x128xf32>
    %9 = vector.shape_cast %8 : vector<16x16x128xf32> to vector<256x128xf32>
    %10 = vector.extract_strided_slice %5 {offsets = [0, 1, 0], sizes = [16, 16, 128], strides = [1, 1, 1]} : vector<18x18x128xf32> to vector<16x16x128xf32>
    %11 = vector.shape_cast %10 : vector<16x16x128xf32> to vector<256x128xf32>
    %12 = vector.extract_strided_slice %5 {offsets = [0, 2, 0], sizes = [16, 16, 128], strides = [1, 1, 1]} : vector<18x18x128xf32> to vector<16x16x128xf32>
    %13 = vector.shape_cast %12 : vector<16x16x128xf32> to vector<256x128xf32>
    %14 = vector.extract_strided_slice %5 {offsets = [1, 0, 0], sizes = [16, 16, 128], strides = [1, 1, 1]} : vector<18x18x128xf32> to vector<16x16x128xf32>
    %15 = vector.shape_cast %14 : vector<16x16x128xf32> to vector<256x128xf32>
    %16 = vector.extract_strided_slice %5 {offsets = [1, 1, 0], sizes = [16, 16, 128], strides = [1, 1, 1]} : vector<18x18x128xf32> to vector<16x16x128xf32>
    %17 = vector.shape_cast %16 : vector<16x16x128xf32> to vector<256x128xf32>
    %18 = vector.extract_strided_slice %5 {offsets = [1, 2, 0], sizes = [16, 16, 128], strides = [1, 1, 1]} : vector<18x18x128xf32> to vector<16x16x128xf32>
    %19 = vector.shape_cast %18 : vector<16x16x128xf32> to vector<256x128xf32>
    %20 = vector.extract_strided_slice %5 {offsets = [2, 0, 0], sizes = [16, 16, 128], strides = [1, 1, 1]} : vector<18x18x128xf32> to vector<16x16x128xf32>
    %21 = vector.shape_cast %20 : vector<16x16x128xf32> to vector<256x128xf32>
    %22 = vector.extract_strided_slice %5 {offsets = [2, 1, 0], sizes = [16, 16, 128], strides = [1, 1, 1]} : vector<18x18x128xf32> to vector<16x16x128xf32>
    %23 = vector.shape_cast %22 : vector<16x16x128xf32> to vector<256x128xf32>
    %24 = vector.extract_strided_slice %5 {offsets = [2, 2, 0], sizes = [16, 16, 128], strides = [1, 1, 1]} : vector<18x18x128xf32> to vector<16x16x128xf32>
    %25 = vector.shape_cast %24 : vector<16x16x128xf32> to vector<256x128xf32>
    %26 = tpu.concatenate %9, %11, %13, %15, %17, %19, %21, %23, %25 in 1 : vector<256x128xf32>, vector<256x128xf32>, vector<256x128xf32>, vector<256x128xf32>, vector<256x128xf32>, vector<256x128xf32>, vector<256x128xf32>, vector<256x128xf32>, vector<256x128xf32> -> vector<256x1152xf32>
    %cst_8 = arith.constant dense<0.000000e+00> : vector<256x128xf32>
    %27 = tpu.matmul %26, %6, %cst_8 {dimension_numbers = #tpu.dot_dimension_numbers<[1], [0], [0], [1], [0, 0, 1, 1], [], []>} : vector<256x1152xf32>, vector<1152x128xf32>, vector<256x128xf32> -> vector<256x128xf32>
    %28 = vector.broadcast %7 : vector<1x128xf32> to vector<256x128xf32>
    %29 = arith.addf %27, %28 : vector<256x128xf32>
    %cst_9 = arith.constant 0.000000e+00 : f32
    %30 = vector.broadcast %cst_9 : f32 to vector<256x128xf32>
    %31 = arith.maximumf %29, %30 : vector<256x128xf32>
    %32 = vector.shape_cast %31 : vector<256x128xf32> to vector<16x16x128xf32>
    %cst_10 = arith.constant 0.000000e+00 : f32
    %33 = vector.broadcast %cst_10 : f32 to vector<1x16x128xf32>
    %34 = tpu.concatenate %33, %32, %33 in 0 : vector<1x16x128xf32>, vector<16x16x128xf32>, vector<1x16x128xf32> -> vector<18x16x128xf32>
    %cst_11 = arith.constant 0.000000e+00 : f32
    %35 = vector.broadcast %cst_11 : f32 to vector<18x1x128xf32>
    %36 = tpu.concatenate %35, %34, %35 in 1 : vector<18x1x128xf32>, vector<18x16x128xf32>, vector<18x1x128xf32> -> vector<18x18x128xf32>
    %c0_12 = arith.constant 0 : index
    %c0_13 = arith.constant 0 : index
    %37 = vector.load %arg4[%c0_12, %c0_13] : memref<1152x128xf32, #tpu.memory_space<vmem>>, vector<1152x128xf32>
    %c0_14 = arith.constant 0 : index
    %c0_15 = arith.constant 0 : index
    %38 = vector.load %arg5[%c0_14, %c0_15] : memref<1x128xf32, #tpu.memory_space<vmem>>, vector<1x128xf32>
    %39 = vector.extract_strided_slice %36 {offsets = [0, 0, 0], sizes = [16, 16, 128], strides = [1, 1, 1]} : vector<18x18x128xf32> to vector<16x16x128xf32>
    %40 = vector.shape_cast %39 : vector<16x16x128xf32> to vector<256x128xf32>
    %41 = vector.extract_strided_slice %36 {offsets = [0, 1, 0], sizes = [16, 16, 128], strides = [1, 1, 1]} : vector<18x18x128xf32> to vector<16x16x128xf32>
    %42 = vector.shape_cast %41 : vector<16x16x128xf32> to vector<256x128xf32>
    %43 = vector.extract_strided_slice %36 {offsets = [0, 2, 0], sizes = [16, 16, 128], strides = [1, 1, 1]} : vector<18x18x128xf32> to vector<16x16x128xf32>
    %44 = vector.shape_cast %43 : vector<16x16x128xf32> to vector<256x128xf32>
    %45 = vector.extract_strided_slice %36 {offsets = [1, 0, 0], sizes = [16, 16, 128], strides = [1, 1, 1]} : vector<18x18x128xf32> to vector<16x16x128xf32>
    %46 = vector.shape_cast %45 : vector<16x16x128xf32> to vector<256x128xf32>
    %47 = vector.extract_strided_slice %36 {offsets = [1, 1, 0], sizes = [16, 16, 128], strides = [1, 1, 1]} : vector<18x18x128xf32> to vector<16x16x128xf32>
    %48 = vector.shape_cast %47 : vector<16x16x128xf32> to vector<256x128xf32>
    %49 = vector.extract_strided_slice %36 {offsets = [1, 2, 0], sizes = [16, 16, 128], strides = [1, 1, 1]} : vector<18x18x128xf32> to vector<16x16x128xf32>
    %50 = vector.shape_cast %49 : vector<16x16x128xf32> to vector<256x128xf32>
    %51 = vector.extract_strided_slice %36 {offsets = [2, 0, 0], sizes = [16, 16, 128], strides = [1, 1, 1]} : vector<18x18x128xf32> to vector<16x16x128xf32>
    %52 = vector.shape_cast %51 : vector<16x16x128xf32> to vector<256x128xf32>
    %53 = vector.extract_strided_slice %36 {offsets = [2, 1, 0], sizes = [16, 16, 128], strides = [1, 1, 1]} : vector<18x18x128xf32> to vector<16x16x128xf32>
    %54 = vector.shape_cast %53 : vector<16x16x128xf32> to vector<256x128xf32>
    %55 = vector.extract_strided_slice %36 {offsets = [2, 2, 0], sizes = [16, 16, 128], strides = [1, 1, 1]} : vector<18x18x128xf32> to vector<16x16x128xf32>
    %56 = vector.shape_cast %55 : vector<16x16x128xf32> to vector<256x128xf32>
    %57 = tpu.concatenate %40, %42, %44, %46, %48, %50, %52, %54, %56 in 1 : vector<256x128xf32>, vector<256x128xf32>, vector<256x128xf32>, vector<256x128xf32>, vector<256x128xf32>, vector<256x128xf32>, vector<256x128xf32>, vector<256x128xf32>, vector<256x128xf32> -> vector<256x1152xf32>
    %cst_16 = arith.constant dense<0.000000e+00> : vector<256x128xf32>
    %58 = tpu.matmul %57, %37, %cst_16 {dimension_numbers = #tpu.dot_dimension_numbers<[1], [0], [0], [1], [0, 0, 1, 1], [], []>} : vector<256x1152xf32>, vector<1152x128xf32>, vector<256x128xf32> -> vector<256x128xf32>
    %59 = vector.broadcast %38 : vector<1x128xf32> to vector<256x128xf32>
    %60 = arith.addf %58, %59 : vector<256x128xf32>
    %61 = vector.shape_cast %1 : vector<16x16x128xf32> to vector<256x128xf32>
    %62 = arith.addf %61, %60 : vector<256x128xf32>
    %cst_17 = arith.constant 0.000000e+00 : f32
    %63 = vector.broadcast %cst_17 : f32 to vector<256x128xf32>
    %64 = arith.maximumf %62, %63 : vector<256x128xf32>
    %65 = vector.shape_cast %64 : vector<256x128xf32> to vector<1x16x16x128xf32>
    %c0_18 = arith.constant 0 : index
    %c0_19 = arith.constant 0 : index
    %c0_20 = arith.constant 0 : index
    %c0_21 = arith.constant 0 : index
    %66 = vector.load %arg6[%c0_18, %c0_19, %c0_20, %c0_21] : memref<1x16x16x128xf32, #tpu.memory_space<vmem>>, vector<1x16x16x128xf32>
    tpu.vector_store %arg6[%c0_18, %c0_19, %c0_20, %c0_21], %65 {strides = array<i32>} : memref<1x16x16x128xf32, #tpu.memory_space<vmem>>, vector<1x16x16x128xf32>,
    return
  }
  func.func @transform_0(%arg0: i32) -> (i32, i32, i32, i32) {
    %c0_i32 = arith.constant 0 : i32
    %c0_i32_0 = arith.constant 0 : i32
    %c0_i32_1 = arith.constant 0 : i32
    %c0_i32_2 = arith.constant 0 : i32
    return %arg0, %c0_i32, %c0_i32_0, %c0_i32_1 : i32, i32, i32, i32
  }
  func.func @transform_1(%arg0: i32) -> (i32, i32) {
    %c0_i32 = arith.constant 0 : i32
    %c0_i32_0 = arith.constant 0 : i32
    %c0_i32_1 = arith.constant 0 : i32
    return %c0_i32, %c0_i32_0 : i32, i32
  }
  func.func @transform_2(%arg0: i32) -> (i32, i32) {
    %c0_i32 = arith.constant 0 : i32
    %c0_i32_0 = arith.constant 0 : i32
    %c0_i32_1 = arith.constant 0 : i32
    return %c0_i32, %c0_i32_0 : i32, i32
  }
  func.func @transform_3(%arg0: i32) -> (i32, i32) {
    %c0_i32 = arith.constant 0 : i32
    %c0_i32_0 = arith.constant 0 : i32
    %c0_i32_1 = arith.constant 0 : i32
    return %c0_i32, %c0_i32_0 : i32, i32
  }
  func.func @transform_4(%arg0: i32) -> (i32, i32) {
    %c0_i32 = arith.constant 0 : i32
    %c0_i32_0 = arith.constant 0 : i32
    %c0_i32_1 = arith.constant 0 : i32
    return %c0_i32, %c0_i32_0 : i32, i32
  }
  func.func @transform_5(%arg0: i32) -> (i32, i32, i32, i32) {
    %c0_i32 = arith.constant 0 : i32
    %c0_i32_0 = arith.constant 0 : i32
    %c0_i32_1 = arith.constant 0 : i32
    %c0_i32_2 = arith.constant 0 : i32
    return %arg0, %c0_i32, %c0_i32_0, %c0_i32_1 : i32, i32, i32, i32
  }
}

</mosaic_0001>

<bundles_post_ra>
// kernel: residual_block.1
= control target key start
LH: loop header
LB: loop body
LE: loop exit
PB: predicated region body
PF: predicated region fallthrough
CT: control target
= control target key end

     0   :  { %s5307_s18 = smov 0   ;;  %s8419_s0 = inlined_call_operand.vmem [shape: f32[2,16,16,128], index: 0, kind: input, shape index: {}]   ;;  %s8420_s1 = inlined_call_operand.vmem [shape: f32[1152,128], index: 1, kind: input, shape index: {}]   ;;  %s8421_s2 = inlined_call_operand.vmem [shape: f32[1,128], index: 2, kind: input, shape index: {}]   ;;  %s8422_s3 = inlined_call_operand.vmem [shape: f32[1152,128], index: 3, kind: input, shape index: {}]   ;;  %s8423_s4 = inlined_call_operand.vmem [shape: f32[1,128], index: 4, kind: input, shape index: {}]   ;;  %s8424_s5 = inlined_call_operand.vmem [shape: f32[2,16,16,128], index: 5, kind: output, shape index: {}]  }
   0x1 LB: > { %s3850_s19 = sadd.s32 4294967295, %s5273_s18   ;;  %p3854_p0 = scmp.ge.s32.totalorder %s5273_s18, 1  ;;  %s5273_s18 = sphi %s5307_s18, %s15_s18  }
   0x2   : > { %p187_p1 = scmp.lt.s32.totalorder %s5273_s18, 3 }
   0x4   : > { %p188_p2 = pnand %p3854_p0, %p187_p1 }
   0x6   : > { %191 = sbr.rel (%p188_p2) target bundleno = 1428 (0x594), region = 40 }
   0xd   : > { %v425_v0 = vld [vmem:[%s8420_s1] sm:$0xff]  ;;  %v426_v1 = vld [vmem:[%s8420_s1 + $0x8] sm:$0xff]  ;;  %v427_v2 = vld [vmem:[%s8420_s1 + $0x10] sm:$0xff]  ;;  %vm290_vm0 = vcmask 1040384   ;;  %v8426_v3 = vmov 0.0|0.0   ;;  %v5276_v6 = vmov 0.0  }
   0xe   : > { %4313 = vmatprep.subr.bf16.mxu0 %v8426_v3  ;;  %v4314_v4 = vpack.c.bf16 %v426_v1, %v425_v0  ;;  %v428_v5 = vld [vmem:[%s8420_s1 + $0x18] sm:$0xff]  ;;  %v5328_v7 = vrot.slane %v5276_v6, 7  ;;  %vm602_vm1 = vcmask 1046528   ;;  %v429_v11 = vld [vmem:[%s8420_s1 + $0x20] sm:$0xff]  ;;  %v430_v12 = vld [vmem:[%s8420_s1 + $0x28] sm:$0xff]  ;;  %p215_p3 = scmp.lt.s32.totalorder %s3850_s19, 1 }
   0xf   : > { %v4317_v8 = vpack.c.bf16 %v428_v5, %v427_v2  ;;  %v4320_v15 = vpack.c.bf16 %v430_v12, %v429_v11  ;;  %v431_v16 = vld [vmem:[%s8420_s1 + $0x30] sm:$0xff]  ;;  %v432_v17 = vld [vmem:[%s8420_s1 + $0x38] sm:$0xff]  ;;  %v433_v19 = vld [vmem:[%s8420_s1 + $0x40] sm:$0xff]  ;;  %vm715_vm3 = vcmask 1045504  }
  0x10   : > { %8625 = vst [vmem:[#allocation2_spill] sm:$0xff] %v5328_v7  ;;  %4315 = vmatpush1.bf16.msra.mxu0 %v4314_v4  ;;  %v5332_v9 = vsel %vm290_vm0, 0.0, %v5328_v7  ;;  %v604_v10 = vrot.slane %v5328_v7, 1  ;;  %v4323_v18 = vpack.c.bf16 %v432_v17, %v431_v16  ;;  %v434_v20 = vld [vmem:[%s8420_s1 + $0x48] sm:$0xff]  ;;  %v435_v22 = vld [vmem:[%s8420_s1 + $0x50] sm:$0xff]  ;;  %v436_v23 = vld [vmem:[%s8420_s1 + $0x58] sm:$0xff] }
  0x11   : > { %4316 = vmatprep.subr.bf16.mxu0 %v8426_v3  ;;  %v603_v13 = vrot.slane %v5332_v9, 1  ;;  %v4326_v21 = vpack.c.bf16 %v434_v20, %v433_v19  ;;  %v4329_v24 = vpack.c.bf16 %v436_v23, %v435_v22  ;;  %v437_v25 = vld [vmem:[%s8420_s1 + $0x60] sm:$0xff]  ;;  %v438_v26 = vld [vmem:[%s8420_s1 + $0x68] sm:$0xff]  ;;  %v439_v28 = vld [vmem:[%s8420_s1 + $0x70] sm:$0xff]  ;;  %s8910_s19 = smov (!%p215_p3, %s3850_s19), 1  ;;  %v5458_v56 = vsel %vm290_vm0, %v5328_v7, 0.0 }
  0x12   : > { %v4332_v27 = vpack.c.bf16 %v438_v26, %v437_v25  ;;  %v440_v29 = vld [vmem:[%s8420_s1 + $0x78] sm:$0xff]  ;;  %v441_v31 = vld [vmem:[%s8420_s1 + $0x80] sm:$0xff]  ;;  %v442_v32 = vld [vmem:[%s8420_s1 + $0x88] sm:$0xff]  ;;  %s4055_s30 = sshll.u32 %s8910_s19, 8  ;;  %v606_v62 = vrot.slane %v5458_v56, 1 }
  0x13   : > { %v5346_v14 = vsel %vm602_vm1, %v603_v13, %v604_v10  ;;  %v4335_v30 = vpack.c.bf16 %v440_v29, %v439_v28  ;;  %v4338_v33 = vpack.c.bf16 %v442_v32, %v441_v31  ;;  %v443_v34 = vld [vmem:[%s8420_s1 + $0x90] sm:$0xff]  ;;  %v444_v35 = vld [vmem:[%s8420_s1 + $0x98] sm:$0xff]  ;;  %v445_v37 = vld [vmem:[%s8420_s1 + $0xa0] sm:$0xff]  ;;  %s5438_s8 = scalar_lea.vmem %s8419_s0, %s4055_s30  ;;  %s8298_s10 = scalar_lea.vmem %s8424_s5, %s4055_s30 }
  0x14   : > { %8626 = vst [vmem:[#allocation3_spill] sm:$0xff] %v5346_v14  ;;  %4318 = vmatpush1.bf16.msra.mxu0 %v4317_v8  ;;  %914 = vmatprep.mubr.f32.mxu0 %v5346_v14  ;;  %v4341_v36 = vpack.c.bf16 %v444_v35, %v443_v34  ;;  %v446_v38 = vld [vmem:[%s8420_s1 + $0xa8] sm:$0xff]  ;;  %v447_v40 = vld [vmem:[%s8420_s1 + $0xb0] sm:$0xff]  ;;  %v448_v41 = vld [vmem:[%s8420_s1 + $0xb8] sm:$0xff]  ;;  %v5489_v6 = vsel %vm602_vm1, %v604_v10, %v606_v62  ;;  %v8645_v14 = vmov 0.0|0.0  }
  0x15   : > { %4319 = vmatprep.subr.bf16.mxu0 %v8426_v3  ;;  %v4344_v39 = vpack.c.bf16 %v446_v38, %v445_v37  ;;  %v4347_v42 = vpack.c.bf16 %v448_v41, %v447_v40  ;;  %v449_v43 = vld [vmem:[%s8420_s1 + $0xc0] sm:$0xff]  ;;  %v450_v44 = vld [vmem:[%s8420_s1 + $0xc8] sm:$0xff]  ;;  %v451_v46 = vld [vmem:[%s8420_s1 + $0xd0] sm:$0xff]  ;;  %8629 = vst [vmem:[#allocation4_spill] sm:$0xff] %v5489_v6 }
  0x16   : > { %v4350_v45 = vpack.c.bf16 %v450_v44, %v449_v43  ;;  %v452_v47 = vld [vmem:[%s8420_s1 + $0xd8] sm:$0xff]  ;;  %v453_v49 = vld [vmem:[%s8420_s1 + $0xe0] sm:$0xff]  ;;  %v454_v50 = vld [vmem:[%s8420_s1 + $0xe8] sm:$0xff] }
  0x17   : > { %v4353_v48 = vpack.c.bf16 %v452_v47, %v451_v46  ;;  %v225_v51 = vld [vmem:[%s5438_s8] sm:$0xff]  ;;  %v226_v52 = vld [vmem:[%s5438_s8 + $0x8] sm:$0xff]  ;;  %v4356_v53 = vpack.c.bf16 %v454_v50, %v453_v49  ;;  %v455_v54 = vld [vmem:[%s8420_s1 + $0xf0] sm:$0xff] }
  0x18   : > { %4321 = vmatpush1.bf16.msra.mxu0 %v4320_v15  ;;  %v456_v55 = vld [vmem:[%s8420_s1 + $0xf8] sm:$0xff]  ;;  %v5460_v57 = vrot.slane %v225_v51, 7  ;;  %v294_v58 = vrot.slane %v226_v52, 7  ;;  %v457_v60 = vld [vmem:[%s8420_s1 + $0x100] sm:$0xff]  ;;  %v458_v61 = vld [vmem:[%s8420_s1 + $0x108] sm:$0xff] }
  0x19   : > { %4322 = vmatprep.subr.bf16.mxu0 %v8426_v3  ;;  %v4359_v59 = vpack.c.bf16 %v456_v55, %v455_v54  ;;  %v227_v1 = vld [vmem:[%s5438_s8 + $0x10] sm:$0xff]  ;;  %v228_v2 = vld [vmem:[%s5438_s8 + $0x18] sm:$0xff]  ;;  %vm5481_vm2 = vmneg %vm290_vm0  ;;  %v4362_v5 = vpack.c.bf16 %v458_v61, %v457_v60 }
  0x1a   : > { %v5472_v63 = vsel %vm290_vm0, %v5460_v57, %v294_v58  ;;  %v5476_v0 = vsel %vm290_vm0, 0.0, %v5460_v57  ;;  %v459_v12 = vld [vmem:[%s8420_s1 + $0x110] sm:$0xff]  ;;  %v460_v13 = vld [vmem:[%s8420_s1 + $0x118] sm:$0xff]  ;;  %v5500_v15 = vsel %vm290_vm0, %v294_v58, 0.0  ;;  %v5502_v16 = vrot.slane %v227_v1, 7  ;;  %v461_v20 = vld [vmem:[%s8420_s1 + $0x120] sm:$0xff] }
  0x1b   : > { %v608_v8 = vrot.slane %v5476_v0, 1  ;;  %v609_v11 = vrot.slane %v5472_v63, 1  ;;  %v297_v10 = vrot.slane %v228_v2, 7  ;;  %v4365_v17 = vpack.c.bf16 %v460_v13, %v459_v12  ;;  %v230_v25 = vld [vmem:[%s5438_s8 + $0x28] sm:$0xff]  ;;  %v464_v31 = vld [vmem:[%s8420_s1 + $0x138] sm:$0xff]  ;;  %v465_v38 = vld [vmem:[%s8420_s1 + $0x140] sm:$0xff] }
  0x1c   : > { %4324 = vmatpush1.bf16.msra.mxu0 %v4323_v18  ;;  %v611_v19 = vrot.slane %v5500_v15, 1  ;;  %v393_v23 = vsel %vm290_vm0, 0.0, %v5502_v16  ;;  %v300_v34 = vrot.slane %v230_v25, 7  ;;  %v232_v43 = vld [vmem:[%s5438_s8 + $0x38] sm:$0xff]  ;;  %v467_v50 = vld [vmem:[%s8420_s1 + $0x150] sm:$0xff]  ;;  %v469_v61 = vld [vmem:[%s8420_s1 + $0x160] sm:$0xff] }
  0x1d   : > { %4325 = vmatprep.subr.bf16.mxu0 %v8426_v3  ;;  %v5509_v18 = vsel %vm602_vm1, %v608_v8, %v609_v11  ;;  %v5521_v22 = vsel %vm290_vm0, %v5502_v16, %v297_v10  ;;  %v613_v28 = vrot.slane %v393_v23, 1  ;;  %v5541_v32 = vsel %vm290_vm0, %v297_v10, 0.0  ;;  %v468_v51 = vld [vmem:[%s8420_s1 + $0x158] sm:$0xff]  ;;  %v470_v62 = vld [vmem:[%s8420_s1 + $0x168] sm:$0xff] }
  0x1e   : > { %8630 = vst [vmem:[#allocation5_spill] sm:$0xff] %v5509_v18  ;;  %v614_v29 = vrot.slane %v5521_v22, 1  ;;  %v616_v37 = vrot.slane %v5541_v32, 1  ;;  %v8425_v46 = vrot.slane %v5521_v22, 2  ;;  %v5586_v52 = vsel %vm290_vm0, %v300_v34, 0.0  ;;  %v234_v8 = vld [vmem:[%s5438_s8 + $0x48] sm:$0xff] }
  0x1f   : > { %v303_v54 = vrot.slane %v232_v43, 7  ;;  %v4377_v58 = vpack.c.bf16 %v468_v51, %v467_v50  ;;  %v621_v60 = vrot.slane %v5586_v52, 1  ;;  %v475_v43 = vld [vmem:[%s8420_s1 + $0x190] sm:$0xff] }
  0x20   : > { %4327 = vmatpush1.bf16.msra.mxu0 %v4326_v21  ;;  %v462_v21 = vld [vmem:[%s8420_s1 + $0x128] sm:$0xff]  ;;  %v5574_v47 = vsel %vm602_vm1, %v614_v29, %v616_v37 }
  0x21   : > { %4328 = vmatprep.subr.bf16.mxu0 %v8426_v3  ;;  %v4368_v26 = vpack.c.bf16 %v462_v21, %v461_v20  ;;  %8633 = vst [vmem:[#allocation8_spill] sm:$0xff] %v5574_v47  ;;  %v5636_v20 = vsel %vm290_vm0, %v303_v54, 0.0 }
  0x24   : > { %4330 = vmatpush1.bf16.msra.mxu0 %v4329_v24  ;;  %v229_v24 = vld [vmem:[%s5438_s8 + $0x20] sm:$0xff] }
  0x25   : > { %4331 = vmatprep.subr.bf16.mxu0 %v8426_v3 }
  0x28   : > { %4333 = vmatpush1.bf16.msra.mxu0 %v4332_v27  ;;  %v5530_v27 = vsel %vm602_vm1, %v609_v11, %v611_v19  ;;  %v4380_v11 = vpack.c.bf16 %v470_v62, %v469_v61  ;;  %v472_v19 = vld [vmem:[%s8420_s1 + $0x178] sm:$0xff] }
  0x29   : > { %4334 = vmatprep.subr.bf16.mxu0 %v8426_v3  ;;  %8631 = vst [vmem:[#allocation6_spill] sm:$0xff] %v5530_v27 }
  0x2c   : > { %4336 = vmatpush1.bf16.msra.mxu0 %v4335_v30  ;;  %v463_v30 = vld [vmem:[%s8420_s1 + $0x130] sm:$0xff] }
  0x2d   : > { %4337 = vmatprep.subr.bf16.mxu0 %v8426_v3  ;;  %v4371_v35 = vpack.c.bf16 %v464_v31, %v463_v30 }
  0x30   : > { %4339 = vmatpush1.bf16.msra.mxu0 %v4338_v33  ;;  %v5543_v33 = vrot.slane %v229_v24, 7 }
  0x31   : > { %4340 = vmatprep.subr.bf16.mxu0 %v8426_v3 }
  0x32   : > { %v5562_v40 = vsel %vm290_vm0, %v5543_v33, %v300_v34  ;;  %v5566_v41 = vsel %vm290_vm0, 0.0, %v5543_v33  ;;  %v235_v34 = vld [vmem:[%s5438_s8 + $0x50] sm:$0xff] }
  0x33   : > { %v619_v49 = vrot.slane %v5562_v40, 1 }
  0x34   : > { %4342 = vmatpush1.bf16.msra.mxu0 %v4341_v36  ;;  %v5550_v36 = vsel %vm602_vm1, %v613_v28, %v614_v29  ;;  %v473_v28 = vld [vmem:[%s8420_s1 + $0x180] sm:$0xff]  ;;  %v474_v29 = vld [vmem:[%s8420_s1 + $0x188] sm:$0xff] }
  0x35   : > { %4343 = vmatprep.subr.bf16.mxu0 %v8426_v3  ;;  %8632 = vst [vmem:[#allocation7_spill] sm:$0xff] %v5550_v36  ;;  %v5624_v12 = vsel %vm602_vm1, %v619_v49, %v621_v60  ;;  %v4386_v37 = vpack.c.bf16 %v474_v29, %v473_v28  ;;  %v478_v60 = vld [vmem:[%s8420_s1 + $0x1a8] sm:$0xff] }
  0x36   : > { %8635 = vst [vmem:[#allocation10_spill] sm:$0xff] %v5624_v12 }
  0x38   : > { %4345 = vmatpush1.bf16.msra.mxu0 %v4344_v39  ;;  %v466_v39 = vld [vmem:[%s8420_s1 + $0x148] sm:$0xff] }
  0x39   : > { %4346 = vmatprep.subr.bf16.mxu0 %v8426_v3  ;;  %v4374_v44 = vpack.c.bf16 %v466_v39, %v465_v38 }
  0x3c   : > { %4348 = vmatpush1.bf16.msra.mxu0 %v4347_v42  ;;  %v231_v42 = vld [vmem:[%s5438_s8 + $0x30] sm:$0xff] }
  0x3d   : > { %4349 = vmatprep.subr.bf16.mxu0 %v8426_v3 }
  0x40   : > { %4351 = vmatpush1.bf16.msra.mxu0 %v4350_v45  ;;  %v726_v45 = vrot.slane %v393_v23, 2  ;;  %v306_v23 = vrot.slane %v234_v8, 7  ;;  %v238_v8 = vld [vmem:[%s5438_s8 + $0x68] sm:$0xff] }
  0x41   : > { %4352 = vmatprep.subr.bf16.mxu0 %v8426_v3  ;;  %v312_v28 = vrot.slane %v238_v8, 7  ;;  %v484_v8 = vld [vmem:[%s8420_s1 + $0x1d8] sm:$0xff] }
  0x42   : > { %v5593_v55 = vsel %vm715_vm3, %v726_v45, %v8425_v46  ;;  %v5680_v45 = vsel %vm290_vm0, %v306_v23, 0.0  ;;  %v487_v46 = vld [vmem:[%s8420_s1 + $0x1f0] sm:$0xff] }
  0x43   : > { %4185 = vmatprep.mubr.f32.mxu1 %v5593_v55 }
  0x44   : > { %4354 = vmatpush1.bf16.msra.mxu0 %v4353_v48  ;;  %v618_v48 = vrot.slane %v5566_v41, 1 }
  0x45   : > { %4355 = vmatprep.subr.bf16.mxu0 %v8426_v3 }
  0x48   : > { %4357 = vmatpush1.bf16.msra.mxu0 %v4356_v53  ;;  %v5588_v53 = vrot.slane %v231_v42, 7 }
  0x49   : > { %4358 = vmatprep.subr.bf16.mxu0 %v8426_v3 }
  0x4a   : > { %v5613_v1 = vsel %vm290_vm0, %v5588_v53, %v303_v54  ;;  %v5617_v2 = vsel %vm290_vm0, 0.0, %v5588_v53  ;;  %v631_v54 = vrot.slane %v5680_v45, 1 }
  0x4b   : > { %v623_v13 = vrot.slane %v5617_v2, 1  ;;  %v624_v10 = vrot.slane %v5613_v1, 1 }
  0x4c   : > { %4360 = vmatpush1.bf16.msra.mxu0 %v4359_v59  ;;  %v5601_v59 = vsel %vm602_vm1, %v618_v48, %v619_v49  ;;  %v5682_v48 = vrot.slane %v235_v34, 7 }
  0x4d   : > { %4361 = vmatprep.subr.bf16.mxu0 %v8426_v3  ;;  %8634 = vst [vmem:[#allocation9_spill] sm:$0xff] %v5601_v59  ;;  %v5645_v25 = vsel %vm602_vm1, %v623_v13, %v624_v10 }
  0x4e   : > { %8636 = vst [vmem:[#allocation11_spill] sm:$0xff] %v5645_v25  ;;  %v5705_v62 = vsel %vm290_vm0, 0.0, %v5682_v48 }
  0x4f   : > { %3861 = vmatmul.mubr.msk.f32.vlgmr.msra.gmra.mrb[0].mxu0 %vm5481_vm2, %v5328_v7 }
  0x50   : > { %4363 = vmatpush1.bf16.msra.mxu0 %v4362_v5  ;;  %919 = vmatprep.mubr.f32.mxu0 %v5489_v6  ;;  %v233_v5 = vld [vmem:[%s5438_s8 + $0x40] sm:$0xff] }
  0x51   : > { %4364 = vmatprep.subr.bf16.mxu0 %v8426_v3  ;;  %v5638_v21 = vrot.slane %v233_v5, 7  ;;  %v237_v5 = vld [vmem:[%s5438_s8 + $0x60] sm:$0xff] }
  0x53   : > { %920 = vmatmul.mubr.f32.gmra.mrb[2].mxu0 %v5328_v7  ;;  %v5657_v30 = vsel %vm290_vm0, %v5638_v21, %v306_v23  ;;  %v5661_v31 = vsel %vm290_vm0, 0.0, %v5638_v21  ;;  %v480_v23 = vld [vmem:[%s8420_s1 + $0x1b8] sm:$0xff] }
  0x54   : > { %924 = vmatprep.mubr.f32.mxu0 %v5509_v18  ;;  %4366 = vmatpush1.bf16.msra.mxu0 %v4365_v17  ;;  %v471_v17 = vld [vmem:[%s8420_s1 + $0x170] sm:$0xff]  ;;  %v628_v39 = vrot.slane %v5661_v31, 1  ;;  %v629_v42 = vrot.slane %v5657_v30, 1 }
  0x55   : > { %4367 = vmatprep.subr.bf16.mxu0 %v8426_v3  ;;  %v4383_v24 = vpack.c.bf16 %v472_v19, %v471_v17  ;;  %v479_v19 = vld [vmem:[%s8420_s1 + $0x1b0] sm:$0xff] }
  0x56   : > { %v5689_v51 = vsel %vm602_vm1, %v628_v39, %v629_v42  ;;  %v5712_v13 = vsel %vm602_vm1, %v629_v42, %v631_v54  ;;  %v4395_v29 = vpack.c.bf16 %v480_v23, %v479_v19  ;;  %v482_v39 = vld [vmem:[%s8420_s1 + $0x1c8] sm:$0xff] }
  0x57   : > { %3863 = vmatmul.mubr.msk.f32.gmra.mrb[4].mxu0 %vm5481_vm2, %v5460_v57  ;;  %8638 = vst [vmem:[#allocation13_spill] sm:$0xff] %v5689_v51  ;;  %8639 = vst [vmem:[#allocation14_spill] sm:$0xff] %v5712_v13 }
  0x58   : > { %929 = vmatprep.mubr.f32.mxu0 %v5530_v27  ;;  %4369 = vmatpush1.bf16.msra.mxu0 %v4368_v26  ;;  %v626_v26 = vrot.slane %v5636_v20, 1 }
  0x59   : > { %4370 = vmatprep.subr.bf16.mxu0 %v8426_v3 }
  0x5a   : > { %v5668_v38 = vsel %vm602_vm1, %v624_v10, %v626_v26  ;;  %v633_v10 = vrot.slane %v5705_v62, 1  ;;  %v5726_v26 = vrot.slane %v237_v5, 7  ;;  %v483_v5 = vld [vmem:[%s8420_s1 + $0x1d0] sm:$0xff] }
  0x5b   : > { %930 = vmatmul.mubr.f32.gmra.mrb[6].mxu0 %v5472_v63  ;;  %8637 = vst [vmem:[#allocation12_spill] sm:$0xff] %v5668_v38  ;;  %v4401_v19 = vpack.c.bf16 %v484_v8, %v483_v5 }
  0x5c   : > { %934 = vmatprep.mubr.f32.mxu0 %v5550_v36  ;;  %4372 = vmatpush1.bf16.msra.mxu0 %v4371_v35  ;;  %v236_v35 = vld [vmem:[%s5438_s8 + $0x58] sm:$0xff]  ;;  %v5745_v42 = vsel %vm290_vm0, %v5726_v26, %v312_v28 }
  0x5d   : > { %4373 = vmatprep.subr.bf16.mxu0 %v8426_v3  ;;  %v309_v49 = vrot.slane %v236_v35, 7 }
  0x5f   : > { %3865 = vmatmul.mubr.msk.f32.gmra.mrb[8].mxu0 %vm5481_vm2, %v5502_v16  ;;  %v5701_v61 = vsel %vm290_vm0, %v5682_v48, %v309_v49 }
  0x60   : > { %939 = vmatprep.mubr.f32.mxu0 %v5574_v47  ;;  %4375 = vmatpush1.bf16.msra.mxu0 %v4374_v44  ;;  %v476_v44 = vld [vmem:[%s8420_s1 + $0x198] sm:$0xff]  ;;  %v634_v17 = vrot.slane %v5701_v61, 1 }
  0x61   : > { %4376 = vmatprep.subr.bf16.mxu0 %v8426_v3  ;;  %v4389_v50 = vpack.c.bf16 %v476_v44, %v475_v43  ;;  %v5749_v43 = vsel %vm290_vm0, 0.0, %v5726_v26  ;;  %v239_v44 = vld [vmem:[%s5438_s8 + $0x70] sm:$0xff] }
  0x62   : > { %v5733_v34 = vsel %vm602_vm1, %v633_v10, %v634_v17  ;;  %v5770_v10 = vrot.slane %v239_v44, 7  ;;  %v241_v44 = vld [vmem:[%s5438_s8 + $0x80] sm:$0xff] }
  0x63   : > { %940 = vmatmul.mubr.f32.gmra.mrb[10].mxu0 %v5521_v22  ;;  %8640 = vst [vmem:[#allocation15_spill] sm:$0xff] %v5733_v34 }
  0x64   : > { %944 = vmatprep.mubr.f32.mxu0 %v5601_v59  ;;  %4378 = vmatpush1.bf16.msra.mxu0 %v4377_v58  ;;  %v477_v58 = vld [vmem:[%s8420_s1 + $0x1a0] sm:$0xff] }
  0x65   : > { %4379 = vmatprep.subr.bf16.mxu0 %v8426_v3 }
  0x67   : > { %3867 = vmatmul.mubr.msk.f32.gmra.mrb[12].mxu0 %vm5481_vm2, %v5543_v33 }
  0x68   : > { %949 = vmatprep.mubr.f32.mxu0 %v5624_v12  ;;  %4381 = vmatpush1.bf16.msra.mxu0 %v4380_v11  ;;  %v4392_v11 = vpack.c.bf16 %v478_v60, %v477_v58  ;;  %v638_v58 = vrot.slane %v5749_v43, 1  ;;  %v639_v60 = vrot.slane %v5745_v42, 1 }
  0x69   : > { %4382 = vmatprep.subr.bf16.mxu0 %v8426_v3 }
  0x6a   : > { %v5777_v23 = vsel %vm602_vm1, %v638_v58, %v639_v60 }
  0x6b   : > { %950 = vmatmul.mubr.f32.gmra.mrb[14].mxu0 %v5562_v40  ;;  %8642 = vst [vmem:[#allocation17_spill] sm:$0xff] %v5777_v23 }
  0x6c   : > { %954 = vmatprep.mubr.f32.mxu0 %v5645_v25  ;;  %4384 = vmatpush1.bf16.msra.mxu0 %v4383_v24  ;;  %v5724_v24 = vsel %vm290_vm0, %v309_v49, 0.0  ;;  %v240_v49 = vld [vmem:[%s5438_s8 + $0x78] sm:$0xff] }
  0x6d   : > { %4385 = vmatprep.subr.bf16.mxu0 %v8426_v3  ;;  %v636_v35 = vrot.slane %v5724_v24, 1 }
  0x6f   : > { %3869 = vmatmul.mubr.msk.f32.gmra.mrb[16].mxu0 %vm5481_vm2, %v5588_v53  ;;  %v5756_v54 = vsel %vm602_vm1, %v634_v17, %v636_v35  ;;  %v315_v17 = vrot.slane %v240_v49, 7  ;;  %v486_v35 = vld [vmem:[%s8420_s1 + $0x1e8] sm:$0xff] }
  0x70   : > { %959 = vmatprep.mubr.f32.mxu0 %v5668_v38  ;;  %4387 = vmatpush1.bf16.msra.mxu0 %v4386_v37  ;;  %v481_v37 = vld [vmem:[%s8420_s1 + $0x1c0] sm:$0xff]  ;;  %8641 = vst [vmem:[#allocation16_spill] sm:$0xff] %v5756_v54  ;;  %v242_v49 = vld [vmem:[%s5438_s8 + $0x88] sm:$0xff] }
  0x71   : > { %4388 = vmatprep.subr.bf16.mxu0 %v8426_v3 }
  0x73   : > { %960 = vmatmul.mubr.f32.gmra.mrb[18].mxu0 %v5613_v1 }
  0x74   : > { %964 = vmatprep.mubr.f32.mxu0 %v5689_v51  ;;  %4390 = vmatpush1.bf16.msra.mxu0 %v4389_v50  ;;  %v4398_v50 = vpack.c.bf16 %v482_v39, %v481_v37  ;;  %v5789_v37 = vsel %vm290_vm0, %v5770_v10, %v315_v17  ;;  %v5793_v39 = vsel %vm290_vm0, 0.0, %v5770_v10 }
  0x75   : > { %4391 = vmatprep.subr.bf16.mxu0 %v8426_v3  ;;  %v643_v5 = vrot.slane %v5793_v39, 1  ;;  %v644_v8 = vrot.slane %v5789_v37, 1 }
  0x77   : > { %3871 = vmatmul.mubr.msk.f32.gmra.mrb[20].mxu0 %vm5481_vm2, %v5638_v21 }
  0x78   : > { %969 = vmatprep.mubr.f32.mxu0 %v5712_v13  ;;  %4393 = vmatpush1.bf16.msra.mxu0 %v4392_v11  ;;  %v5768_v11 = vsel %vm290_vm0, %v312_v28, 0.0  ;;  %v485_v28 = vld [vmem:[%s8420_s1 + $0x1e0] sm:$0xff] }
  0x79   : > { %4394 = vmatprep.subr.bf16.mxu0 %v8426_v3 }
  0x7b   : > { %970 = vmatmul.mubr.f32.gmra.mrb[22].mxu0 %v5657_v30 }
  0x7c   : > { %974 = vmatprep.mubr.f32.mxu0 %v5733_v34  ;;  %4396 = vmatpush1.bf16.msra.mxu0 %v4395_v29  ;;  %v641_v29 = vrot.slane %v5768_v11, 1 }
  0x7d   : > { %4397 = vmatprep.subr.bf16.mxu0 %v8426_v3 }
  0x7e   : > { %v5800_v58 = vsel %vm602_vm1, %v639_v60, %v641_v29  ;;  %v5814_v60 = vrot.slane %v241_v44, 7  ;;  %v318_v29 = vrot.slane %v242_v49, 7  ;;  %v243_v49 = vld [vmem:[%s5438_s8 + $0x90] sm:$0xff] }
  0x7f   : > { %3873 = vmatmul.mubr.msk.f32.gmra.mrb[24].mxu0 %vm5481_vm2, %v5682_v48  ;;  %8643 = vst [vmem:[#allocation18_spill] sm:$0xff] %v5800_v58 }
  0x80   : > { %979 = vmatprep.mubr.f32.mxu0 %v5756_v54  ;;  %4399 = vmatpush1.bf16.msra.mxu0 %v4398_v50  ;;  %v4404_v50 = vpack.c.bf16 %v486_v35, %v485_v28  ;;  %v5812_v28 = vsel %vm290_vm0, %v315_v17, 0.0  ;;  %v5827_v17 = vsel %vm290_vm0, %v5814_v60, %v318_v29  ;;  %v5831_v44 = vsel %vm290_vm0, 0.0, %v5814_v60 }
  0x81   : > { %4400 = vmatprep.subr.bf16.mxu0 %v8426_v3  ;;  %v646_v6 = vrot.slane %v5812_v28, 1 }
  0x83   : > { %980 = vmatmul.mubr.f32.gmra.mrb[26].mxu0 %v5701_v61 }
  0x84   : > { %984 = vmatprep.mubr.f32.mxu0 %v5777_v23  ;;  %4402 = vmatpush1.bf16.msra.mxu0 %v4401_v19  ;;  %v488_v19 = vld [vmem:[%s8420_s1 + $0x1f8] sm:$0xff]  ;;  %v5846_v23 = vrot.slane %v243_v49, 7  ;;  %v245_v49 = vld [vmem:[%s5438_s8 + $0xa0] sm:$0xff] }
  0x85   : > { %4403 = vmatprep.subr.bf16.mxu0 %v8426_v3  ;;  %v4407_v35 = vpack.c.bf16 %v488_v19, %v487_v46  ;;  %v5821_v3 = vsel %vm602_vm1, %v643_v5, %v644_v8  ;;  %v5838_v46 = vsel %vm602_vm1, %v644_v8, %v646_v6  ;;  %v648_v5 = vrot.slane %v5831_v44, 1 }
  0x86   : > { %8644 = vst [vmem:[#allocation19_spill] sm:$0xff] %v5821_v3  ;;  %8646 = vst [vmem:[#allocation20_spill] sm:$0xff] %v5838_v46  ;;  %v649_v19 = vrot.slane %v5827_v17, 1  ;;  %v5876_v13 = vrot.slane %v245_v49, 7  ;;  %v247_v49 = vld [vmem:[%s5438_s8 + $0xb0] sm:$0xff] }
  0x87   : > { %3875 = vmatmul.mubr.msk.f32.gmra.mrb[28].mxu0 %vm5481_vm2, %v5726_v26  ;;  %v5906_v12 = vrot.slane %v247_v49, 7  ;;  %v249_v49 = vld [vmem:[%s5438_s8 + $0xc0] sm:$0xff] }
  0x88   : > { %989 = vmatprep.mubr.f32.mxu0 %v5800_v58  ;;  %4405 = vmatpush1.bf16.msra.mxu0 %v4404_v50  ;;  %v244_v50 = vld [vmem:[%s5438_s8 + $0x98] sm:$0xff]  ;;  %v5844_v58 = vsel %vm290_vm0, %v318_v29, 0.0  ;;  %v5853_v6 = vsel %vm602_vm1, %v648_v5, %v649_v19  ;;  %v5862_v29 = vsel %vm290_vm0, 0.0, %v5846_v23  ;;  %8650 = vst [vmem:[#allocation24_spill] sm:$0xff] %v5876_v13  ;;  %v5936_v27 = vrot.slane %v249_v49, 7  ;;  %v251_v49 = vld [vmem:[%s5438_s8 + $0xd0] sm:$0xff] }
  0x89   : > { %4406 = vmatprep.subr.bf16.mxu0 %v8645_v14  ;;  %v321_v54 = vrot.slane %v244_v50, 7  ;;  %8647 = vst [vmem:[#allocation21_spill] sm:$0xff] %v5853_v6  ;;  %v651_v8 = vrot.slane %v5844_v58, 1  ;;  %v246_v50 = vld [vmem:[%s5438_s8 + $0xa8] sm:$0xff]  ;;  %8656 = vst [vmem:[#allocation30_spill] sm:$0xff] %v5906_v12 }
  0x8a   : > { %v324_v51 = vrot.slane %v246_v50, 7  ;;  %v248_v50 = vld [vmem:[%s5438_s8 + $0xb8] sm:$0xff]  ;;  %8662 = vst [vmem:[#allocation36_spill] sm:$0xff] %v5936_v27 }
  0x8b   : > { %990 = vmatmul.mubr.f32.gmra.mrb[30].mxu0 %v5745_v42  ;;  %v5869_v5 = vsel %vm602_vm1, %v649_v19, %v651_v8  ;;  %v5874_v34 = vsel %vm290_vm0, %v321_v54, 0.0  ;;  %v327_v59 = vrot.slane %v248_v50, 7  ;;  %v250_v50 = vld [vmem:[%s5438_s8 + $0xc8] sm:$0xff] }
  0x8c   : > { %994 = vmatprep.mubr.f32.mxu0 %v5821_v3  ;;  %4408 = vmatpush1.bf16.msra.mxu0 %v4407_v35  ;;  %v5858_v35 = vsel %vm290_vm0, %v5846_v23, %v321_v54  ;;  %8649 = vst [vmem:[#allocation23_spill] sm:$0xff] %v5869_v5  ;;  %v656_v19 = vrot.slane %v5874_v34, 1  ;;  %v5888_v8 = vsel %vm290_vm0, %v5876_v13, %v324_v51  ;;  %v5892_v54 = vsel %vm290_vm0, 0.0, %v5876_v13 }
  0x8d   : > { %4409 = vmatprep.subr.bf16.mxu0 %v8645_v14  ;;  %8648 = vst [vmem:[#allocation22_spill] sm:$0xff] %v5858_v35  ;;  %v654_v3 = vrot.slane %v5858_v35, 1  ;;  %8652 = vst [vmem:[#allocation26_spill] sm:$0xff] %v5888_v8  ;;  %v659_v38 = vrot.slane %v5888_v8, 1  ;;  %v5904_v25 = vsel %vm290_vm0, %v324_v51, 0.0  ;;  %v5922_v51 = vsel %vm290_vm0, 0.0, %v5906_v12 }
  0x8e   : > { %8653 = vst [vmem:[#allocation27_spill] sm:$0xff] %v5892_v54  ;;  %8655 = vst [vmem:[#allocation29_spill] sm:$0xff] %v5904_v25  ;;  %v5934_v36 = vsel %vm290_vm0, %v327_v59, 0.0  ;;  %v330_v18 = vrot.slane %v250_v50, 7  ;;  %v252_v50 = vld [vmem:[%s5438_s8 + $0xd8] sm:$0xff] }
  0x8f   : > { %3877 = vmatmul.mubr.msk.f32.gmra.mrb[32].mxu0 %vm5481_vm2, %v5770_v10  ;;  %8659 = vst [vmem:[#allocation33_spill] sm:$0xff] %v5922_v51  ;;  %8661 = vst [vmem:[#allocation35_spill] sm:$0xff] %v5934_v36 }
  0x90   : > { %999 = vmatprep.mubr.f32.mxu0 %v5838_v46  ;;  %v653_v46 = vrot.slane %v5862_v29, 1 }
  0x93   : > { %1000 = vmatmul.mubr.f32.gmra.mrb[34].mxu0 %v5789_v37 }
  0x94   : > { %1004 = vmatprep.mubr.f32.mxu0 %v5853_v6  ;;  %v5883_v6 = vsel %vm602_vm1, %v653_v46, %v654_v3  ;;  %v5899_v46 = vsel %vm602_vm1, %v654_v3, %v656_v19  ;;  %v661_v3 = vrot.slane %v5904_v25, 1  ;;  %v5918_v19 = vsel %vm290_vm0, %v5906_v12, %v327_v59 }
  0x95   : > { %8651 = vst [vmem:[#allocation25_spill] sm:$0xff] %v5883_v6  ;;  %8654 = vst [vmem:[#allocation28_spill] sm:$0xff] %v5899_v46  ;;  %v664_v47 = vrot.slane %v5918_v19, 1  ;;  %v5952_v59 = vsel %vm290_vm0, 0.0, %v5936_v27  ;;  %v5966_v25 = vrot.slane %v251_v49, 7  ;;  %v253_v49 = vld [vmem:[%s5438_s8 + $0xe0] sm:$0xff] }
  0x96   : > { %8658 = vst [vmem:[#allocation32_spill] sm:$0xff] %v5918_v19  ;;  %8665 = vst [vmem:[#allocation39_spill] sm:$0xff] %v5952_v59 }
  0x97   : > { %3879 = vmatmul.mubr.msk.f32.gmra.mrb[36].mxu0 %vm5481_vm2, %v5814_v60  ;;  %8668 = vst [vmem:[#allocation42_spill] sm:$0xff] %v5966_v25 }
  0x98   : > { %1009 = vmatprep.mubr.f32.mxu0 %v5869_v5  ;;  %v658_v5 = vrot.slane %v5892_v54, 1  ;;  %v333_v54 = vrot.slane %v252_v50, 7  ;;  %v254_v50 = vld [vmem:[%s5438_s8 + $0xe8] sm:$0xff] }
  0x9b   : > { %1010 = vmatmul.mubr.f32.gmra.mrb[38].mxu0 %v5827_v17 }
  0x9c   : > { %1014 = vmatprep.mubr.f32.mxu0 %v5883_v6  ;;  %v5913_v6 = vsel %vm602_vm1, %v658_v5, %v659_v38  ;;  %v5929_v5 = vsel %vm602_vm1, %v659_v38, %v661_v3  ;;  %v666_v38 = vrot.slane %v5934_v36, 1  ;;  %v5948_v3 = vsel %vm290_vm0, %v5936_v27, %v330_v18 }
  0x9d   : > { %8657 = vst [vmem:[#allocation31_spill] sm:$0xff] %v5913_v6  ;;  %8660 = vst [vmem:[#allocation34_spill] sm:$0xff] %v5929_v5  ;;  %v669_v36 = vrot.slane %v5948_v3, 1 }
  0x9e   : > { %8664 = vst [vmem:[#allocation38_spill] sm:$0xff] %v5948_v3 }
  0x9f   : > { %3881 = vmatmul.mubr.msk.f32.gmra.mrb[40].mxu0 %vm5481_vm2, %v5846_v23 }
  0xa0   : > { %1019 = vmatprep.mubr.f32.mxu0 %v5899_v46  ;;  %v663_v46 = vrot.slane %v5922_v51, 1  ;;  %v5964_v51 = vsel %vm290_vm0, %v330_v18, 0.0  ;;  %v5982_v18 = vsel %vm290_vm0, 0.0, %v5966_v25 }
  0xa1   : > { %8667 = vst [vmem:[#allocation41_spill] sm:$0xff] %v5964_v51 }
  0xa3   : > { %1020 = vmatmul.mubr.f32.gmra.mrb[42].mxu0 %v5858_v35 }
  0xa4   : > { %1024 = vmatprep.mubr.f32.mxu0 %v5913_v6  ;;  %v5943_v6 = vsel %vm602_vm1, %v663_v46, %v664_v47  ;;  %v5959_v46 = vsel %vm602_vm1, %v664_v47, %v666_v38  ;;  %v671_v47 = vrot.slane %v5964_v51, 1  ;;  %v5978_v38 = vsel %vm290_vm0, %v5966_v25, %v333_v54 }
  0xa5   : > { %8663 = vst [vmem:[#allocation37_spill] sm:$0xff] %v5943_v6  ;;  %8666 = vst [vmem:[#allocation40_spill] sm:$0xff] %v5959_v46  ;;  %v674_v51 = vrot.slane %v5978_v38, 1 }
  0xa6   : > { %8670 = vst [vmem:[#allocation44_spill] sm:$0xff] %v5978_v38 }
  0xa7   : > { %3883 = vmatmul.mubr.msk.f32.gmra.mrb[44].mxu0 %vm5481_vm2, %v5876_v13 }
  0xa8   : > { %1029 = vmatprep.mubr.f32.mxu0 %v5929_v5  ;;  %v668_v5 = vrot.slane %v5952_v59, 1  ;;  %v5994_v59 = vsel %vm290_vm0, %v333_v54, 0.0 }
  0xa9   : > { %8672 = vst [vmem:[#allocation46_spill] sm:$0xff] %v5994_v59 }
  0xab   : > { %1030 = vmatmul.mubr.f32.gmra.mrb[46].mxu0 %v5888_v8  ;;  %v336_v8 = vrot.slane %v254_v50, 7 }
  0xac   : > { %1034 = vmatprep.mubr.f32.mxu0 %v5943_v6  ;;  %v5973_v6 = vsel %vm602_vm1, %v668_v5, %v669_v36  ;;  %v673_v5 = vrot.slane %v5982_v18, 1 }
  0xad   : > { %8669 = vst [vmem:[#allocation43_spill] sm:$0xff] %v5973_v6 }
  0xaf   : > { %3885 = vmatmul.mubr.msk.f32.gmra.mrb[48].mxu0 %vm5481_vm2, %v5906_v12  ;;  %v5996_v12 = vrot.slane %v253_v49, 7 }
  0xb0   : > { %1039 = vmatprep.mubr.f32.mxu0 %v5959_v46  ;;  %v5989_v46 = vsel %vm602_vm1, %v669_v36, %v671_v47  ;;  %v676_v36 = vrot.slane %v5994_v59, 1 }
  0xb1   : > { %8671 = vst [vmem:[#allocation45_spill] sm:$0xff] %v5989_v46  ;;  %8673 = vst [vmem:[#allocation47_spill] sm:$0xff] %v5996_v12  ;;  %v6008_v47 = vsel %vm290_vm0, %v5996_v12, %v336_v8  ;;  %v6012_v54 = vsel %vm290_vm0, 0.0, %v5996_v12 }
  0xb2   : > { %8675 = vst [vmem:[#allocation49_spill] sm:$0xff] %v6008_v47  ;;  %v6017_v49 = vsel %vm602_vm1, %v674_v51, %v676_v36  ;;  %v678_v50 = vrot.slane %v6012_v54, 1  ;;  %v717_v36 = vrot.slane %v5328_v7, 2  ;;  %v491_v7 = vld [vmem:[%s8420_s1 + $0x210] sm:$0xff] }
  0xb3   : > { %1040 = vmatmul.mubr.f32.gmra.mrb[50].mxu0 %v5918_v19 }
  0xb4   : > { %1044 = vmatprep.mubr.f32.mxu0 %v5973_v6  ;;  %v6003_v6 = vsel %vm602_vm1, %v673_v5, %v674_v51  ;;  %v679_v5 = vrot.slane %v6008_v47, 1 }
  0xb5   : > { %8674 = vst [vmem:[#allocation48_spill] sm:$0xff] %v6003_v6 }
  0xb6   : > { %v6029_v59 = vsel %vm602_vm1, %v678_v50, %v679_v5  ;;  %v489_v50 = vld [vmem:[%s8420_s1 + $0x200] sm:$0xff] }
  0xb7   : > { %3887 = vmatmul.mubr.msk.f32.gmra.mrb[52].mxu0 %vm5481_vm2, %v5936_v27  ;;  %8676 = vst [vmem:[#allocation50_spill] sm:$0xff] %v6029_v59 }
  0xb8   : > { %1049 = vmatprep.mubr.f32.mxu0 %v5989_v46  ;;  %v6022_v46 = vsel %vm290_vm0, %v336_v8, 0.0  ;;  %v716_v8 = vrot.slane %v5332_v9, 2 }
  0xba   : > { %v6054_v9 = vsel %vm715_vm3, %v716_v8, %v717_v36 }
  0xbb   : > { %1050 = vmatmul.mubr.f32.gmra.mrb[54].mxu0 %v5948_v3  ;;  %8678 = vst [vmem:[#allocation52_spill] sm:$0xff] %v6054_v9 }
  0xbc   : > { %1054 = vmatprep.mubr.f32.mxu0 %v6003_v6  ;;  %v681_v6 = vrot.slane %v6022_v46, 1 }
  0xbe   : > { %v6035_v51 = vsel %vm602_vm1, %v679_v5, %v681_v6  ;;  %v719_v5 = vrot.slane %v5458_v56, 2  ;;  %v722_v56 = vrot.slane %v5472_v63, 2 }
  0xbf   : > { %3889 = vmatmul.mubr.msk.f32.gmra.mrb[56].mxu0 %vm5481_vm2, %v5966_v25  ;;  %8677 = vst [vmem:[#allocation51_spill] sm:$0xff] %v6035_v51 }
  0xc0   : > { %1059 = vmatprep.mubr.f32.mxu0 %v6017_v49 }
  0xc2   : > { %v8884_v4 = vld [vmem:[#allocation52_spill] sm:$0xff] }
  0xc3   : > { %1060 = vmatmul.mubr.f32.gmra.mrb[58].mxu0 %v5978_v38 }
  0xc4   : > { %1064 = vmatprep.mubr.f32.mxu0 %v6029_v59  ;;  %v490_v59 = vld [vmem:[%s8420_s1 + $0x208] sm:$0xff] }
  0xc5   : > { %v4410_v6 = vpack.c.bf16 %v490_v59, %v489_v50  ;;  %v721_v59 = vrot.slane %v5476_v0, 2  ;;  %v493_v50 = vld [vmem:[%s8420_s1 + $0x220] sm:$0xff] }
  0xc7   : > { %3891 = vmatmul.mubr.msk.f32.gmra.mrb[60].mxu0 %vm5481_vm2, %v5996_v12  ;;  %v6082_v0 = vsel %vm715_vm3, %v721_v59, %v722_v56  ;;  %v497_v59 = vld [vmem:[%s8420_s1 + $0x240] sm:$0xff] }
  0xc8   : > { %1069 = vmatprep.mubr.f32.mxu0 %v6035_v51  ;;  %v492_v51 = vld [vmem:[%s8420_s1 + $0x218] sm:$0xff] }
  0xc9   : > { %v4413_v8 = vpack.c.bf16 %v492_v51, %v491_v7  ;;  %v724_v7 = vrot.slane %v5500_v15, 2  ;;  %v495_v51 = vld [vmem:[%s8420_s1 + $0x230] sm:$0xff] }
  0xcb   : > { %1070 = vmatmul.mubr.f32.gmra.mrb[62].mxu0 %v6008_v47 }
  0xcc   : > { %3893 = vmatprep.mubr.msk.f32.mxu0 %vm5481_vm2, %v5460_v57  ;;  %v6066_v57 = vsel %vm715_vm3, %v717_v36, %v719_v5  ;;  %v496_v36 = vld [vmem:[%s8420_s1 + $0x238] sm:$0xff]  ;;  %v6095_v5 = vsel %vm715_vm3, %v722_v56, %v724_v7  ;;  %v729_v56 = vrot.slane %v5541_v32, 2 }
  0xcd   : > { %8679 = vst [vmem:[#allocation53_spill] sm:$0xff] %v6066_v57  ;;  %v4419_v15 = vpack.c.bf16 %v496_v36, %v495_v51  ;;  %v500_v7 = vld [vmem:[%s8420_s1 + $0x258] sm:$0xff]  ;;  %v731_v51 = vrot.slane %v5566_v41, 2  ;;  %v732_v36 = vrot.slane %v5562_v40, 2 }
  0xcf   : > { %1140 = vmatmul.mubr.f32.vlgmr.msra.gmra.mrb[0].mxu0 %v6054_v9  ;;  %v6137_v41 = vsel %vm715_vm3, %v731_v51, %v732_v36  ;;  %v737_v51 = vrot.slane %v5613_v1, 2 }
  0xd0   : > { %4411 = vmatpush1.bf16.msra.mxu0 %v4410_v6  ;;  %1144 = vmatprep.mubr.f32.mxu0 %v5472_v63  ;;  %v494_v6 = vld [vmem:[%s8420_s1 + $0x228] sm:$0xff] }
  0xd1   : > { %4412 = vmatprep.subr.bf16.mxu0 %v8645_v14  ;;  %v4416_v63 = vpack.c.bf16 %v494_v6, %v493_v50  ;;  %v499_v6 = vld [vmem:[%s8420_s1 + $0x250] sm:$0xff] }
  0xd3   : > { %1145 = vmatmul.mubr.f32.gmra.mrb[2].mxu0 %v6066_v57 }
  0xd4   : > { %3895 = vmatprep.mubr.msk.f32.mxu0 %vm5481_vm2, %v5502_v16  ;;  %4414 = vmatpush1.bf16.msra.mxu0 %v4413_v8  ;;  %v498_v8 = vld [vmem:[%s8420_s1 + $0x248] sm:$0xff] }
  0xd5   : > { %4415 = vmatprep.subr.bf16.mxu0 %v8645_v14  ;;  %v4422_v50 = vpack.c.bf16 %v498_v8, %v497_v59  ;;  %v501_v59 = vld [vmem:[%s8420_s1 + $0x260] sm:$0xff]  ;;  %v502_v8 = vld [vmem:[%s8420_s1 + $0x268] sm:$0xff] }
  0xd7   : > { %1150 = vmatmul.mubr.f32.gmra.mrb[4].mxu0 %v6082_v0 }
  0xd8   : > { %1154 = vmatprep.mubr.f32.mxu0 %v5521_v22  ;;  %4417 = vmatpush1.bf16.msra.mxu0 %v4416_v63  ;;  %v8680_v63 = vrot.slane %v5521_v22, 2 }
  0xd9   : > { %4418 = vmatprep.subr.bf16.mxu0 %v8645_v14 }
  0xda   : > { %v6121_v32 = vsel %vm715_vm3, %v8680_v63, %v729_v56  ;;  %v734_v56 = vrot.slane %v5586_v52, 2  ;;  %v736_v52 = vrot.slane %v5617_v2, 2 }
  0xdb   : > { %1155 = vmatmul.mubr.f32.gmra.mrb[6].mxu0 %v6095_v5 }
  0xdc   : > { %3897 = vmatprep.mubr.msk.f32.mxu0 %vm5481_vm2, %v5543_v33  ;;  %4420 = vmatpush1.bf16.msra.mxu0 %v4419_v15  ;;  %v4425_v15 = vpack.c.bf16 %v500_v7, %v499_v6  ;;  %v503_v6 = vld [vmem:[%s8420_s1 + $0x270] sm:$0xff]  ;;  %v504_v7 = vld [vmem:[%s8420_s1 + $0x278] sm:$0xff]  ;;  %v6150_v63 = vsel %vm715_vm3, %v732_v36, %v734_v56  ;;  %v6166_v2 = vsel %vm715_vm3, %v736_v52, %v737_v51  ;;  %v739_v36 = vrot.slane %v5636_v20, 2 }
  0xdd   : > { %4421 = vmatprep.subr.bf16.mxu0 %v8645_v14  ;;  %v741_v20 = vrot.slane %v5661_v31, 2  ;;  %v742_v52 = vrot.slane %v5657_v30, 2 }
  0xdf   : > { %1160 = vmatmul.mubr.f32.gmra.mrb[8].mxu0 %v5593_v55  ;;  %v6195_v31 = vsel %vm715_vm3, %v741_v20, %v742_v52  ;;  %v747_v20 = vrot.slane %v5701_v61, 2 }
  0xe0   : > { %1164 = vmatprep.mubr.f32.mxu0 %v5562_v40  ;;  %4423 = vmatpush1.bf16.msra.mxu0 %v4422_v50  ;;  %v4428_v50 = vpack.c.bf16 %v502_v8, %v501_v59  ;;  %v505_v59 = vld [vmem:[%s8420_s1 + $0x280] sm:$0xff]  ;;  %v506_v8 = vld [vmem:[%s8420_s1 + $0x288] sm:$0xff] }
  0xe1   : > { %4424 = vmatprep.subr.bf16.mxu0 %v8645_v14  ;;  %v4434_v56 = vpack.c.bf16 %v506_v8, %v505_v59  ;;  %v509_v59 = vld [vmem:[%s8420_s1 + $0x2a0] sm:$0xff]  ;;  %v510_v8 = vld [vmem:[%s8420_s1 + $0x2a8] sm:$0xff] }
  0xe3   : > { %1165 = vmatmul.mubr.f32.gmra.mrb[10].mxu0 %v6121_v32 }
  0xe4   : > { %3899 = vmatprep.mubr.msk.f32.mxu0 %vm5481_vm2, %v5588_v53  ;;  %4426 = vmatpush1.bf16.msra.mxu0 %v4425_v15  ;;  %v4431_v15 = vpack.c.bf16 %v504_v7, %v503_v6  ;;  %v508_v6 = vld [vmem:[%s8420_s1 + $0x298] sm:$0xff]  ;;  %v6179_v7 = vsel %vm715_vm3, %v737_v51, %v739_v36  ;;  %v744_v51 = vrot.slane %v5680_v45, 2  ;;  %v4440_v36 = vpack.c.bf16 %v510_v8, %v509_v59  ;;  %v513_v59 = vld [vmem:[%s8420_s1 + $0x2c0] sm:$0xff]  ;;  %v514_v8 = vld [vmem:[%s8420_s1 + $0x2c8] sm:$0xff] }
  0xe5   : > { %4427 = vmatprep.subr.bf16.mxu0 %v8645_v14  ;;  %v746_v45 = vrot.slane %v5705_v62, 2 }
  0xe7   : > { %1170 = vmatmul.mubr.f32.gmra.mrb[12].mxu0 %v6137_v41  ;;  %v6224_v62 = vsel %vm715_vm3, %v746_v45, %v747_v20  ;;  %v752_v45 = vrot.slane %v5745_v42, 2 }
  0xe8   : > { %1174 = vmatprep.mubr.f32.mxu0 %v5613_v1  ;;  %4429 = vmatpush1.bf16.msra.mxu0 %v4428_v50  ;;  %v507_v50 = vld [vmem:[%s8420_s1 + $0x290] sm:$0xff] }
  0xe9   : > { %4430 = vmatprep.subr.bf16.mxu0 %v8645_v14 }
  0xeb   : > { %1175 = vmatmul.mubr.f32.gmra.mrb[14].mxu0 %v6150_v63 }
  0xec   : > { %3901 = vmatprep.mubr.msk.f32.mxu0 %vm5481_vm2, %v5638_v21  ;;  %4432 = vmatpush1.bf16.msra.mxu0 %v4431_v15  ;;  %v4437_v15 = vpack.c.bf16 %v508_v6, %v507_v50  ;;  %v512_v50 = vld [vmem:[%s8420_s1 + $0x2b8] sm:$0xff]  ;;  %v6208_v6 = vsel %vm715_vm3, %v742_v52, %v744_v51  ;;  %v749_v52 = vrot.slane %v5724_v24, 2  ;;  %v4446_v51 = vpack.c.bf16 %v514_v8, %v513_v59  ;;  %v517_v59 = vld [vmem:[%s8420_s1 + $0x2e0] sm:$0xff]  ;;  %v518_v8 = vld [vmem:[%s8420_s1 + $0x2e8] sm:$0xff] }
  0xed   : > { %4433 = vmatprep.subr.bf16.mxu0 %v8645_v14  ;;  %v751_v24 = vrot.slane %v5749_v43, 2 }
  0xef   : > { %1180 = vmatmul.mubr.f32.gmra.mrb[16].mxu0 %v6166_v2  ;;  %v6253_v43 = vsel %vm715_vm3, %v751_v24, %v752_v45  ;;  %v757_v24 = vrot.slane %v5789_v37, 2 }
  0xf0   : > { %1184 = vmatprep.mubr.f32.mxu0 %v5657_v30  ;;  %4435 = vmatpush1.bf16.msra.mxu0 %v4434_v56  ;;  %v511_v56 = vld [vmem:[%s8420_s1 + $0x2b0] sm:$0xff] }
  0xf1   : > { %4436 = vmatprep.subr.bf16.mxu0 %v8645_v14 }
  0xf3   : > { %1185 = vmatmul.mubr.f32.gmra.mrb[18].mxu0 %v6179_v7 }
  0xf4   : > { %3903 = vmatprep.mubr.msk.f32.mxu0 %vm5481_vm2, %v5682_v48  ;;  %4438 = vmatpush1.bf16.msra.mxu0 %v4437_v15  ;;  %v4443_v15 = vpack.c.bf16 %v512_v50, %v511_v56  ;;  %v516_v56 = vld [vmem:[%s8420_s1 + $0x2d8] sm:$0xff]  ;;  %v6237_v50 = vsel %vm715_vm3, %v747_v20, %v749_v52  ;;  %v754_v20 = vrot.slane %v5768_v11, 2  ;;  %v4452_v52 = vpack.c.bf16 %v518_v8, %v517_v59 }
  0xf5   : > { %4439 = vmatprep.subr.bf16.mxu0 %v8645_v14  ;;  %v756_v11 = vrot.slane %v5793_v39, 2  ;;  %v761_v8 = vrot.slane %v5831_v44, 2  ;;  %v766_v44 = vrot.slane %v5862_v29, 2  ;;  %v8682_v29 = vld [vmem:[#allocation27_spill] sm:$0xff] }
  0xf7   : > { %1190 = vmatmul.mubr.f32.gmra.mrb[20].mxu0 %v6195_v31  ;;  %v6276_v59 = vsel %vm715_vm3, %v756_v11, %v757_v24 }
  0xf8   : > { %1194 = vmatprep.mubr.f32.mxu0 %v5701_v61  ;;  %4441 = vmatpush1.bf16.msra.mxu0 %v4440_v36  ;;  %v515_v36 = vld [vmem:[%s8420_s1 + $0x2d0] sm:$0xff] }
  0xf9   : > { %4442 = vmatprep.subr.bf16.mxu0 %v8645_v14 }
  0xfb   : > { %1195 = vmatmul.mubr.f32.gmra.mrb[22].mxu0 %v6208_v6 }
  0xfc   : > { %3905 = vmatprep.mubr.msk.f32.mxu0 %vm5481_vm2, %v5726_v26  ;;  %4444 = vmatpush1.bf16.msra.mxu0 %v4443_v15  ;;  %v4449_v15 = vpack.c.bf16 %v516_v56, %v515_v36  ;;  %v520_v36 = vld [vmem:[%s8420_s1 + $0x2f8] sm:$0xff]  ;;  %v6266_v56 = vsel %vm715_vm3, %v752_v45, %v754_v20  ;;  %v759_v45 = vrot.slane %v5812_v28, 2  ;;  %v762_v20 = vrot.slane %v5827_v17, 2 }
  0xfd   : > { %4445 = vmatprep.subr.bf16.mxu0 %v8645_v14 }
  0xfe   : > { %v6283_v39 = vsel %vm715_vm3, %v757_v24, %v759_v45  ;;  %v6292_v28 = vsel %vm715_vm3, %v761_v8, %v762_v20  ;;  %v8681_v24 = vld [vmem:[#allocation26_spill] sm:$0xff]  ;;  %v771_v45 = vrot.slane %v8682_v29, 2 }
  0xff   : > { %1200 = vmatmul.mubr.f32.gmra.mrb[24].mxu0 %v6224_v62  ;;  %v772_v8 = vrot.slane %v8681_v24, 2 }
 0x100   : > { %1204 = vmatprep.mubr.f32.mxu0 %v5745_v42  ;;  %4447 = vmatpush1.bf16.msra.mxu0 %v4446_v51  ;;  %v519_v51 = vld [vmem:[%s8420_s1 + $0x2f0] sm:$0xff] }
 0x101   : > { %4448 = vmatprep.subr.bf16.mxu0 %v8645_v14 }
 0x103   : > { %1205 = vmatmul.mubr.f32.gmra.mrb[26].mxu0 %v6237_v50 }
 0x104   : > { %3907 = vmatprep.mubr.msk.f32.mxu0 %vm5481_vm2, %v5770_v10  ;;  %4450 = vmatpush1.bf16.msra.mxu0 %v4449_v15  ;;  %v4455_v15 = vpack.c.bf16 %v520_v36, %v519_v51  ;;  %v767_v36 = vrot.slane %v5858_v35, 2 }
 0x105   : > { %4451 = vmatprep.subr.bf16.mxu0 %v8645_v14 }
 0x106   : > { %v6307_v11 = vsel %vm715_vm3, %v766_v44, %v767_v36 }
 0x107   : > { %1210 = vmatmul.mubr.f32.gmra.mrb[28].mxu0 %v6253_v43 }
 0x108   : > { %1214 = vmatprep.mubr.f32.mxu0 %v5789_v37  ;;  %4453 = vmatpush1.bf16.msra.mxu0 %v4452_v52  ;;  %v764_v52 = vrot.slane %v5844_v58, 2  ;;  %v769_v58 = vrot.slane %v5874_v34, 2  ;;  %v8684_v34 = vld [vmem:[#allocation29_spill] sm:$0xff] }
 0x109   : > { %4454 = vmatprep.subr.bf16.mxu0 %v8645_v14  ;;  %v774_v44 = vrot.slane %v8684_v34, 2  ;;  %v8686_v34 = vld [vmem:[#allocation35_spill] sm:$0xff] }
 0x10a   : > { %v6298_v51 = vsel %vm715_vm3, %v762_v20, %v764_v52  ;;  %v8683_v20 = vld [vmem:[#allocation30_spill] sm:$0xff]  ;;  %v6322_v52 = vsel %vm715_vm3, %v771_v45, %v772_v8 }
 0x10b   : > { %1215 = vmatmul.mubr.f32.gmra.mrb[30].mxu0 %v6266_v56 }
 0x10c   : > { %3909 = vmatprep.mubr.msk.f32.mxu0 %vm5481_vm2, %v5814_v60  ;;  %4456 = vmatpush1.bf16.msra.mxu0 %v4455_v15  ;;  %v6313_v15 = vsel %vm715_vm3, %v767_v36, %v769_v58  ;;  %v6328_v36 = vsel %vm715_vm3, %v772_v8, %v774_v44  ;;  %v8685_v58 = vld [vmem:[#allocation33_spill] sm:$0xff]  ;;  %v553_v8 = vld [vmem:[%s8420_s1 + $0x400] sm:$0xff]  ;;  %v554_v44 = vld [vmem:[%s8420_s1 + $0x408] sm:$0xff] }
 0x10d   : > { %4457 = vmatprep.subr.bf16.mxu0 %v8645_v14  ;;  %v776_v29 = vrot.slane %v8685_v58, 2  ;;  %v4505_v58 = vpack.c.bf16 %v554_v44, %v553_v8  ;;  %v556_v8 = vld [vmem:[%s8420_s1 + $0x418] sm:$0xff] }
 0x10f   : > { %1220 = vmatmul.mubr.f32.gmra.mrb[32].mxu0 %v6276_v59  ;;  %4506 = vmatprep.subr.bf16.mxu1 %v4505_v58 }
 0x110   : > { %1224 = vmatprep.mubr.f32.mxu0 %v5827_v17  ;;  %4508 = vmatpush3.bf16.msra.mxu1 %v4505_v58 }
 0x113   : > { %1225 = vmatmul.mubr.f32.gmra.mrb[34].mxu0 %v6283_v39 }
 0x114   : > { %3911 = vmatprep.mubr.msk.f32.mxu0 %vm5481_vm2, %v5846_v23 }
 0x117   : > { %1230 = vmatmul.mubr.f32.gmra.mrb[36].mxu0 %v6292_v28 }
 0x118   : > { %1234 = vmatprep.mubr.f32.mxu0 %v5858_v35 }
 0x11b   : > { %1235 = vmatmul.mubr.f32.gmra.mrb[38].mxu0 %v6298_v51 }
 0x11c   : > { %3913 = vmatprep.mubr.msk.f32.mxu0 %vm5481_vm2, %v5876_v13  ;;  %v555_v13 = vld [vmem:[%s8420_s1 + $0x410] sm:$0xff] }
 0x11d   : > { %v4509_v44 = vpack.c.bf16 %v556_v8, %v555_v13  ;;  %v558_v13 = vld [vmem:[%s8420_s1 + $0x428] sm:$0xff] }
 0x11f   : > { %1240 = vmatmul.mubr.f32.gmra.mrb[40].mxu0 %v6307_v11  ;;  %4510 = vmatprep.subr.bf16.mxu1 %v4509_v44 }
 0x120   : > { %1244 = vmatprep.mubr.f32.mxu0 %v8681_v24  ;;  %v777_v24 = vrot.slane %v5918_v19, 2  ;;  %4512 = vmatpush3.bf16.msra.mxu1 %v4509_v44  ;;  %v787_v44 = vrot.slane %v5978_v38, 2 }
 0x122   : > { %v6337_v45 = vsel %vm715_vm3, %v776_v29, %v777_v24  ;;  %v8687_v29 = vld [vmem:[#allocation39_spill] sm:$0xff] }
 0x123   : > { %1245 = vmatmul.mubr.f32.gmra.mrb[42].mxu0 %v6313_v15 }
 0x124   : > { %3915 = vmatprep.mubr.msk.f32.mxu0 %vm5481_vm2, %v8683_v20  ;;  %v779_v20 = vrot.slane %v8686_v34, 2  ;;  %v782_v34 = vrot.slane %v5948_v3, 2 }
 0x127   : > { %1250 = vmatmul.mubr.f32.gmra.mrb[44].mxu0 %v6322_v52 }
 0x128   : > { %1254 = vmatprep.mubr.f32.mxu0 %v5918_v19  ;;  %v781_v19 = vrot.slane %v8687_v29, 2  ;;  %v557_v29 = vld [vmem:[%s8420_s1 + $0x420] sm:$0xff] }
 0x129   : > { %v4513_v8 = vpack.c.bf16 %v558_v13, %v557_v29  ;;  %v560_v29 = vld [vmem:[%s8420_s1 + $0x438] sm:$0xff] }
 0x12b   : > { %1255 = vmatmul.mubr.f32.gmra.mrb[46].mxu0 %v6328_v36  ;;  %4514 = vmatprep.subr.bf16.mxu1 %v4513_v8 }
 0x12c   : > { %3917 = vmatprep.mubr.msk.f32.mxu0 %vm5481_vm2, %v5936_v27  ;;  %v6349_v27 = vsel %vm715_vm3, %v777_v24, %v779_v20  ;;  %v6364_v24 = vsel %vm715_vm3, %v781_v19, %v782_v34  ;;  %v8688_v20 = vld [vmem:[#allocation41_spill] sm:$0xff]  ;;  %4516 = vmatpush3.bf16.msra.mxu1 %v4513_v8  ;;  %v255_v8 = vld [vmem:[%s5438_s8 + $0xf0] sm:$0xff] }
 0x12d   : > { %v784_v58 = vrot.slane %v8688_v20, 2  ;;  %v786_v20 = vrot.slane %v5982_v18, 2 }
 0x12f   : > { %1260 = vmatmul.mubr.f32.gmra.mrb[48].mxu0 %v6337_v45  ;;  %v6376_v19 = vsel %vm715_vm3, %v782_v34, %v784_v58  ;;  %v6391_v18 = vsel %vm715_vm3, %v786_v20, %v787_v44  ;;  %v8689_v34 = vld [vmem:[#allocation46_spill] sm:$0xff] }
 0x130   : > { %1264 = vmatprep.mubr.f32.mxu0 %v5948_v3  ;;  %v789_v58 = vrot.slane %v8689_v34, 2  ;;  %v6409_v34 = vrot.slane %v255_v8, 7  ;;  %v565_v8 = vld [vmem:[%s8420_s1 + $0x460] sm:$0xff] }
 0x132   : > { %v6407_v20 = vsel %vm715_vm3, %v787_v44, %v789_v58  ;;  %8690 = vst [vmem:[#allocation27_spill] sm:$0xff] %v6409_v34 }
 0x133   : > { %1265 = vmatmul.mubr.f32.gmra.mrb[50].mxu0 %v6349_v27 }
 0x134   : > { %3919 = vmatprep.mubr.msk.f32.mxu0 %vm5481_vm2, %v5966_v25  ;;  %v559_v25 = vld [vmem:[%s8420_s1 + $0x430] sm:$0xff] }
 0x135   : > { %v4517_v13 = vpack.c.bf16 %v560_v29, %v559_v25  ;;  %v562_v25 = vld [vmem:[%s8420_s1 + $0x448] sm:$0xff]  ;;  %v6402_v29 = vld [vmem:[%s5438_s8 + $0xf8] sm:$0xff] }
 0x136   : > { %v8510_v35 = vrot.slane %v6402_v29, 7 }
 0x137   : > { %1270 = vmatmul.mubr.f32.gmra.mrb[52].mxu0 %v6364_v24  ;;  %4518 = vmatprep.subr.bf16.mxu1 %v4517_v13 }
 0x138   : > { %1274 = vmatprep.mubr.f32.mxu0 %v5978_v38  ;;  %4520 = vmatpush3.bf16.msra.mxu1 %v4517_v13  ;;  %v561_v38 = vld [vmem:[%s8420_s1 + $0x440] sm:$0xff]  ;;  %v791_v13 = vrot.slane %v6012_v54, 2  ;;  %v6432_v58 = vsel %vm290_vm0, %v6409_v34, %v8510_v35  ;;  %v523_v35 = vld [vmem:[%s8420_s1 + $0x310] sm:$0xff] }
 0x139   : > { %v4521_v3 = vpack.c.bf16 %v562_v25, %v561_v38  ;;  %v563_v38 = vld [vmem:[%s8420_s1 + $0x450] sm:$0xff]  ;;  %v564_v25 = vld [vmem:[%s8420_s1 + $0x458] sm:$0xff] }
 0x13a   : > { %v4525_v44 = vpack.c.bf16 %v564_v25, %v563_v38  ;;  %v566_v38 = vld [vmem:[%s8420_s1 + $0x468] sm:$0xff]  ;;  %v521_v25 = vld [vmem:[%s8420_s1 + $0x300] sm:$0xff] }
 0x13b   : > { %1275 = vmatmul.mubr.f32.gmra.mrb[54].mxu0 %v6376_v19  ;;  %4522 = vmatprep.subr.bf16.mxu1 %v4521_v3 }
 0x13c   : > { %3921 = vmatprep.mubr.msk.f32.mxu0 %vm5481_vm2, %v5996_v12  ;;  %v792_v12 = vrot.slane %v6008_v47, 2  ;;  %4524 = vmatpush3.bf16.msra.mxu1 %v4521_v3  ;;  %v794_v3 = vrot.slane %v6022_v46, 2 }
 0x13d   : > { %4526 = vmatprep.subr.bf16.mxu1 %v4525_v44 }
 0x13e   : > { %v6425_v54 = vsel %vm715_vm3, %v791_v13, %v792_v12  ;;  %v4529_v13 = vpack.c.bf16 %v566_v38, %v565_v8  ;;  %v6443_v46 = vsel %vm715_vm3, %v792_v12, %v794_v3  ;;  %v567_v8 = vld [vmem:[%s8420_s1 + $0x470] sm:$0xff]  ;;  %v568_v38 = vld [vmem:[%s8420_s1 + $0x478] sm:$0xff] }
 0x13f   : > { %1280 = vmatmul.mubr.f32.gmra.mrb[56].mxu0 %v6391_v18  ;;  %v4533_v12 = vpack.c.bf16 %v568_v38, %v567_v8  ;;  %v8693_v38 = vld [vmem:[#allocation7_spill] sm:$0xff] }
 0x140   : > { %1284 = vmatprep.mubr.f32.mxu0 %v6008_v47  ;;  %4528 = vmatpush3.bf16.msra.mxu1 %v4525_v44  ;;  %v522_v44 = vld [vmem:[%s8420_s1 + $0x308] sm:$0xff]  ;;  %v8691_v47 = vld [vmem:[#allocation5_spill] sm:$0xff] }
 0x141   : > { %4530 = vmatprep.subr.bf16.mxu1 %v4529_v13  ;;  %v4458_v3 = vpack.c.bf16 %v522_v44, %v521_v25  ;;  %v526_v25 = vld [vmem:[%s8420_s1 + $0x328] sm:$0xff]  ;;  %v8692_v44 = vld [vmem:[#allocation6_spill] sm:$0xff] }
 0x143   : > { %1285 = vmatmul.mubr.f32.gmra.mrb[58].mxu0 %v6407_v20 }
 0x144   : > { %3923 = vmatprep.mubr.msk.f32.mxu0 %vm5481_vm2, %v6409_v34  ;;  %4532 = vmatpush3.bf16.msra.mxu1 %v4529_v13  ;;  %v524_v13 = vld [vmem:[%s8420_s1 + $0x318] sm:$0xff] }
 0x145   : > { %4534 = vmatprep.subr.bf16.mxu1 %v4533_v12  ;;  %v4461_v8 = vpack.c.bf16 %v524_v13, %v523_v35  ;;  %v8694_v13 = vld [vmem:[#allocation8_spill] sm:$0xff] }
 0x147   : > { %1290 = vmatmul.mubr.f32.gmra.mrb[60].mxu0 %v6425_v54 }
 0x148   : > { %1294 = vmatprep.mubr.f32.mxu0 %v6432_v58  ;;  %4536 = vmatpush3.bf16.msra.mxu1 %v4533_v12  ;;  %v529_v12 = vld [vmem:[%s8420_s1 + $0x340] sm:$0xff] }
 0x149   : > { %4537 = vmatprep.subr.bf16.mxu1 %v8645_v14 }
 0x14b   : > { %1295 = vmatmul.mubr.f32.gmra.mrb[62].mxu0 %v6443_v46  ;;  %4186 = vmatmul.mubr.f32.vlgmr.msra.gmra.mrb[0].mxu1 %v6121_v32 }
 0x14c   : > { %1364 = vmatprep.mubr.f32.mxu0 %v6082_v0  ;;  %v525_v0 = vld [vmem:[%s8420_s1 + $0x320] sm:$0xff]  ;;  %4188 = vmatprep.mubr.f32.mxu1 %v6137_v41 }
 0x14d   : > { %v4464_v35 = vpack.c.bf16 %v526_v25, %v525_v0  ;;  %v532_v0 = vld [vmem:[%s8420_s1 + $0x358] sm:$0xff] }
 0x14e   : > { %v8695_v25 = vld [vmem:[#allocation9_spill] sm:$0xff] }
 0x14f   : > { %1365 = vmatmul.mubr.f32.vlgmr.msra.gmra.mrb[0].mxu0 %v8691_v47  ;;  %v527_v47 = vld [vmem:[%s8420_s1 + $0x330] sm:$0xff]  ;;  %4189 = vmatmul.mubr.f32.gmra.mrb[2].mxu1 %v6150_v63 }
 0x150   : > { %4459 = vmatpush1.bf16.msra.mxu0 %v4458_v3  ;;  %1369 = vmatprep.mubr.f32.mxu0 %v6095_v5  ;;  %v528_v5 = vld [vmem:[%s8420_s1 + $0x338] sm:$0xff]  ;;  %v530_v3 = vld [vmem:[%s8420_s1 + $0x348] sm:$0xff] }
 0x151   : > { %4460 = vmatprep.subr.bf16.mxu0 %v8645_v14  ;;  %4191 = vmatprep.mubr.f32.mxu1 %v6166_v2 }
 0x153   : > { %1370 = vmatmul.mubr.f32.gmra.mrb[2].mxu0 %v8692_v44  ;;  %4192 = vmatmul.mubr.f32.gmra.mrb[4].mxu1 %v6179_v7  ;;  %v533_v44 = vld [vmem:[%s8420_s1 + $0x360] sm:$0xff] }
 0x154   : > { %1374 = vmatprep.mubr.f32.mxu0 %v5593_v55  ;;  %4462 = vmatpush1.bf16.msra.mxu0 %v4461_v8  ;;  %v4467_v55 = vpack.c.bf16 %v528_v5, %v527_v47  ;;  %v531_v8 = vld [vmem:[%s8420_s1 + $0x350] sm:$0xff]  ;;  %v8696_v47 = vld [vmem:[#allocation10_spill] sm:$0xff] }
 0x155   : > { %4463 = vmatprep.subr.bf16.mxu0 %v8645_v14  ;;  %4194 = vmatprep.mubr.f32.mxu1 %v6195_v31  ;;  %v535_v5 = vld [vmem:[%s8420_s1 + $0x370] sm:$0xff] }
 0x157   : > { %1375 = vmatmul.mubr.f32.gmra.mrb[4].mxu0 %v8693_v38  ;;  %4195 = vmatmul.mubr.f32.gmra.mrb[6].mxu1 %v6208_v6 }
 0x158   : > { %1379 = vmatprep.mubr.f32.mxu0 %v6121_v32  ;;  %4465 = vmatpush1.bf16.msra.mxu0 %v4464_v35  ;;  %v4470_v32 = vpack.c.bf16 %v530_v3, %v529_v12  ;;  %v534_v35 = vld [vmem:[%s8420_s1 + $0x368] sm:$0xff]  ;;  %v537_v3 = vld [vmem:[%s8420_s1 + $0x380] sm:$0xff] }
 0x159   : > { %4466 = vmatprep.subr.bf16.mxu0 %v8645_v14  ;;  %4197 = vmatprep.mubr.f32.mxu1 %v6224_v62  ;;  %v8697_v12 = vld [vmem:[#allocation11_spill] sm:$0xff] }
 0x15b   : > { %1380 = vmatmul.mubr.f32.gmra.mrb[6].mxu0 %v8694_v13  ;;  %4198 = vmatmul.mubr.f32.gmra.mrb[8].mxu1 %v6237_v50 }
 0x15c   : > { %1384 = vmatprep.mubr.f32.mxu0 %v6137_v41  ;;  %4468 = vmatpush1.bf16.msra.mxu0 %v4467_v55  ;;  %v4473_v41 = vpack.c.bf16 %v532_v0, %v531_v8  ;;  %v536_v55 = vld [vmem:[%s8420_s1 + $0x378] sm:$0xff]  ;;  %v8698_v8 = vld [vmem:[#allocation12_spill] sm:$0xff] }
 0x15d   : > { %4469 = vmatprep.subr.bf16.mxu0 %v8645_v14  ;;  %4200 = vmatprep.mubr.f32.mxu1 %v6253_v43  ;;  %v539_v0 = vld [vmem:[%s8420_s1 + $0x390] sm:$0xff] }
 0x15f   : > { %1385 = vmatmul.mubr.f32.gmra.mrb[8].mxu0 %v8695_v25  ;;  %4201 = vmatmul.mubr.f32.gmra.mrb[10].mxu1 %v6266_v56 }
 0x160   : > { %1389 = vmatprep.mubr.f32.mxu0 %v6150_v63  ;;  %4471 = vmatpush1.bf16.msra.mxu0 %v4470_v32  ;;  %v4476_v63 = vpack.c.bf16 %v534_v35, %v533_v44  ;;  %v538_v32 = vld [vmem:[%s8420_s1 + $0x388] sm:$0xff]  ;;  %v8699_v44 = vld [vmem:[#allocation13_spill] sm:$0xff]  ;;  %v541_v35 = vld [vmem:[%s8420_s1 + $0x3a0] sm:$0xff] }
 0x161   : > { %4472 = vmatprep.subr.bf16.mxu0 %v8645_v14  ;;  %4203 = vmatprep.mubr.f32.mxu1 %v6276_v59 }
 0x163   : > { %1390 = vmatmul.mubr.f32.gmra.mrb[10].mxu0 %v8696_v47  ;;  %4204 = vmatmul.mubr.f32.gmra.mrb[12].mxu1 %v6283_v39 }
 0x164   : > { %1394 = vmatprep.mubr.f32.mxu0 %v6166_v2  ;;  %4474 = vmatpush1.bf16.msra.mxu0 %v4473_v41  ;;  %v4479_v2 = vpack.c.bf16 %v536_v55, %v535_v5  ;;  %v540_v41 = vld [vmem:[%s8420_s1 + $0x398] sm:$0xff]  ;;  %v8700_v5 = vld [vmem:[#allocation14_spill] sm:$0xff]  ;;  %v543_v55 = vld [vmem:[%s8420_s1 + $0x3b0] sm:$0xff] }
 0x165   : > { %4475 = vmatprep.subr.bf16.mxu0 %v8645_v14  ;;  %4206 = vmatprep.mubr.f32.mxu1 %v6292_v28 }
 0x167   : > { %1395 = vmatmul.mubr.f32.gmra.mrb[12].mxu0 %v8697_v12  ;;  %4207 = vmatmul.mubr.f32.gmra.mrb[14].mxu1 %v6298_v51 }
 0x168   : > { %1399 = vmatprep.mubr.f32.mxu0 %v6179_v7  ;;  %4477 = vmatpush1.bf16.msra.mxu0 %v4476_v63  ;;  %v4482_v7 = vpack.c.bf16 %v538_v32, %v537_v3  ;;  %v542_v63 = vld [vmem:[%s8420_s1 + $0x3a8] sm:$0xff]  ;;  %v545_v32 = vld [vmem:[%s8420_s1 + $0x3c0] sm:$0xff] }
 0x169   : > { %4478 = vmatprep.subr.bf16.mxu0 %v8645_v14  ;;  %4209 = vmatprep.mubr.f32.mxu1 %v6307_v11  ;;  %v8701_v3 = vld [vmem:[#allocation15_spill] sm:$0xff] }
 0x16b   : > { %1400 = vmatmul.mubr.f32.gmra.mrb[14].mxu0 %v8698_v8  ;;  %4210 = vmatmul.mubr.f32.gmra.mrb[16].mxu1 %v6313_v15 }
 0x16c   : > { %1404 = vmatprep.mubr.f32.mxu0 %v6195_v31  ;;  %4480 = vmatpush1.bf16.msra.mxu0 %v4479_v2  ;;  %v4485_v31 = vpack.c.bf16 %v540_v41, %v539_v0  ;;  %v544_v2 = vld [vmem:[%s8420_s1 + $0x3b8] sm:$0xff]  ;;  %v8702_v0 = vld [vmem:[#allocation16_spill] sm:$0xff] }
 0x16d   : > { %4481 = vmatprep.subr.bf16.mxu0 %v8645_v14  ;;  %4212 = vmatprep.mubr.f32.mxu1 %v6322_v52  ;;  %v547_v41 = vld [vmem:[%s8420_s1 + $0x3d0] sm:$0xff] }
 0x16f   : > { %1405 = vmatmul.mubr.f32.gmra.mrb[16].mxu0 %v8699_v44  ;;  %4213 = vmatmul.mubr.f32.gmra.mrb[18].mxu1 %v6328_v36 }
 0x170   : > { %1409 = vmatprep.mubr.f32.mxu0 %v6208_v6  ;;  %4483 = vmatpush1.bf16.msra.mxu0 %v4482_v7  ;;  %v4488_v6 = vpack.c.bf16 %v542_v63, %v541_v35  ;;  %v546_v7 = vld [vmem:[%s8420_s1 + $0x3c8] sm:$0xff]  ;;  %v6599_v35 = vsel %vm290_vm0, 0.0, %v6409_v34  ;;  %v8709_v34 = vld [vmem:[#allocation21_spill] sm:$0xff] }
 0x171   : > { %4484 = vmatprep.subr.bf16.mxu0 %v8645_v14  ;;  %4215 = vmatprep.mubr.f32.mxu1 %v6337_v45 }
 0x173   : > { %1410 = vmatmul.mubr.f32.gmra.mrb[18].mxu0 %v8700_v5  ;;  %4216 = vmatmul.mubr.f32.gmra.mrb[20].mxu1 %v6349_v27 }
 0x174   : > { %1414 = vmatprep.mubr.f32.mxu0 %v6224_v62  ;;  %4486 = vmatpush1.bf16.msra.mxu0 %v4485_v31  ;;  %v4491_v62 = vpack.c.bf16 %v544_v2, %v543_v55  ;;  %v548_v31 = vld [vmem:[%s8420_s1 + $0x3d8] sm:$0xff]  ;;  %v550_v55 = vld [vmem:[%s8420_s1 + $0x3e8] sm:$0xff]  ;;  %v837_v2 = vrot.slane %v6599_v35, 2 }
 0x175   : > { %4487 = vmatprep.subr.bf16.mxu0 %v8645_v14  ;;  %4218 = vmatprep.mubr.f32.mxu1 %v6364_v24  ;;  %v4497_v63 = vpack.c.bf16 %v548_v31, %v547_v41 }
 0x177   : > { %1415 = vmatmul.mubr.f32.gmra.mrb[20].mxu0 %v8701_v3  ;;  %4219 = vmatmul.mubr.f32.gmra.mrb[22].mxu1 %v6376_v19 }
 0x178   : > { %1419 = vmatprep.mubr.f32.mxu0 %v6237_v50  ;;  %4489 = vmatpush1.bf16.msra.mxu0 %v4488_v6  ;;  %v4494_v50 = vpack.c.bf16 %v546_v7, %v545_v32  ;;  %v549_v6 = vld [vmem:[%s8420_s1 + $0x3e0] sm:$0xff]  ;;  %v8704_v32 = vrot.slane %v6402_v29, 7  ;;  %v551_v29 = vld [vmem:[%s8420_s1 + $0x3f0] sm:$0xff] }
 0x179   : > { %4490 = vmatprep.subr.bf16.mxu0 %v8645_v14  ;;  %4221 = vmatprep.mubr.f32.mxu1 %v6391_v18  ;;  %v8705_v7 = vld [vmem:[#allocation18_spill] sm:$0xff] }
 0x17b   : > { %1420 = vmatmul.mubr.f32.gmra.mrb[22].mxu0 %v8702_v0  ;;  %4222 = vmatmul.mubr.f32.gmra.mrb[24].mxu1 %v6407_v20 }
 0x17c   : > { %1424 = vmatprep.mubr.f32.mxu0 %v6253_v43  ;;  %4492 = vmatpush1.bf16.msra.mxu0 %v4491_v62  ;;  %v8703_v43 = vld [vmem:[#allocation17_spill] sm:$0xff]  ;;  %v838_v62 = vrot.slane %v6432_v58, 2 }
 0x17d   : > { %4493 = vmatprep.subr.bf16.mxu0 %v8645_v14  ;;  %4224 = vmatprep.mubr.f32.mxu1 %v6425_v54 }
 0x17e   : > { %v839_v31 = vsel %vm715_vm3, %v837_v2, %v838_v62  ;;  %v8708_v2 = vld [vmem:[#allocation3_spill] sm:$0xff] }
 0x17f   : > { %1425 = vmatmul.mubr.f32.gmra.mrb[24].mxu0 %v8703_v43  ;;  %4225 = vmatmul.mubr.f32.gmra.mrb[26].mxu1 %v6443_v46 }
 0x180   : > { %1429 = vmatprep.mubr.f32.mxu0 %v6266_v56  ;;  %4495 = vmatpush1.bf16.msra.mxu0 %v4494_v50  ;;  %v6616_v56 = vsel %vm290_vm0, %v8704_v32, 0.0  ;;  %v4500_v50 = vpack.c.bf16 %v550_v55, %v549_v6  ;;  %v552_v32 = vld [vmem:[%s8420_s1 + $0x3f8] sm:$0xff]  ;;  %v8707_v55 = vld [vmem:[#allocation20_spill] sm:$0xff] }
 0x181   : > { %4496 = vmatprep.subr.bf16.mxu0 %v8645_v14  ;;  %v840_v41 = vrot.slane %v6616_v56, 2  ;;  %4227 = vmatprep.mubr.f32.mxu1 %v839_v31 }
 0x183   : > { %1430 = vmatmul.mubr.f32.gmra.mrb[26].mxu0 %v8705_v7  ;;  %v841_v6 = vsel %vm715_vm3, %v838_v62, %v840_v41  ;;  %v8711_v62 = vld [vmem:[#allocation25_spill] sm:$0xff]  ;;  %v8714_v41 = vld [vmem:[#allocation34_spill] sm:$0xff] }
 0x184   : > { %1434 = vmatprep.mubr.f32.mxu0 %v6276_v59  ;;  %4498 = vmatpush1.bf16.msra.mxu0 %v4497_v63  ;;  %v8706_v59 = vld [vmem:[#allocation19_spill] sm:$0xff]  ;;  %v4503_v63 = vpack.c.bf16 %v552_v32, %v551_v29  ;;  %v2170_v29 = vld [vmem:[%s8422_s3 + $0x18] sm:$0xff] }
 0x185   : > { %4499 = vmatprep.subr.bf16.mxu0 %v8645_v14  ;;  %4228 = vmatmul.mubr.f32.gmra.mrb[28].mxu1 %v841_v6 }
 0x186   : > { %4230 = vmatprep.mubr.f32.mxu1 %v6054_v9 }
 0x187   : > { %1435 = vmatmul.mubr.f32.gmra.mrb[28].mxu0 %v8706_v59 }
 0x188   : > { %1439 = vmatprep.mubr.f32.mxu0 %v6283_v39  ;;  %4501 = vmatpush1.bf16.msra.mxu0 %v4500_v50  ;;  %v8710_v39 = vld [vmem:[#allocation23_spill] sm:$0xff]  ;;  %v8712_v50 = vld [vmem:[#allocation28_spill] sm:$0xff] }
 0x189   : > { %4502 = vmatprep.subr.bf16.mxu0 %v8645_v14  ;;  %4231 = vmatmul.mubr.f32.gmra.mrb[30].mxu1 %v6066_v57 }
 0x18a   : > { %2638 = vmatprep.mubr.f32.mxu1 %v8708_v2 }
 0x18b   : > { %1440 = vmatmul.mubr.f32.gmra.mrb[30].mxu0 %v8707_v55 }
 0x18c   : > { %1444 = vmatprep.mubr.f32.mxu0 %v6292_v28  ;;  %4504 = vmatpush1.bf16.msra.mxu0 %v4503_v63  ;;  %v8713_v28 = vld [vmem:[#allocation31_spill] sm:$0xff]  ;;  %v2171_v63 = vld [vmem:[%s8422_s3 + $0x20] sm:$0xff] }
 0x18f   : > { %1445 = vmatmul.mubr.f32.gmra.mrb[32].mxu0 %v8709_v34 }
 0x190   : > { %1449 = vmatprep.mubr.f32.mxu0 %v6298_v51  ;;  %v8715_v51 = vld [vmem:[#allocation37_spill] sm:$0xff] }
 0x193   : > { %1450 = vmatmul.mubr.f32.gmra.mrb[34].mxu0 %v8710_v39 }
 0x194   : > { %1454 = vmatprep.mubr.f32.mxu0 %v6307_v11  ;;  %v8716_v11 = vld [vmem:[#allocation40_spill] sm:$0xff] }
 0x197   : > { %1455 = vmatmul.mubr.f32.gmra.mrb[36].mxu0 %v8711_v62 }
 0x198   : > { %1459 = vmatprep.mubr.f32.mxu0 %v6313_v15  ;;  %v8717_v15 = vld [vmem:[#allocation43_spill] sm:$0xff] }
 0x19b   : > { %1460 = vmatmul.mubr.f32.gmra.mrb[38].mxu0 %v8712_v50 }
 0x19c   : > { %1464 = vmatprep.mubr.f32.mxu0 %v6322_v52  ;;  %v8718_v52 = vld [vmem:[#allocation45_spill] sm:$0xff] }
 0x19f   : > { %1465 = vmatmul.mubr.f32.gmra.mrb[40].mxu0 %v8713_v28 }
 0x1a0   : > { %1469 = vmatprep.mubr.f32.mxu0 %v6328_v36  ;;  %v8719_v36 = vld [vmem:[#allocation48_spill] sm:$0xff] }
 0x1a3   : > { %1470 = vmatmul.mubr.f32.gmra.mrb[42].mxu0 %v8714_v41 }
 0x1a4   : > { %1474 = vmatprep.mubr.f32.mxu0 %v6337_v45  ;;  %v830_v45 = vrot.slane %v6599_v35, 1  ;;  %v2168_v35 = vld [vmem:[%s8422_s3 + $0x8] sm:$0xff] }
 0x1a7   : > { %1475 = vmatmul.mubr.f32.gmra.mrb[44].mxu0 %v8715_v51 }
 0x1a8   : > { %1479 = vmatprep.mubr.f32.mxu0 %v6349_v27  ;;  %v8720_v27 = vld [vmem:[#allocation50_spill] sm:$0xff] }
 0x1ab   : > { %1480 = vmatmul.mubr.f32.gmra.mrb[46].mxu0 %v8716_v11 }
 0x1ac   : > { %1484 = vmatprep.mubr.f32.mxu0 %v6364_v24  ;;  %v831_v24 = vrot.slane %v6432_v58, 1 }
 0x1af   : > { %1485 = vmatmul.mubr.f32.gmra.mrb[48].mxu0 %v8717_v15 }
 0x1b0   : > { %1489 = vmatprep.mubr.f32.mxu0 %v6376_v19  ;;  %v8721_v19 = vld [vmem:[#allocation51_spill] sm:$0xff] }
 0x1b3   : > { %1490 = vmatmul.mubr.f32.gmra.mrb[50].mxu0 %v8718_v52 }
 0x1b4   : > { %1494 = vmatprep.mubr.f32.mxu0 %v6391_v18  ;;  %v6671_v18 = vsel %vm602_vm1, %v830_v45, %v831_v24  ;;  %v2173_v45 = vld [vmem:[%s8422_s3 + $0x30] sm:$0xff] }
 0x1b7   : > { %1495 = vmatmul.mubr.f32.gmra.mrb[52].mxu0 %v8719_v36 }
 0x1b8   : > { %1499 = vmatprep.mubr.f32.mxu0 %v6407_v20  ;;  %v833_v20 = vrot.slane %v6616_v56, 1  ;;  %v2169_v56 = vld [vmem:[%s8422_s3 + $0x10] sm:$0xff] }
 0x1b9   : > { %v4541_v32 = vpack.c.bf16 %v2170_v29, %v2169_v56 }
 0x1bb   : > { %1500 = vmatmul.mubr.f32.gmra.mrb[54].mxu0 %v6017_v49 }
 0x1bc   : > { %1504 = vmatprep.mubr.f32.mxu0 %v6425_v54  ;;  %v6676_v54 = vsel %vm602_vm1, %v831_v24, %v833_v20  ;;  %v2295_v24 = vld [vmem:[%s8422_s3 + $0x400] sm:$0xff] }
 0x1bf   : > { %1505 = vmatmul.mubr.f32.gmra.mrb[56].mxu0 %v8720_v27 }
 0x1c0   : > { %1509 = vmatprep.mubr.f32.mxu0 %v6443_v46  ;;  %v2167_v46 = vld [vmem:[%s8422_s3] sm:$0xff] }
 0x1c3   : > { %1510 = vmatmul.mubr.f32.gmra.mrb[58].mxu0 %v8721_v19 }
 0x1c4   : > { %1514 = vmatprep.mubr.f32.mxu0 %v839_v31  ;;  %v4538_v31 = vpack.c.bf16 %v2168_v35, %v2167_v46  ;;  %v2298_v46 = vld [vmem:[%s8422_s3 + $0x418] sm:$0xff] }
 0x1c6   : > { %4539 = vmatpush1.bf16.msra.mxu1 %v4538_v31  ;;  %v2176_v31 = vld [vmem:[%s8422_s3 + $0x48] sm:$0xff] }
 0x1c7   : > { %1515 = vmatmul.mubr.f32.gmra.mrb[60].mxu0 %v6671_v18  ;;  %4540 = vmatprep.subr.bf16.mxu1 %v8645_v14 }
 0x1c8   : > { %1519 = vmatprep.mubr.f32.mxu0 %v841_v6 }
 0x1ca   : > { %4542 = vmatpush1.bf16.msra.mxu1 %v4541_v32  ;;  %v2178_v32 = vld [vmem:[%s8422_s3 + $0x58] sm:$0xff] }
 0x1cb   : > { %1520 = vmatmul.mubr.f32.gmra.mrb[62].mxu0 %v6676_v54  ;;  %4543 = vmatprep.subr.bf16.mxu1 %v8645_v14 }
 0x1cc   : > { %1589 = vmatprep.mubr.f32.mxu0 %v8693_v38  ;;  %v2172_v38 = vld [vmem:[%s8422_s3 + $0x28] sm:$0xff] }
 0x1cd   : > { %v4544_v6 = vpack.c.bf16 %v2172_v38, %v2171_v63  ;;  %v2180_v63 = vld [vmem:[%s8422_s3 + $0x68] sm:$0xff]  ;;  %v2182_v38 = vld [vmem:[%s8422_s3 + $0x78] sm:$0xff] }
 0x1cf   : > { %3925 = vmatmul.mubr.msk.f32.vlgmr.msra.gmra.mrb[0].mxu0 %vm5481_vm2, %v5502_v16  ;;  %v2174_v16 = vld [vmem:[%s8422_s3 + $0x38] sm:$0xff]  ;;  %4545 = vmatpush1.bf16.msra.mxu1 %v4544_v6 }
 0x1d0   : > { %1594 = vmatprep.mubr.f32.mxu0 %v8694_v13  ;;  %v2296_v13 = vld [vmem:[%s8422_s3 + $0x408] sm:$0xff]  ;;  %v4547_v56 = vpack.c.bf16 %v2174_v16, %v2173_v45  ;;  %4546 = vmatprep.subr.bf16.mxu1 %v8645_v14  ;;  %v2186_v45 = vld [vmem:[%s8422_s3 + $0x98] sm:$0xff] }
 0x1d1   : > { %v6718_v20 = vpack.c.bf16 %v2296_v13, %v2295_v24  ;;  %v2190_v24 = vld [vmem:[%s8422_s3 + $0xb8] sm:$0xff] }
 0x1d3   : > { %1595 = vmatmul.mubr.f32.gmra.mrb[2].mxu0 %v5521_v22  ;;  %8722 = vst [vmem:[#allocation29_spill] sm:$0xff] %v6718_v20  ;;  %v2297_v22 = vld [vmem:[%s8422_s3 + $0x410] sm:$0xff]  ;;  %4730 = vmatprep.subr.bf16.mxu0 %v6718_v20 }
 0x1d4   : > { %1599 = vmatprep.mubr.f32.mxu0 %v8695_v25  ;;  %v6726_v35 = vpack.c.bf16 %v2298_v46, %v2297_v22  ;;  %v2175_v25 = vld [vmem:[%s8422_s3 + $0x40] sm:$0xff]  ;;  %4732 = vmatpush3.bf16.msra.mxu0 %v6718_v20  ;;  %v2194_v22 = vld [vmem:[%s8422_s3 + $0xd8] sm:$0xff] }
 0x1d5   : > { %4548 = vmatpush1.bf16.msra.mxu1 %v4547_v56  ;;  %v4550_v29 = vpack.c.bf16 %v2176_v31, %v2175_v25  ;;  %v8731_v56 = vld [vmem:[#allocation36_spill] sm:$0xff]  ;;  %v2303_v31 = vld [vmem:[%s8422_s3 + $0x440] sm:$0xff] }
 0x1d6   : > { %8723 = vst [vmem:[#allocation33_spill] sm:$0xff] %v6726_v35  ;;  %4734 = vmatprep.subr.bf16.mxu0 %v6726_v35  ;;  %4549 = vmatprep.subr.bf16.mxu1 %v8645_v14 }
 0x1d7   : > { %3927 = vmatmul.mubr.msk.f32.gmra.mrb[4].mxu0 %vm5481_vm2, %v5543_v33  ;;  %v2177_v33 = vld [vmem:[%s8422_s3 + $0x50] sm:$0xff] }
 0x1d8   : > { %1604 = vmatprep.mubr.f32.mxu0 %v8696_v47  ;;  %4736 = vmatpush3.bf16.msra.mxu0 %v6726_v35  ;;  %v4553_v47 = vpack.c.bf16 %v2178_v32, %v2177_v33  ;;  %v8733_v32 = vld [vmem:[#allocation38_spill] sm:$0xff] }
 0x1d9   : > { %4551 = vmatpush1.bf16.msra.mxu1 %v4550_v29  ;;  %v2304_v29 = vld [vmem:[%s8422_s3 + $0x448] sm:$0xff] }
 0x1da   : > { %4552 = vmatprep.subr.bf16.mxu1 %v8645_v14  ;;  %v6912_v33 = vpack.c.bf16 %v2304_v29, %v2303_v31  ;;  %v2212_v31 = vld [vmem:[%s8422_s3 + $0x168] sm:$0xff] }
 0x1db   : > { %1605 = vmatmul.mubr.f32.gmra.mrb[6].mxu0 %v5562_v40  ;;  %v2179_v40 = vld [vmem:[%s8422_s3 + $0x60] sm:$0xff] }
 0x1dc   : > { %1609 = vmatprep.mubr.f32.mxu0 %v8697_v12  ;;  %v4556_v12 = vpack.c.bf16 %v2180_v63, %v2179_v40  ;;  %8732 = vst [vmem:[#allocation41_spill] sm:$0xff] %v6912_v33  ;;  %v8734_v40 = vld [vmem:[#allocation2_spill] sm:$0xff]  ;;  %v8735_v63 = vld [vmem:[#allocation4_spill] sm:$0xff] }
 0x1dd   : > { %4554 = vmatpush1.bf16.msra.mxu1 %v4553_v47 }
 0x1de   : > { %4555 = vmatprep.subr.bf16.mxu1 %v8645_v14 }
 0x1df   : > { %3929 = vmatmul.mubr.msk.f32.gmra.mrb[8].mxu0 %vm5481_vm2, %v5588_v53  ;;  %v2181_v53 = vld [vmem:[%s8422_s3 + $0x70] sm:$0xff] }
 0x1e0   : > { %1614 = vmatprep.mubr.f32.mxu0 %v8698_v8  ;;  %v4559_v6 = vpack.c.bf16 %v2182_v38, %v2181_v53  ;;  %v2184_v8 = vld [vmem:[%s8422_s3 + $0x88] sm:$0xff]  ;;  %v2306_v53 = vld [vmem:[%s8422_s3 + $0x458] sm:$0xff]  ;;  %v8737_v38 = vld [vmem:[#allocation42_spill] sm:$0xff] }
 0x1e1   : > { %4557 = vmatpush1.bf16.msra.mxu1 %v4556_v12  ;;  %v2305_v12 = vld [vmem:[%s8422_s3 + $0x450] sm:$0xff] }
 0x1e2   : > { %4558 = vmatprep.subr.bf16.mxu1 %v8645_v14 }
 0x1e3   : > { %1615 = vmatmul.mubr.f32.gmra.mrb[10].mxu0 %v5613_v1  ;;  %v2183_v1 = vld [vmem:[%s8422_s3 + $0x80] sm:$0xff] }
 0x1e4   : > { %1619 = vmatprep.mubr.f32.mxu0 %v8699_v44  ;;  %v4562_v44 = vpack.c.bf16 %v2184_v8, %v2183_v1  ;;  %v2200_v1 = vld [vmem:[%s8422_s3 + $0x108] sm:$0xff]  ;;  %v2307_v8 = vld [vmem:[%s8422_s3 + $0x460] sm:$0xff] }
 0x1e5   : > { %4560 = vmatpush1.bf16.msra.mxu1 %v4559_v6  ;;  %v2199_v6 = vld [vmem:[%s8422_s3 + $0x100] sm:$0xff] }
 0x1e6   : > { %4561 = vmatprep.subr.bf16.mxu1 %v8645_v14 }
 0x1e7   : > { %3931 = vmatmul.mubr.msk.f32.gmra.mrb[12].mxu0 %vm5481_vm2, %v5638_v21  ;;  %v2185_v21 = vld [vmem:[%s8422_s3 + $0x90] sm:$0xff] }
 0x1e8   : > { %1624 = vmatprep.mubr.f32.mxu0 %v8700_v5  ;;  %v4565_v16 = vpack.c.bf16 %v2186_v45, %v2185_v21  ;;  %v2188_v5 = vld [vmem:[%s8422_s3 + $0xa8] sm:$0xff]  ;;  %v8738_v21 = vld [vmem:[#allocation44_spill] sm:$0xff] }
 0x1e9   : > { %4563 = vmatpush1.bf16.msra.mxu1 %v4562_v44  ;;  %v4586_v44 = vpack.c.bf16 %v2200_v1, %v2199_v6 }
 0x1ea   : > { %4564 = vmatprep.subr.bf16.mxu1 %v8645_v14 }
 0x1eb   : > { %1625 = vmatmul.mubr.f32.gmra.mrb[14].mxu0 %v5657_v30  ;;  %v2187_v30 = vld [vmem:[%s8422_s3 + $0xa0] sm:$0xff] }
 0x1ec   : > { %1629 = vmatprep.mubr.f32.mxu0 %v8701_v3  ;;  %v4568_v3 = vpack.c.bf16 %v2188_v5, %v2187_v30  ;;  %v2309_v5 = vld [vmem:[%s8422_s3 + $0x470] sm:$0xff] }
 0x1ed   : > { %4566 = vmatpush1.bf16.msra.mxu1 %v4565_v16 }
 0x1ee   : > { %4567 = vmatprep.subr.bf16.mxu1 %v8645_v14 }
 0x1ef   : > { %3933 = vmatmul.mubr.msk.f32.gmra.mrb[16].mxu0 %vm5481_vm2, %v5682_v48  ;;  %v2189_v48 = vld [vmem:[%s8422_s3 + $0xb0] sm:$0xff] }
 0x1f0   : > { %1634 = vmatprep.mubr.f32.mxu0 %v8702_v0  ;;  %v4571_v13 = vpack.c.bf16 %v2190_v24, %v2189_v48  ;;  %v2192_v0 = vld [vmem:[%s8422_s3 + $0xc8] sm:$0xff]  ;;  %v2201_v24 = vld [vmem:[%s8422_s3 + $0x110] sm:$0xff] }
 0x1f1   : > { %4569 = vmatpush1.bf16.msra.mxu1 %v4568_v3  ;;  %v2310_v3 = vld [vmem:[%s8422_s3 + $0x478] sm:$0xff] }
 0x1f2   : > { %4570 = vmatprep.subr.bf16.mxu1 %v8645_v14  ;;  %v6970_v48 = vpack.c.bf16 %v2310_v3, %v2309_v5 }
 0x1f3   : > { %1635 = vmatmul.mubr.f32.gmra.mrb[18].mxu0 %v5701_v61  ;;  %v2191_v61 = vld [vmem:[%s8422_s3 + $0xc0] sm:$0xff] }
 0x1f4   : > { %1639 = vmatprep.mubr.f32.mxu0 %v8703_v43  ;;  %v4574_v43 = vpack.c.bf16 %v2192_v0, %v2191_v61  ;;  %8740 = vst [vmem:[#allocation6_spill] sm:$0xff] %v6970_v48  ;;  %v8742_v0 = vld [vmem:[#allocation49_spill] sm:$0xff] }
 0x1f5   : > { %4572 = vmatpush1.bf16.msra.mxu1 %v4571_v13  ;;  %v2202_v13 = vld [vmem:[%s8422_s3 + $0x118] sm:$0xff] }
 0x1f6   : > { %4573 = vmatprep.subr.bf16.mxu1 %v8645_v14  ;;  %v4589_v61 = vpack.c.bf16 %v2202_v13, %v2201_v24  ;;  %v2218_v24 = vld [vmem:[%s8422_s3 + $0x198] sm:$0xff] }
 0x1f7   : > { %3935 = vmatmul.mubr.msk.f32.gmra.mrb[20].mxu0 %vm5481_vm2, %v5726_v26  ;;  %v2193_v26 = vld [vmem:[%s8422_s3 + $0xd0] sm:$0xff] }
 0x1f8   : > { %1644 = vmatprep.mubr.f32.mxu0 %v8705_v7  ;;  %v4577_v46 = vpack.c.bf16 %v2194_v22, %v2193_v26  ;;  %v2195_v7 = vld [vmem:[%s8422_s3 + $0xe0] sm:$0xff]  ;;  %v8743_v26 = vld [vmem:[#allocation27_spill] sm:$0xff] }
 0x1f9   : > { %4575 = vmatpush1.bf16.msra.mxu1 %v4574_v43  ;;  %v2203_v22 = vld [vmem:[%s8422_s3 + $0x120] sm:$0xff] }
 0x1fa   : > { %4576 = vmatprep.subr.bf16.mxu1 %v8645_v14 }
 0x1fb   : > { %1645 = vmatmul.mubr.f32.gmra.mrb[22].mxu0 %v5745_v42  ;;  %v8724_v42 = vld [vmem:[#allocation22_spill] sm:$0xff] }
 0x1fc   : > { %1649 = vmatprep.mubr.f32.mxu0 %v8706_v59  ;;  %v2196_v59 = vld [vmem:[%s8422_s3 + $0xe8] sm:$0xff] }
 0x1fd   : > { %4578 = vmatpush1.bf16.msra.mxu1 %v4577_v46  ;;  %v2204_v46 = vld [vmem:[%s8422_s3 + $0x128] sm:$0xff] }
 0x1fe   : > { %4579 = vmatprep.subr.bf16.mxu1 %v8645_v14 }
 0x1ff   : > { %3937 = vmatmul.mubr.msk.f32.gmra.mrb[24].mxu0 %vm5481_vm2, %v5770_v10  ;;  %v8725_v10 = vld [vmem:[#allocation24_spill] sm:$0xff] }
 0x200   : > { %1654 = vmatprep.mubr.f32.mxu0 %v8707_v55  ;;  %v8729_v55 = vld [vmem:[#allocation32_spill] sm:$0xff] }
 0x203   : > { %1655 = vmatmul.mubr.f32.gmra.mrb[26].mxu0 %v5789_v37  ;;  %v8726_v37 = vld [vmem:[#allocation26_spill] sm:$0xff] }
 0x204   : > { %1659 = vmatprep.mubr.f32.mxu0 %v8709_v34 }
 0x207   : > { %3939 = vmatmul.mubr.msk.f32.gmra.mrb[28].mxu0 %vm5481_vm2, %v5814_v60  ;;  %v8727_v60 = vld [vmem:[#allocation30_spill] sm:$0xff] }
 0x208   : > { %1664 = vmatprep.mubr.f32.mxu0 %v8710_v39  ;;  %v4580_v39 = vpack.c.bf16 %v2196_v59, %v2195_v7  ;;  %v2208_v7 = vld [vmem:[%s8422_s3 + $0x148] sm:$0xff] }
 0x20a   : > { %4581 = vmatpush1.bf16.msra.mxu1 %v4580_v39 }
 0x20b   : > { %1665 = vmatmul.mubr.f32.gmra.mrb[30].mxu0 %v5827_v17  ;;  %v2300_v17 = vld [vmem:[%s8422_s3 + $0x428] sm:$0xff]  ;;  %4582 = vmatprep.subr.bf16.mxu1 %v8645_v14 }
 0x20c   : > { %1669 = vmatprep.mubr.f32.mxu0 %v8711_v62 }
 0x20f   : > { %3941 = vmatmul.mubr.msk.f32.gmra.mrb[32].mxu0 %vm5481_vm2, %v5846_v23  ;;  %v2299_v23 = vld [vmem:[%s8422_s3 + $0x420] sm:$0xff] }
 0x210   : > { %1674 = vmatprep.mubr.f32.mxu0 %v8712_v50  ;;  %v6868_v34 = vpack.c.bf16 %v2300_v17, %v2299_v23  ;;  %v2207_v17 = vld [vmem:[%s8422_s3 + $0x140] sm:$0xff] }
 0x211   : > { %v4598_v59 = vpack.c.bf16 %v2208_v7, %v2207_v17 }
 0x212   : > { %8728 = vst [vmem:[#allocation35_spill] sm:$0xff] %v6868_v34  ;;  %4738 = vmatprep.subr.bf16.mxu0 %v6868_v34 }
 0x213   : > { %1675 = vmatmul.mubr.f32.gmra.mrb[34].mxu0 %v8724_v42 }
 0x214   : > { %1679 = vmatprep.mubr.f32.mxu0 %v8713_v28  ;;  %4740 = vmatpush3.bf16.msra.mxu0 %v6868_v34  ;;  %v2301_v28 = vld [vmem:[%s8422_s3 + $0x430] sm:$0xff] }
 0x217   : > { %3943 = vmatmul.mubr.msk.f32.gmra.mrb[36].mxu0 %vm5481_vm2, %v8725_v10 }
 0x218   : > { %1684 = vmatprep.mubr.f32.mxu0 %v8714_v41  ;;  %v2302_v41 = vld [vmem:[%s8422_s3 + $0x438] sm:$0xff] }
 0x21b   : > { %1685 = vmatmul.mubr.f32.gmra.mrb[38].mxu0 %v8726_v37 }
 0x21c   : > { %1689 = vmatprep.mubr.f32.mxu0 %v8715_v51  ;;  %v6891_v51 = vpack.c.bf16 %v2302_v41, %v2301_v28  ;;  %v2209_v28 = vld [vmem:[%s8422_s3 + $0x150] sm:$0xff]  ;;  %v2210_v41 = vld [vmem:[%s8422_s3 + $0x158] sm:$0xff] }
 0x21e   : > { %v6878_v62 = vpop.f32.mrb[0].mxu1  ;;  %8730 = vst [vmem:[#allocation39_spill] sm:$0xff] %v6891_v51  ;;  %4742 = vmatprep.subr.bf16.mxu0 %v6891_v51 }
 0x21f   : > { %3945 = vmatmul.mubr.msk.f32.gmra.mrb[40].mxu0 %vm5481_vm2, %v8727_v60  ;;  %v6881_v50 = vpop.f32.mrb[1].mxu1 }
 0x220   : > { %1694 = vmatprep.mubr.f32.mxu0 %v8716_v11  ;;  %v2197_v11 = vld [vmem:[%s8422_s3 + $0xf0] sm:$0xff]  ;;  %4744 = vmatpush3.bf16.msra.mxu0 %v6891_v51 }
 0x221   : > { %4746 = vmatprep.subr.bf16.mxu0 %v6912_v33 }
 0x223   : > { %1695 = vmatmul.mubr.f32.gmra.mrb[42].mxu0 %v8729_v55 }
 0x224   : > { %1699 = vmatprep.mubr.f32.mxu0 %v8717_v15  ;;  %v2198_v15 = vld [vmem:[%s8422_s3 + $0xf8] sm:$0xff]  ;;  %4748 = vmatpush3.bf16.msra.mxu0 %v6912_v33 }
 0x225   : > { %v4583_v25 = vpack.c.bf16 %v2198_v15, %v2197_v11  ;;  %v4601_v11 = vpack.c.bf16 %v2210_v41, %v2209_v28  ;;  %v2223_v28 = vld [vmem:[%s8422_s3 + $0x1c0] sm:$0xff]  ;;  %v2224_v41 = vld [vmem:[%s8422_s3 + $0x1c8] sm:$0xff] }
 0x227   : > { %3947 = vmatmul.mubr.msk.f32.gmra.mrb[44].mxu0 %vm5481_vm2, %v8731_v56  ;;  %4584 = vmatpush1.bf16.msra.mxu1 %v4583_v25  ;;  %v2211_v25 = vld [vmem:[%s8422_s3 + $0x160] sm:$0xff] }
 0x228   : > { %1704 = vmatprep.mubr.f32.mxu0 %v8718_v52  ;;  %4585 = vmatprep.subr.bf16.mxu1 %v8645_v14  ;;  %v6915_v52 = vpop.f32.mrb[2].mxu1  ;;  %v4604_v29 = vpack.c.bf16 %v2212_v31, %v2211_v25 }
 0x229   : > { %v6918_v47 = vpop.f32.mrb[3].mxu1 }
 0x22a   : > { %3958 = vmatmul.mubr.msk.f32.vlgmr.msra.gmra.mrb[32].mxu1 %vm5481_vm2, %v8734_v40  ;;  %v6954_v45 = vpop.f32.mrb[4].mxu1 }
 0x22b   : > { %1705 = vmatmul.mubr.f32.gmra.mrb[46].mxu0 %v8733_v32  ;;  %2643 = vmatprep.mubr.f32.mxu1 %v8735_v63  ;;  %v6959_v30 = vpop.f32.mrb[5].mxu1 }
 0x22c   : > { %1709 = vmatprep.mubr.f32.mxu0 %v8719_v36  ;;  %v6932_v36 = vpack.c.bf16 %v2306_v53, %v2305_v12  ;;  %4587 = vmatpush1.bf16.msra.mxu1 %v4586_v44  ;;  %v6985_v43 = vpop.f32.mrb[6].mxu1  ;;  %v2213_v53 = vld [vmem:[%s8422_s3 + $0x170] sm:$0xff]  ;;  %v2215_v44 = vld [vmem:[%s8422_s3 + $0x180] sm:$0xff] }
 0x22d   : > { %4588 = vmatprep.subr.bf16.mxu1 %v8645_v14 }
 0x22e   : > { %8736 = vst [vmem:[#allocation46_spill] sm:$0xff] %v6932_v36  ;;  %2644 = vmatmul.mubr.f32.gmra.mrb[34].mxu1 %v8734_v40  ;;  %4750 = vmatprep.subr.bf16.mxu0 %v6932_v36 }
 0x22f   : > { %3949 = vmatmul.mubr.msk.f32.gmra.mrb[48].mxu0 %vm5481_vm2, %v8737_v38  ;;  %v2214_v38 = vld [vmem:[%s8422_s3 + $0x178] sm:$0xff] }
 0x230   : > { %1714 = vmatprep.mubr.f32.mxu0 %v6017_v49  ;;  %4752 = vmatpush3.bf16.msra.mxu0 %v6932_v36  ;;  %v2308_v49 = vld [vmem:[%s8422_s3 + $0x468] sm:$0xff]  ;;  %v4607_v6 = vpack.c.bf16 %v2214_v38, %v2213_v53  ;;  %v2226_v53 = vld [vmem:[%s8422_s3 + $0x1d8] sm:$0xff] }
 0x231   : > { %v6956_v16 = vpack.c.bf16 %v2308_v49, %v2307_v8  ;;  %4590 = vmatpush1.bf16.msra.mxu1 %v4589_v61  ;;  %v2216_v49 = vld [vmem:[%s8422_s3 + $0x188] sm:$0xff] }
 0x232   : > { %4591 = vmatprep.subr.bf16.mxu1 %v8645_v14 }
 0x233   : > { %1715 = vmatmul.mubr.f32.gmra.mrb[50].mxu0 %v8738_v21  ;;  %8739 = vst [vmem:[#allocation5_spill] sm:$0xff] %v6956_v16  ;;  %4754 = vmatprep.subr.bf16.mxu0 %v6956_v16  ;;  %v4610_v21 = vpack.c.bf16 %v2216_v49, %v2215_v44  ;;  %v7137_v49 = vld [vmem:[%s8421_s2] ss:$0 sm:$0xff] }
 0x234   : > { %1719 = vmatprep.mubr.f32.mxu0 %v8720_v27  ;;  %4756 = vmatpush3.bf16.msra.mxu0 %v6956_v16  ;;  %v8741_v27 = vld [vmem:[#allocation47_spill] sm:$0xff] }
 0x235   : > { %4758 = vmatprep.subr.bf16.mxu0 %v6970_v48 }
 0x237   : > { %3951 = vmatmul.mubr.msk.f32.gmra.mrb[52].mxu0 %vm5481_vm2, %v8741_v27  ;;  %v2217_v27 = vld [vmem:[%s8422_s3 + $0x190] sm:$0xff] }
 0x238   : > { %1724 = vmatprep.mubr.f32.mxu0 %v8721_v19  ;;  %4760 = vmatpush3.bf16.msra.mxu0 %v6970_v48  ;;  %v6988_v19 = vpop.f32.mrb[7].mxu1  ;;  %v4613_v13 = vpack.c.bf16 %v2218_v24, %v2217_v27  ;;  %v2228_v27 = vld [vmem:[%s8422_s3 + $0x1e8] sm:$0xff] }
 0x239   : > { %v7002_v42 = vpop.f32.mrb[8].mxu1 }
 0x23a   : > { %v7005_v10 = vpop.f32.mrb[9].mxu1 }
 0x23b   : > { %1725 = vmatmul.mubr.f32.gmra.mrb[54].mxu0 %v8742_v0  ;;  %v7019_v60 = vpop.f32.mrb[10].mxu1 }
 0x23c   : > { %1729 = vmatprep.mubr.f32.mxu0 %v6671_v18  ;;  %v4592_v18 = vpack.c.bf16 %v2204_v46, %v2203_v22  ;;  %v7021_v23 = vpop.f32.mrb[11].mxu1  ;;  %v2220_v22 = vld [vmem:[%s8422_s3 + $0x1a8] sm:$0xff] }
 0x23d   : > { %v7030_v55 = vpop.f32.mrb[12].mxu1 }
 0x23e   : > { %4593 = vmatpush1.bf16.msra.mxu1 %v4592_v18  ;;  %v7032_v39 = vpop.f32.mrb[13].mxu1 }
 0x23f   : > { %3953 = vmatmul.mubr.msk.f32.gmra.mrb[56].mxu0 %vm5481_vm2, %v8743_v26  ;;  %4594 = vmatprep.subr.bf16.mxu1 %v8645_v14  ;;  %v7041_v15 = vpop.f32.mrb[14].mxu1  ;;  %v2219_v26 = vld [vmem:[%s8422_s3 + $0x1a0] sm:$0xff] }
 0x240   : > { %1734 = vmatprep.mubr.f32.mxu0 %v6676_v54  ;;  %v2205_v54 = vld [vmem:[%s8422_s3 + $0x130] sm:$0xff]  ;;  %v7043_v56 = vpop.f32.mrb[15].mxu1  ;;  %v4616_v46 = vpack.c.bf16 %v2220_v22, %v2219_v26 }
 0x241   : > { %v7052_v32 = vpop.f32.mrb[16].mxu1 }
 0x242   : > { %v7054_v12 = vpop.f32.mrb[17].mxu1 }
 0x243   : > { %1735 = vmatmul.mubr.f32.gmra.mrb[58].mxu0 %v6432_v58  ;;  %v2206_v58 = vld [vmem:[%s8422_s3 + $0x138] sm:$0xff]  ;;  %v7063_v1 = vpop.f32.mrb[18].mxu1 }
 0x244   : > { %1739 = vmatprep.mubr.f32.mxu0 %v8708_v2  ;;  %v4595_v37 = vpack.c.bf16 %v2206_v58, %v2205_v54  ;;  %v7065_v8 = vpop.f32.mrb[19].mxu1  ;;  %v2221_v58 = vld [vmem:[%s8422_s3 + $0x1b0] sm:$0xff] }
 0x246   : > { %4596 = vmatpush1.bf16.msra.mxu1 %v4595_v37  ;;  %v7074_v5 = vpop.f32.mrb[20].mxu1  ;;  %v2222_v37 = vld [vmem:[%s8422_s3 + $0x1b8] sm:$0xff] }
 0x247   : > { %3955 = vmatmul.mubr.msk.f32.gmra.mrb[60].mxu0 %vm5481_vm2, %v8734_v40  ;;  %4597 = vmatprep.subr.bf16.mxu1 %v8645_v14  ;;  %v7076_v3 = vpop.f32.mrb[21].mxu1  ;;  %v4619_v17 = vpack.c.bf16 %v2222_v37, %v2221_v58  ;;  %v2229_v37 = vld [vmem:[%s8422_s3 + $0x1f0] sm:$0xff] }
 0x248   : > { %1744 = vmatprep.mubr.f32.mxu0 %v8735_v63 }
 0x24a   : > { %4599 = vmatpush1.bf16.msra.mxu1 %v4598_v59  ;;  %v7085_v61 = vpop.f32.mrb[22].mxu1 }
 0x24b   : > { %1745 = vmatmul.mubr.f32.gmra.mrb[62].mxu0 %v8734_v40  ;;  %4600 = vmatprep.subr.bf16.mxu1 %v8645_v14  ;;  %v7087_v0 = vpop.f32.mrb[23].mxu1 }
 0x24e   : > { %4602 = vmatpush1.bf16.msra.mxu1 %v4601_v11  ;;  %v7096_v18 = vpop.f32.mrb[24].mxu1  ;;  %v4622_v11 = vpack.c.bf16 %v2224_v41, %v2223_v28 }
 0x24f   : > { %4603 = vmatprep.subr.bf16.mxu1 %v8645_v14  ;;  %v7098_v54 = vpop.f32.mrb[25].mxu1 }
 0x252   : > { %4605 = vmatpush1.bf16.msra.mxu1 %v4604_v29  ;;  %v7107_v7 = vpop.f32.mrb[26].mxu1  ;;  %v2225_v29 = vld [vmem:[%s8422_s3 + $0x1d0] sm:$0xff] }
 0x253   : > { %4606 = vmatprep.subr.bf16.mxu1 %v8645_v14  ;;  %v7109_v59 = vpop.f32.mrb[27].mxu1  ;;  %v4625_v38 = vpack.c.bf16 %v2226_v53, %v2225_v29 }
 0x256   : > { %4608 = vmatpush1.bf16.msra.mxu1 %v4607_v6 }
 0x257   : > { %4609 = vmatprep.subr.bf16.mxu1 %v8645_v14 }
 0x258   : > { %v7118_v25 = vpop.f32.mrb[28].mxu1 }
 0x259   : > { %v7120_v31 = vpop.f32.mrb[29].mxu1 }
 0x25a   : > { %4611 = vmatpush1.bf16.msra.mxu1 %v4610_v21  ;;  %v2227_v21 = vld [vmem:[%s8422_s3 + $0x1e0] sm:$0xff] }
 0x25b   : > { %4612 = vmatprep.subr.bf16.mxu1 %v8645_v14 }
 0x25c   : > { %v7129_v6 = vpop.f32.mrb[30].mxu1 }
 0x25d   : > { %v7131_v44 = vpop.f32.mrb[31].mxu1 }
 0x25e   : > { %4614 = vmatpush1.bf16.msra.mxu1 %v4613_v13  ;;  %v4628_v13 = vpack.c.bf16 %v2228_v27, %v2227_v21 }
 0x25f   : > { %4615 = vmatprep.subr.bf16.mxu1 %v8645_v14 }
 0x262   : > { %4617 = vmatpush1.bf16.msra.mxu1 %v4616_v46 }
 0x263   : > { %4618 = vmatprep.subr.bf16.mxu1 %v8645_v14 }
 0x266   : > { %4620 = vmatpush1.bf16.msra.mxu1 %v4619_v17  ;;  %v2230_v17 = vld [vmem:[%s8422_s3 + $0x1f8] sm:$0xff] }
 0x267   : > { %4621 = vmatprep.subr.bf16.mxu1 %v8645_v14  ;;  %v4631_v29 = vpack.c.bf16 %v2230_v17, %v2229_v37 }
 0x26a   : > { %4623 = vmatpush1.bf16.msra.mxu1 %v4622_v11 }
 0x26b   : > { %4624 = vmatprep.subr.bf16.mxu1 %v8645_v14 }
 0x26e   : > { %4626 = vmatpush1.bf16.msra.mxu1 %v4625_v38 }
 0x26f   : > { %4627 = vmatprep.subr.bf16.mxu1 %v8645_v14 }
 0x272   : > { %4629 = vmatpush1.bf16.msra.mxu1 %v4628_v13 }
 0x273   : > { %4630 = vmatprep.subr.bf16.mxu1 %v8645_v14 }
 0x276   : > { %4632 = vmatpush1.bf16.msra.mxu1 %v4631_v29 }
 0x277   : > { %4633 = vmatprep.subr.bf16.mxu1 %v8645_v14 }
 0x2a2   : > { %v1591_v24 = vpop.f32.mrb[0].mxu0 }
 0x2a3   : > { %v4777_v26 = vadd.f32 %v7137_v49, %v1591_v24  ;;  %v1593_v22 = vpop.f32.mrb[1].mxu0 }
 0x2a5   : > { %v1817_v46 = vadd.f32 %v4777_v26, %v6881_v50 }
 0x2a6   : > { %v1596_v58 = vpop.f32.mrb[2].mxu0 }
 0x2a7   : > { %v1975_v28 = vmax.f32 %v1817_v46, 0.0  ;;  %v4778_v41 = vadd.f32 %v7137_v49, %v1596_v58  ;;  %v1598_v11 = vpop.f32.mrb[3].mxu0 }
 0x2a9   : > { %v7155_v53 = vrot.slane %v1975_v28, 7  ;;  %v1822_v50 = vadd.f32 %v4778_v41, %v6878_v62 }
 0x2aa   : > { %v1601_v38 = vpop.f32.mrb[4].mxu0 }
 0x2ab   : > { %v1976_v21 = vmax.f32 %v1822_v50, 0.0  ;;  %v4779_v27 = vadd.f32 %v7137_v49, %v1601_v38  ;;  %v1603_v24 = vpop.f32.mrb[5].mxu0  ;;  %v7163_v22 = vsel %vm290_vm0, 0.0, %v7155_v53 }
 0x2ac   : > { %v2342_v41 = vrot.slane %v7163_v22, 1 }
 0x2ad   : > { %v2040_v13 = vrot.slane %v1976_v21, 7  ;;  %v1827_v26 = vadd.f32 %v4779_v27, %v6918_v47 }
 0x2ae   : > { %v1606_v46 = vpop.f32.mrb[6].mxu0 }
 0x2af   : > { %v7167_v58 = vsel %vm290_vm0, %v7155_v53, %v2040_v13  ;;  %v7170_v62 = vsel %vm290_vm0, %v2040_v13, 0.0  ;;  %v1977_v37 = vmax.f32 %v1827_v26, 0.0  ;;  %v4780_v17 = vadd.f32 %v7137_v49, %v1606_v46  ;;  %v1608_v28 = vpop.f32.mrb[7].mxu0 }
 0x2b0   : > { %v2343_v47 = vrot.slane %v7167_v58, 1  ;;  %v2345_v11 = vrot.slane %v7170_v62, 1 }
 0x2b1   : > { %v7176_v29 = vrot.slane %v1977_v37, 7  ;;  %v1832_v50 = vadd.f32 %v4780_v17, %v6915_v52 }
 0x2b2   : > { %v1611_v38 = vpop.f32.mrb[8].mxu0  ;;  %v7180_v21 = vsel %vm602_vm1, %v2342_v41, %v2343_v47  ;;  %v7190_v46 = vsel %vm602_vm1, %v2343_v47, %v2345_v11 }
 0x2b3   : > { %8744 = vst [vmem:[#allocation7_spill] sm:$0xff] %v7180_v21  ;;  %v1978_v27 = vmax.f32 %v1832_v50, 0.0  ;;  %v4781_v24 = vadd.f32 %v7137_v49, %v1611_v38  ;;  %v1613_v13 = vpop.f32.mrb[9].mxu0  ;;  %2648 = vmatprep.mubr.f32.mxu1 %v7180_v21  ;;  %v2136_v26 = vsel %vm290_vm0, 0.0, %v7176_v29  ;;  %8745 = vst [vmem:[#allocation8_spill] sm:$0xff] %v7190_v46 }
 0x2b4   : > { %3960 = vmatmul.mubr.msk.f32.gmra.mrb[36].mxu1 %vm5481_vm2, %v7155_v53  ;;  %v2347_v28 = vrot.slane %v2136_v26, 1  ;;  %v2452_v41 = vrot.slane %v2136_v26, 2 }
 0x2b5   : > { %v2043_v52 = vrot.slane %v1978_v27, 7  ;;  %v1837_v37 = vadd.f32 %v4781_v24, %v6959_v30  ;;  %2653 = vmatprep.mubr.f32.mxu1 %v7190_v46 }
 0x2b6   : > { %v1616_v17 = vpop.f32.mrb[10].mxu0 }
 0x2b7   : > { %v7196_v50 = vsel %vm290_vm0, %v7176_v29, %v2043_v52  ;;  %v2152_v38 = vsel %vm290_vm0, %v2043_v52, 0.0  ;;  %v1979_v13 = vmax.f32 %v1837_v37, 0.0  ;;  %v4782_v63 = vadd.f32 %v7137_v49, %v1616_v17  ;;  %v1618_v40 = vpop.f32.mrb[11].mxu0 }
 0x2b8   : > { %v2455_v47 = vrot.slane %v2152_v38, 2  ;;  %2654 = vmatmul.mubr.f32.gmra.mrb[38].mxu1 %v7167_v58  ;;  %v2348_v30 = vrot.slane %v7196_v50, 1  ;;  %v2453_v11 = vrot.slane %v7196_v50, 2  ;;  %v2350_v27 = vrot.slane %v2152_v38, 1 }
 0x2b9   : > { %v7203_v24 = vrot.slane %v1979_v13, 7  ;;  %v1842_v26 = vadd.f32 %v4782_v63, %v6954_v45 }
 0x2ba   : > { %v1621_v2 = vpop.f32.mrb[12].mxu0  ;;  %v7207_v48 = vsel %vm602_vm1, %v2347_v28, %v2348_v30  ;;  %v7210_v52 = vsel %vm715_vm3, %v2452_v41, %v2453_v11  ;;  %v7213_v40 = vsel %vm715_vm3, %v2453_v11, %v2455_v47  ;;  %v7225_v45 = vsel %vm602_vm1, %v2348_v30, %v2350_v27 }
 0x2bb   : > { %8746 = vst [vmem:[#allocation9_spill] sm:$0xff] %v7207_v48  ;;  %v1980_v37 = vmax.f32 %v1842_v26, 0.0  ;;  %v4783_v17 = vadd.f32 %v7137_v49, %v1621_v2  ;;  %v1623_v16 = vpop.f32.mrb[13].mxu0  ;;  %2658 = vmatprep.mubr.f32.mxu1 %v7207_v48  ;;  %4265 = vmatprep.mubr.f32.mxu0 %v7210_v52  ;;  %v2137_v63 = vsel %vm290_vm0, 0.0, %v7203_v24  ;;  %8747 = vst [vmem:[#allocation10_spill] sm:$0xff] %v7225_v45 }
 0x2bc   : > { %3962 = vmatmul.mubr.msk.f32.gmra.mrb[40].mxu1 %vm5481_vm2, %v7176_v29  ;;  %4266 = vmatmul.mubr.f32.vlgmr.msra.gmra.mrb[64].mxu0 %v7213_v40  ;;  %v2352_v41 = vrot.slane %v2137_v63, 1  ;;  %v2457_v38 = vrot.slane %v2137_v63, 2 }
 0x2bd   : > { %v2046_v28 = vrot.slane %v1980_v37, 7  ;;  %v1847_v2 = vadd.f32 %v4783_v17, %v6988_v19  ;;  %2663 = vmatprep.mubr.f32.mxu1 %v7225_v45 }
 0x2be   : > { %v1626_v16 = vpop.f32.mrb[14].mxu0 }
 0x2bf   : > { %v7231_v13 = vsel %vm290_vm0, %v7203_v24, %v2046_v28  ;;  %v2153_v47 = vsel %vm290_vm0, %v2046_v28, 0.0  ;;  %v1981_v11 = vmax.f32 %v1847_v2, 0.0  ;;  %v4784_v26 = vadd.f32 %v7137_v49, %v1626_v16  ;;  %v1628_v36 = vpop.f32.mrb[15].mxu0 }
 0x2c0   : > { %2664 = vmatmul.mubr.f32.gmra.mrb[42].mxu1 %v7196_v50  ;;  %v2353_v30 = vrot.slane %v7231_v13, 1  ;;  %v2458_v19 = vrot.slane %v7231_v13, 2  ;;  %v2460_v27 = vrot.slane %v2153_v47, 2  ;;  %v2355_v37 = vrot.slane %v2153_v47, 1 }
 0x2c1   : > { %v7238_v17 = vrot.slane %v1981_v11, 7  ;;  %v1852_v63 = vadd.f32 %v4784_v26, %v6985_v43 }
 0x2c2   : > { %v1631_v33 = vpop.f32.mrb[16].mxu0  ;;  %v7242_v51 = vsel %vm602_vm1, %v2352_v41, %v2353_v30  ;;  %v7245_v28 = vsel %vm715_vm3, %v2457_v38, %v2458_v19  ;;  %v7248_v36 = vsel %vm715_vm3, %v2458_v19, %v2460_v27  ;;  %v7260_v41 = vsel %vm602_vm1, %v2353_v30, %v2355_v37 }
 0x2c3   : > { %8748 = vst [vmem:[#allocation11_spill] sm:$0xff] %v7242_v51  ;;  %v1982_v2 = vmax.f32 %v1852_v63, 0.0  ;;  %v4785_v16 = vadd.f32 %v7137_v49, %v1631_v33  ;;  %v1633_v34 = vpop.f32.mrb[17].mxu0  ;;  %2668 = vmatprep.mubr.f32.mxu1 %v7242_v51  ;;  %4268 = vmatprep.mubr.f32.mxu0 %v7245_v28  ;;  %v2138_v43 = vsel %vm290_vm0, 0.0, %v7238_v17  ;;  %8749 = vst [vmem:[#allocation12_spill] sm:$0xff] %v7260_v41 }
 0x2c4   : > { %3964 = vmatmul.mubr.msk.f32.gmra.mrb[44].mxu1 %vm5481_vm2, %v7203_v24  ;;  %4269 = vmatmul.mubr.f32.gmra.mrb[66].mxu0 %v7248_v36  ;;  %v2357_v47 = vrot.slane %v2138_v43, 1  ;;  %v2462_v11 = vrot.slane %v2138_v43, 2 }
 0x2c5   : > { %v2049_v38 = vrot.slane %v1982_v2, 7  ;;  %v1857_v33 = vadd.f32 %v4785_v16, %v7005_v10  ;;  %2673 = vmatprep.mubr.f32.mxu1 %v7260_v41 }
 0x2c6   : > { %v1636_v34 = vpop.f32.mrb[18].mxu0 }
 0x2c7   : > { %v7266_v26 = vsel %vm290_vm0, %v7238_v17, %v2049_v38  ;;  %v2154_v19 = vsel %vm290_vm0, %v2049_v38, 0.0  ;;  %v1983_v27 = vmax.f32 %v1857_v33, 0.0  ;;  %v4786_v63 = vadd.f32 %v7137_v49, %v1636_v34  ;;  %v1638_v35 = vpop.f32.mrb[19].mxu0 }
 0x2c8   : > { %2674 = vmatmul.mubr.f32.gmra.mrb[46].mxu1 %v7231_v13  ;;  %v2358_v30 = vrot.slane %v7266_v26, 1  ;;  %v2463_v10 = vrot.slane %v7266_v26, 2  ;;  %v2465_v37 = vrot.slane %v2154_v19, 2  ;;  %v2360_v2 = vrot.slane %v2154_v19, 1 }
 0x2c9   : > { %v7273_v16 = vrot.slane %v1983_v27, 7  ;;  %v1862_v43 = vadd.f32 %v4786_v63, %v7002_v42 }
 0x2ca   : > { %v1641_v20 = vpop.f32.mrb[20].mxu0  ;;  %v7277_v41 = vsel %vm602_vm1, %v2357_v47, %v2358_v30  ;;  %v7280_v38 = vsel %vm715_vm3, %v2462_v11, %v2463_v10  ;;  %v7283_v35 = vsel %vm715_vm3, %v2463_v10, %v2465_v37  ;;  %v7295_v47 = vsel %vm602_vm1, %v2358_v30, %v2360_v2 }
 0x2cb   : > { %8750 = vst [vmem:[#allocation13_spill] sm:$0xff] %v7277_v41  ;;  %v1984_v33 = vmax.f32 %v1862_v43, 0.0  ;;  %v4787_v34 = vadd.f32 %v7137_v49, %v1641_v20  ;;  %v1643_v51 = vpop.f32.mrb[21].mxu0  ;;  %2678 = vmatprep.mubr.f32.mxu1 %v7277_v41  ;;  %4271 = vmatprep.mubr.f32.mxu0 %v7280_v38  ;;  %v2139_v42 = vsel %vm290_vm0, 0.0, %v7273_v16  ;;  %8751 = vst [vmem:[#allocation14_spill] sm:$0xff] %v7295_v47 }
 0x2cc   : > { %3966 = vmatmul.mubr.msk.f32.gmra.mrb[48].mxu1 %vm5481_vm2, %v7238_v17  ;;  %4272 = vmatmul.mubr.f32.gmra.mrb[68].mxu0 %v7283_v35  ;;  %v2362_v19 = vrot.slane %v2139_v42, 1  ;;  %v2467_v27 = vrot.slane %v2139_v42, 2 }
 0x2cd   : > { %v2052_v11 = vrot.slane %v1984_v33, 7  ;;  %v1867_v20 = vadd.f32 %v4787_v34, %v7021_v23  ;;  %2683 = vmatprep.mubr.f32.mxu1 %v7295_v47 }
 0x2ce   : > { %v1646_v51 = vpop.f32.mrb[22].mxu0 }
 0x2cf   : > { %v7301_v63 = vsel %vm290_vm0, %v7273_v16, %v2052_v11  ;;  %v2155_v10 = vsel %vm290_vm0, %v2052_v11, 0.0  ;;  %v1985_v37 = vmax.f32 %v1867_v20, 0.0  ;;  %v4788_v43 = vadd.f32 %v7137_v49, %v1646_v51  ;;  %v1648_v41 = vpop.f32.mrb[23].mxu0 }
 0x2d0   : > { %2684 = vmatmul.mubr.f32.gmra.mrb[50].mxu1 %v7266_v26  ;;  %v2363_v30 = vrot.slane %v7301_v63, 1  ;;  %v2468_v23 = vrot.slane %v7301_v63, 2  ;;  %v2470_v2 = vrot.slane %v2155_v10, 2  ;;  %v2365_v33 = vrot.slane %v2155_v10, 1 }
 0x2d1   : > { %v7308_v34 = vrot.slane %v1985_v37, 7  ;;  %v1872_v42 = vadd.f32 %v4788_v43, %v7019_v60 }
 0x2d2   : > { %v1651_v47 = vpop.f32.mrb[24].mxu0  ;;  %v7312_v45 = vsel %vm602_vm1, %v2362_v19, %v2363_v30  ;;  %v7315_v11 = vsel %vm715_vm3, %v2467_v27, %v2468_v23  ;;  %v7318_v41 = vsel %vm715_vm3, %v2468_v23, %v2470_v2  ;;  %v7330_v19 = vsel %vm602_vm1, %v2363_v30, %v2365_v33 }
 0x2d3   : > { %8752 = vst [vmem:[#allocation15_spill] sm:$0xff] %v7312_v45  ;;  %v1986_v20 = vmax.f32 %v1872_v42, 0.0  ;;  %v4789_v51 = vadd.f32 %v7137_v49, %v1651_v47  ;;  %v1653_v48 = vpop.f32.mrb[25].mxu0  ;;  %2688 = vmatprep.mubr.f32.mxu1 %v7312_v45  ;;  %4274 = vmatprep.mubr.f32.mxu0 %v7315_v11  ;;  %v2140_v60 = vsel %vm290_vm0, 0.0, %v7308_v34  ;;  %8753 = vst [vmem:[#allocation16_spill] sm:$0xff] %v7330_v19 }
 0x2d4   : > { %3968 = vmatmul.mubr.msk.f32.gmra.mrb[52].mxu1 %vm5481_vm2, %v7273_v16  ;;  %4275 = vmatmul.mubr.f32.gmra.mrb[70].mxu0 %v7318_v41  ;;  %v2367_v10 = vrot.slane %v2140_v60, 1  ;;  %v2472_v37 = vrot.slane %v2140_v60, 2 }
 0x2d5   : > { %v2055_v27 = vrot.slane %v1986_v20, 7  ;;  %v1877_v47 = vadd.f32 %v4789_v51, %v7032_v39  ;;  %2693 = vmatprep.mubr.f32.mxu1 %v7330_v19 }
 0x2d6   : > { %v1656_v48 = vpop.f32.mrb[26].mxu0 }
 0x2d7   : > { %v7336_v43 = vsel %vm290_vm0, %v7308_v34, %v2055_v27  ;;  %v2156_v23 = vsel %vm290_vm0, %v2055_v27, 0.0  ;;  %v1987_v2 = vmax.f32 %v1877_v47, 0.0  ;;  %v4790_v42 = vadd.f32 %v7137_v49, %v1656_v48  ;;  %v1658_v45 = vpop.f32.mrb[27].mxu0 }
 0x2d8   : > { %2694 = vmatmul.mubr.f32.gmra.mrb[54].mxu1 %v7301_v63  ;;  %v2368_v30 = vrot.slane %v7336_v43, 1  ;;  %v2473_v39 = vrot.slane %v7336_v43, 2  ;;  %v2475_v33 = vrot.slane %v2156_v23, 2  ;;  %v2370_v20 = vrot.slane %v2156_v23, 1 }
 0x2d9   : > { %v7343_v51 = vrot.slane %v1987_v2, 7  ;;  %v1882_v60 = vadd.f32 %v4790_v42, %v7030_v55 }
 0x2da   : > { %v1661_v19 = vpop.f32.mrb[28].mxu0  ;;  %v7347_v46 = vsel %vm602_vm1, %v2367_v10, %v2368_v30  ;;  %v7350_v27 = vsel %vm715_vm3, %v2472_v37, %v2473_v39  ;;  %v7353_v45 = vsel %vm715_vm3, %v2473_v39, %v2475_v33  ;;  %v7365_v10 = vsel %vm602_vm1, %v2368_v30, %v2370_v20 }
 0x2db   : > { %8754 = vst [vmem:[#allocation17_spill] sm:$0xff] %v7347_v46  ;;  %8755 = vst [vmem:[#allocation18_spill] sm:$0xff] %v7350_v27  ;;  %v1988_v47 = vmax.f32 %v1882_v60, 0.0  ;;  %v4791_v48 = vadd.f32 %v7137_v49, %v1661_v19  ;;  %v1663_v21 = vpop.f32.mrb[29].mxu0  ;;  %2698 = vmatprep.mubr.f32.mxu1 %v7347_v46  ;;  %4277 = vmatprep.mubr.f32.mxu0 %v7350_v27  ;;  %v2141_v55 = vsel %vm290_vm0, 0.0, %v7343_v51 }
 0x2dc   : > { %8756 = vst [vmem:[#allocation19_spill] sm:$0xff] %v7353_v45  ;;  %3970 = vmatmul.mubr.msk.f32.gmra.mrb[56].mxu1 %vm5481_vm2, %v7308_v34  ;;  %4278 = vmatmul.mubr.f32.gmra.mrb[72].mxu0 %v7353_v45  ;;  %8757 = vst [vmem:[#allocation20_spill] sm:$0xff] %v7365_v10  ;;  %v2372_v23 = vrot.slane %v2141_v55, 1  ;;  %v2477_v2 = vrot.slane %v2141_v55, 2 }
 0x2dd   : > { %v2058_v37 = vrot.slane %v1988_v47, 7  ;;  %v1887_v19 = vadd.f32 %v4791_v48, %v7043_v56  ;;  %2703 = vmatprep.mubr.f32.mxu1 %v7365_v10 }
 0x2de   : > { %v1666_v21 = vpop.f32.mrb[30].mxu0 }
 0x2df   : > { %v7371_v42 = vsel %vm290_vm0, %v7343_v51, %v2058_v37  ;;  %v2157_v39 = vsel %vm290_vm0, %v2058_v37, 0.0  ;;  %v1989_v33 = vmax.f32 %v1887_v19, 0.0  ;;  %v4792_v60 = vadd.f32 %v7137_v49, %v1666_v21  ;;  %v1668_v46 = vpop.f32.mrb[31].mxu0 }
 0x2e0   : > { %2704 = vmatmul.mubr.f32.gmra.mrb[58].mxu1 %v7336_v43  ;;  %v2373_v30 = vrot.slane %v7371_v42, 1  ;;  %v2478_v56 = vrot.slane %v7371_v42, 2  ;;  %v2480_v20 = vrot.slane %v2157_v39, 2  ;;  %v2375_v47 = vrot.slane %v2157_v39, 1 }
 0x2e1   : > { %v7378_v48 = vrot.slane %v1989_v33, 7  ;;  %v1892_v55 = vadd.f32 %v4792_v60, %v7041_v15 }
 0x2e2   : > { %v1671_v10 = vpop.f32.mrb[32].mxu0  ;;  %v7382_v45 = vsel %vm602_vm1, %v2372_v23, %v2373_v30  ;;  %v7385_v37 = vsel %vm715_vm3, %v2477_v2, %v2478_v56  ;;  %v7388_v46 = vsel %vm715_vm3, %v2478_v56, %v2480_v20  ;;  %v7400_v23 = vsel %vm602_vm1, %v2373_v30, %v2375_v47 }
 0x2e3   : > { %8758 = vst [vmem:[#allocation21_spill] sm:$0xff] %v7382_v45  ;;  %8759 = vst [vmem:[#allocation23_spill] sm:$0xff] %v7385_v37  ;;  %v1990_v19 = vmax.f32 %v1892_v55, 0.0  ;;  %v4793_v21 = vadd.f32 %v7137_v49, %v1671_v10  ;;  %v1673_v27 = vpop.f32.mrb[33].mxu0  ;;  %2708 = vmatprep.mubr.f32.mxu1 %v7382_v45  ;;  %4280 = vmatprep.mubr.f32.mxu0 %v7385_v37  ;;  %v2142_v15 = vsel %vm290_vm0, 0.0, %v7378_v48 }
 0x2e4   : > { %8760 = vst [vmem:[#allocation25_spill] sm:$0xff] %v7388_v46  ;;  %3972 = vmatmul.mubr.msk.f32.gmra.mrb[60].mxu1 %vm5481_vm2, %v7343_v51  ;;  %4281 = vmatmul.mubr.f32.gmra.mrb[74].mxu0 %v7388_v46  ;;  %8761 = vst [vmem:[#allocation28_spill] sm:$0xff] %v7400_v23  ;;  %v2377_v39 = vrot.slane %v2142_v15, 1  ;;  %v2482_v33 = vrot.slane %v2142_v15, 2 }
 0x2e5   : > { %v2061_v2 = vrot.slane %v1990_v19, 7  ;;  %v1897_v10 = vadd.f32 %v4793_v21, %v7054_v12  ;;  %2713 = vmatprep.mubr.f32.mxu1 %v7400_v23 }
 0x2e6   : > { %v1676_v27 = vpop.f32.mrb[34].mxu0 }
 0x2e7   : > { %v7406_v60 = vsel %vm290_vm0, %v7378_v48, %v2061_v2  ;;  %v2158_v56 = vsel %vm290_vm0, %v2061_v2, 0.0  ;;  %v1991_v20 = vmax.f32 %v1897_v10, 0.0  ;;  %v4794_v55 = vadd.f32 %v7137_v49, %v1676_v27  ;;  %v1678_v45 = vpop.f32.mrb[35].mxu0 }
 0x2e8   : > { %2714 = vmatmul.mubr.f32.gmra.mrb[62].mxu1 %v7371_v42  ;;  %v2378_v30 = vrot.slane %v7406_v60, 1  ;;  %v2483_v12 = vrot.slane %v7406_v60, 2  ;;  %v2485_v47 = vrot.slane %v2158_v56, 2  ;;  %v2380_v19 = vrot.slane %v2158_v56, 1 }
 0x2e9   : > { %v7413_v21 = vrot.slane %v1991_v20, 7  ;;  %v1902_v15 = vadd.f32 %v4794_v55, %v7052_v32 }
 0x2ea   : > { %v1681_v23 = vpop.f32.mrb[36].mxu0  ;;  %v7417_v46 = vsel %vm602_vm1, %v2377_v39, %v2378_v30  ;;  %v7420_v2 = vsel %vm715_vm3, %v2482_v33, %v2483_v12  ;;  %v7423_v45 = vsel %vm715_vm3, %v2483_v12, %v2485_v47  ;;  %v7435_v39 = vsel %vm602_vm1, %v2378_v30, %v2380_v19 }
 0x2eb   : > { %8762 = vst [vmem:[#allocation31_spill] sm:$0xff] %v7417_v46  ;;  %8763 = vst [vmem:[#allocation34_spill] sm:$0xff] %v7420_v2  ;;  %v1992_v10 = vmax.f32 %v1902_v15, 0.0  ;;  %v4795_v27 = vadd.f32 %v7137_v49, %v1681_v23  ;;  %v1683_v37 = vpop.f32.mrb[37].mxu0  ;;  %2718 = vmatprep.mubr.f32.mxu1 %v7417_v46  ;;  %4283 = vmatprep.mubr.f32.mxu0 %v7420_v2  ;;  %v2143_v32 = vsel %vm290_vm0, 0.0, %v7413_v21 }
 0x2ec   : > { %8764 = vst [vmem:[#allocation37_spill] sm:$0xff] %v7423_v45  ;;  %3974 = vmatmul.mubr.msk.f32.gmra.mrb[64].mxu1 %vm5481_vm2, %v7378_v48  ;;  %4284 = vmatmul.mubr.f32.gmra.mrb[76].mxu0 %v7423_v45  ;;  %8765 = vst [vmem:[#allocation40_spill] sm:$0xff] %v7435_v39  ;;  %v2382_v56 = vrot.slane %v2143_v32, 1  ;;  %v2487_v20 = vrot.slane %v2143_v32, 2 }
 0x2ed   : > { %v2064_v33 = vrot.slane %v1992_v10, 7  ;;  %v1907_v23 = vadd.f32 %v4795_v27, %v7065_v8  ;;  %2723 = vmatprep.mubr.f32.mxu1 %v7435_v39 }
 0x2ee   : > { %v1686_v37 = vpop.f32.mrb[38].mxu0 }
 0x2ef   : > { %v7441_v55 = vsel %vm290_vm0, %v7413_v21, %v2064_v33  ;;  %v2159_v12 = vsel %vm290_vm0, %v2064_v33, 0.0  ;;  %v1993_v47 = vmax.f32 %v1907_v23, 0.0  ;;  %v4796_v15 = vadd.f32 %v7137_v49, %v1686_v37  ;;  %v1688_v46 = vpop.f32.mrb[39].mxu0 }
 0x2f0   : > { %8766 = vst [vmem:[#allocation43_spill] sm:$0xff] %v7441_v55  ;;  %2724 = vmatmul.mubr.f32.gmra.mrb[66].mxu1 %v7406_v60  ;;  %v2383_v30 = vrot.slane %v7441_v55, 1  ;;  %v2488_v8 = vrot.slane %v7441_v55, 2  ;;  %v2490_v19 = vrot.slane %v2159_v12, 2  ;;  %v2385_v10 = vrot.slane %v2159_v12, 1 }
 0x2f1   : > { %v7448_v27 = vrot.slane %v1993_v47, 7  ;;  %v1912_v32 = vadd.f32 %v4796_v15, %v7063_v1 }
 0x2f2   : > { %v1691_v39 = vpop.f32.mrb[40].mxu0  ;;  %v7452_v45 = vsel %vm602_vm1, %v2382_v56, %v2383_v30  ;;  %v7455_v33 = vsel %vm715_vm3, %v2487_v20, %v2488_v8  ;;  %v7458_v46 = vsel %vm715_vm3, %v2488_v8, %v2490_v19  ;;  %v7470_v56 = vsel %vm602_vm1, %v2383_v30, %v2385_v10 }
 0x2f3   : > { %8767 = vst [vmem:[#allocation45_spill] sm:$0xff] %v7448_v27  ;;  %8768 = vst [vmem:[#allocation48_spill] sm:$0xff] %v7452_v45  ;;  %v1994_v23 = vmax.f32 %v1912_v32, 0.0  ;;  %v4797_v37 = vadd.f32 %v7137_v49, %v1691_v39  ;;  %v1693_v2 = vpop.f32.mrb[41].mxu0  ;;  %2728 = vmatprep.mubr.f32.mxu1 %v7452_v45  ;;  %4286 = vmatprep.mubr.f32.mxu0 %v7455_v33  ;;  %v2144_v1 = vsel %vm290_vm0, 0.0, %v7448_v27 }
 0x2f4   : > { %8769 = vst [vmem:[#allocation50_spill] sm:$0xff] %v7455_v33  ;;  %8770 = vst [vmem:[#allocation51_spill] sm:$0xff] %v7458_v46  ;;  %3976 = vmatmul.mubr.msk.f32.gmra.mrb[68].mxu1 %vm5481_vm2, %v7413_v21  ;;  %4287 = vmatmul.mubr.f32.gmra.mrb[78].mxu0 %v7458_v46  ;;  %v2387_v12 = vrot.slane %v2144_v1, 1  ;;  %v2492_v47 = vrot.slane %v2144_v1, 2 }
 0x2f5   : > { %8771 = vst [vmem:[#allocation22_spill] sm:$0xff] %v7470_v56  ;;  %v2067_v20 = vrot.slane %v1994_v23, 7  ;;  %v1917_v39 = vadd.f32 %v4797_v37, %v7076_v3  ;;  %2733 = vmatprep.mubr.f32.mxu1 %v7470_v56 }
 0x2f6   : > { %v1696_v2 = vpop.f32.mrb[42].mxu0 }
 0x2f7   : > { %v7476_v15 = vsel %vm290_vm0, %v7448_v27, %v2067_v20  ;;  %v2160_v8 = vsel %vm290_vm0, %v2067_v20, 0.0  ;;  %v1995_v19 = vmax.f32 %v1917_v39, 0.0  ;;  %v4798_v32 = vadd.f32 %v7137_v49, %v1696_v2  ;;  %v1698_v45 = vpop.f32.mrb[43].mxu0 }
 0x2f8   : > { %8772 = vst [vmem:[#allocation24_spill] sm:$0xff] %v7476_v15  ;;  %2734 = vmatmul.mubr.f32.gmra.mrb[70].mxu1 %v7441_v55  ;;  %v2388_v30 = vrot.slane %v7476_v15, 1  ;;  %v2493_v3 = vrot.slane %v7476_v15, 2  ;;  %v2495_v10 = vrot.slane %v2160_v8, 2  ;;  %v2390_v23 = vrot.slane %v2160_v8, 1 }
 0x2f9   : > { %v7483_v37 = vrot.slane %v1995_v19, 7  ;;  %v1922_v1 = vadd.f32 %v4798_v32, %v7074_v5 }
 0x2fa   : > { %v1701_v56 = vpop.f32.mrb[44].mxu0  ;;  %v7487_v46 = vsel %vm602_vm1, %v2387_v12, %v2388_v30  ;;  %v7490_v20 = vsel %vm715_vm3, %v2492_v47, %v2493_v3  ;;  %v7493_v45 = vsel %vm715_vm3, %v2493_v3, %v2495_v10  ;;  %v7505_v12 = vsel %vm602_vm1, %v2388_v30, %v2390_v23 }
 0x2fb   : > { %8773 = vst [vmem:[#allocation26_spill] sm:$0xff] %v7483_v37  ;;  %8774 = vst [vmem:[#allocation30_spill] sm:$0xff] %v7487_v46  ;;  %v1996_v39 = vmax.f32 %v1922_v1, 0.0  ;;  %v4799_v2 = vadd.f32 %v7137_v49, %v1701_v56  ;;  %v1703_v33 = vpop.f32.mrb[45].mxu0  ;;  %2738 = vmatprep.mubr.f32.mxu1 %v7487_v46  ;;  %4289 = vmatprep.mubr.f32.mxu0 %v7490_v20  ;;  %v2145_v5 = vsel %vm290_vm0, 0.0, %v7483_v37 }
 0x2fc   : > { %8775 = vst [vmem:[#allocation32_spill] sm:$0xff] %v7490_v20  ;;  %8776 = vst [vmem:[#allocation36_spill] sm:$0xff] %v7493_v45  ;;  %3978 = vmatmul.mubr.msk.f32.gmra.mrb[72].mxu1 %vm5481_vm2, %v7448_v27  ;;  %4290 = vmatmul.mubr.f32.gmra.mrb[80].mxu0 %v7493_v45  ;;  %v2392_v8 = vrot.slane %v2145_v5, 1  ;;  %v2497_v19 = vrot.slane %v2145_v5, 2 }
 0x2fd   : > { %8777 = vst [vmem:[#allocation38_spill] sm:$0xff] %v7505_v12  ;;  %v2070_v47 = vrot.slane %v1996_v39, 7  ;;  %v1927_v56 = vadd.f32 %v4799_v2, %v7087_v0  ;;  %2743 = vmatprep.mubr.f32.mxu1 %v7505_v12 }
 0x2fe   : > { %v1706_v33 = vpop.f32.mrb[46].mxu0 }
 0x2ff   : > { %v7511_v32 = vsel %vm290_vm0, %v7483_v37, %v2070_v47  ;;  %v2161_v3 = vsel %vm290_vm0, %v2070_v47, 0.0  ;;  %v1997_v10 = vmax.f32 %v1927_v56, 0.0  ;;  %v4800_v1 = vadd.f32 %v7137_v49, %v1706_v33  ;;  %v1708_v46 = vpop.f32.mrb[47].mxu0 }
 0x300   : > { %8778 = vst [vmem:[#allocation42_spill] sm:$0xff] %v7511_v32  ;;  %2744 = vmatmul.mubr.f32.gmra.mrb[74].mxu1 %v7476_v15  ;;  %v2393_v30 = vrot.slane %v7511_v32, 1  ;;  %v2498_v0 = vrot.slane %v7511_v32, 2  ;;  %v2500_v23 = vrot.slane %v2161_v3, 2  ;;  %v2395_v39 = vrot.slane %v2161_v3, 1 }
 0x301   : > { %v7518_v2 = vrot.slane %v1997_v10, 7  ;;  %v1932_v5 = vadd.f32 %v4800_v1, %v7085_v61 }
 0x302   : > { %v1711_v12 = vpop.f32.mrb[48].mxu0  ;;  %v7522_v45 = vsel %vm602_vm1, %v2392_v8, %v2393_v30  ;;  %v7525_v47 = vsel %vm715_vm3, %v2497_v19, %v2498_v0  ;;  %v7528_v46 = vsel %vm715_vm3, %v2498_v0, %v2500_v23  ;;  %v7540_v8 = vsel %vm602_vm1, %v2393_v30, %v2395_v39 }
 0x303   : > { %8779 = vst [vmem:[#allocation44_spill] sm:$0xff] %v7518_v2  ;;  %8780 = vst [vmem:[#allocation47_spill] sm:$0xff] %v7522_v45  ;;  %v1998_v56 = vmax.f32 %v1932_v5, 0.0  ;;  %v4801_v33 = vadd.f32 %v7137_v49, %v1711_v12  ;;  %v1713_v20 = vpop.f32.mrb[49].mxu0  ;;  %2748 = vmatprep.mubr.f32.mxu1 %v7522_v45  ;;  %4292 = vmatprep.mubr.f32.mxu0 %v7525_v47  ;;  %v2146_v61 = vsel %vm290_vm0, 0.0, %v7518_v2 }
 0x304   : > { %8781 = vst [vmem:[#allocation49_spill] sm:$0xff] %v7525_v47  ;;  %8782 = vst [vmem:[#allocation27_spill] sm:$0xff] %v7528_v46  ;;  %3980 = vmatmul.mubr.msk.f32.gmra.mrb[76].mxu1 %vm5481_vm2, %v7483_v37  ;;  %4293 = vmatmul.mubr.f32.gmra.mrb[82].mxu0 %v7528_v46  ;;  %v2397_v3 = vrot.slane %v2146_v61, 1  ;;  %v2502_v10 = vrot.slane %v2146_v61, 2 }
 0x305   : > { %8783 = vst [vmem:[#allocation54_spill] sm:$0xff] %v7540_v8  ;;  %v2073_v19 = vrot.slane %v1998_v56, 7  ;;  %v1937_v12 = vadd.f32 %v4801_v33, %v7098_v54  ;;  %2753 = vmatprep.mubr.f32.mxu1 %v7540_v8 }
 0x306   : > { %v1716_v20 = vpop.f32.mrb[50].mxu0 }
 0x307   : > { %v7546_v1 = vsel %vm290_vm0, %v7518_v2, %v2073_v19  ;;  %v2162_v0 = vsel %vm290_vm0, %v2073_v19, 0.0  ;;  %v1999_v23 = vmax.f32 %v1937_v12, 0.0  ;;  %v4802_v5 = vadd.f32 %v7137_v49, %v1716_v20  ;;  %v1718_v45 = vpop.f32.mrb[51].mxu0 }
 0x308   : > { %8784 = vst [vmem:[#allocation55_spill] sm:$0xff] %v7546_v1  ;;  %2754 = vmatmul.mubr.f32.gmra.mrb[78].mxu1 %v7511_v32  ;;  %v2398_v30 = vrot.slane %v7546_v1, 1  ;;  %v2503_v54 = vrot.slane %v7546_v1, 2  ;;  %v2505_v39 = vrot.slane %v2162_v0, 2  ;;  %v2400_v56 = vrot.slane %v2162_v0, 1 }
 0x309   : > { %v7553_v33 = vrot.slane %v1999_v23, 7  ;;  %v1942_v61 = vadd.f32 %v4802_v5, %v7096_v18 }
 0x30a   : > { %v1721_v8 = vpop.f32.mrb[52].mxu0  ;;  %v7557_v46 = vsel %vm602_vm1, %v2397_v3, %v2398_v30  ;;  %v7560_v19 = vsel %vm715_vm3, %v2502_v10, %v2503_v54  ;;  %v7563_v45 = vsel %vm715_vm3, %v2503_v54, %v2505_v39  ;;  %v7575_v3 = vsel %vm602_vm1, %v2398_v30, %v2400_v56 }
 0x30b   : > { %8785 = vst [vmem:[#allocation56_spill] sm:$0xff] %v7553_v33  ;;  %8786 = vst [vmem:[#allocation57_spill] sm:$0xff] %v7557_v46  ;;  %v2000_v12 = vmax.f32 %v1942_v61, 0.0  ;;  %v4803_v20 = vadd.f32 %v7137_v49, %v1721_v8  ;;  %v1723_v47 = vpop.f32.mrb[53].mxu0  ;;  %2758 = vmatprep.mubr.f32.mxu1 %v7557_v46  ;;  %4295 = vmatprep.mubr.f32.mxu0 %v7560_v19  ;;  %v2147_v18 = vsel %vm290_vm0, 0.0, %v7553_v33 }
 0x30c   : > { %8787 = vst [vmem:[#allocation58_spill] sm:$0xff] %v7560_v19  ;;  %8788 = vst [vmem:[#allocation59_spill] sm:$0xff] %v7563_v45  ;;  %3982 = vmatmul.mubr.msk.f32.gmra.mrb[80].mxu1 %vm5481_vm2, %v7518_v2  ;;  %4296 = vmatmul.mubr.f32.gmra.mrb[84].mxu0 %v7563_v45  ;;  %v2402_v0 = vrot.slane %v2147_v18, 1  ;;  %v2507_v23 = vrot.slane %v2147_v18, 2 }
 0x30d   : > { %8789 = vst [vmem:[#allocation60_spill] sm:$0xff] %v7575_v3  ;;  %v2076_v10 = vrot.slane %v2000_v12, 7  ;;  %v1947_v8 = vadd.f32 %v4803_v20, %v7109_v59  ;;  %2763 = vmatprep.mubr.f32.mxu1 %v7575_v3 }
 0x30e   : > { %v1726_v47 = vpop.f32.mrb[54].mxu0 }
 0x30f   : > { %v7581_v5 = vsel %vm290_vm0, %v7553_v33, %v2076_v10  ;;  %v2163_v54 = vsel %vm290_vm0, %v2076_v10, 0.0  ;;  %v2001_v39 = vmax.f32 %v1947_v8, 0.0  ;;  %v4804_v61 = vadd.f32 %v7137_v49, %v1726_v47  ;;  %v1728_v46 = vpop.f32.mrb[55].mxu0 }
 0x310   : > { %8790 = vst [vmem:[#allocation61_spill] sm:$0xff] %v7581_v5  ;;  %2764 = vmatmul.mubr.f32.gmra.mrb[82].mxu1 %v7546_v1  ;;  %v2403_v30 = vrot.slane %v7581_v5, 1  ;;  %v2508_v59 = vrot.slane %v7581_v5, 2  ;;  %v2510_v56 = vrot.slane %v2163_v54, 2  ;;  %v2405_v12 = vrot.slane %v2163_v54, 1 }
 0x311   : > { %v7588_v20 = vrot.slane %v2001_v39, 7  ;;  %v1952_v18 = vadd.f32 %v4804_v61, %v7107_v7 }
 0x312   : > { %v1731_v3 = vpop.f32.mrb[56].mxu0  ;;  %v7592_v45 = vsel %vm602_vm1, %v2402_v0, %v2403_v30  ;;  %v7595_v10 = vsel %vm715_vm3, %v2507_v23, %v2508_v59  ;;  %v7598_v46 = vsel %vm715_vm3, %v2508_v59, %v2510_v56  ;;  %v7608_v7 = vsel %vm602_vm1, %v2403_v30, %v2405_v12 }
 0x313   : > { %8791 = vst [vmem:[#allocation62_spill] sm:$0xff] %v7588_v20  ;;  %v2002_v8 = vmax.f32 %v1952_v18, 0.0  ;;  %v4805_v47 = vadd.f32 %v7137_v49, %v1731_v3  ;;  %v1733_v19 = vpop.f32.mrb[57].mxu0  ;;  %2768 = vmatprep.mubr.f32.mxu1 %v7592_v45  ;;  %4298 = vmatprep.mubr.f32.mxu0 %v7595_v10  ;;  %8792 = vst [vmem:[#allocation63_spill] sm:$0xff] %v7608_v7 }
 0x314   : > { %3984 = vmatmul.mubr.msk.f32.gmra.mrb[84].mxu1 %vm5481_vm2, %v7553_v33  ;;  %4299 = vmatmul.mubr.f32.gmra.mrb[86].mxu0 %v7598_v46  ;;  %v7614_v19 = vsel %vm290_vm0, 0.0, %v7588_v20 }
 0x315   : > { %v2079_v0 = vrot.slane %v2002_v8, 7  ;;  %v1957_v23 = vadd.f32 %v4805_v47, %v7120_v31  ;;  %2773 = vmatprep.mubr.f32.mxu1 %v7608_v7  ;;  %v2407_v31 = vrot.slane %v7614_v19, 1 }
 0x316   : > { %v1736_v3 = vpop.f32.mrb[58].mxu0 }
 0x317   : > { %v7618_v54 = vsel %vm290_vm0, %v7588_v20, %v2079_v0  ;;  %v7621_v39 = vsel %vm290_vm0, %v2079_v0, 0.0  ;;  %v2003_v61 = vmax.f32 %v1957_v23, 0.0  ;;  %v4806_v30 = vadd.f32 %v7137_v49, %v1736_v3  ;;  %v1738_v59 = vpop.f32.mrb[59].mxu0 }
 0x318   : > { %8793 = vst [vmem:[#allocation64_spill] sm:$0xff] %v7618_v54  ;;  %2774 = vmatmul.mubr.f32.gmra.mrb[86].mxu1 %v7581_v5  ;;  %v2408_v56 = vrot.slane %v7618_v54, 1  ;;  %v2410_v12 = vrot.slane %v7621_v39, 1 }
 0x319   : > { %v7628_v18 = vrot.slane %v2003_v61, 7  ;;  %v1962_v8 = vadd.f32 %v4806_v30, %v7118_v25 }
 0x31a   : > { %v1741_v47 = vpop.f32.mrb[60].mxu0  ;;  %v7632_v0 = vsel %vm602_vm1, %v2407_v31, %v2408_v56  ;;  %v7640_v7 = vsel %vm602_vm1, %v2408_v56, %v2410_v12 }
 0x31b   : > { %8794 = vst [vmem:[#allocation65_spill] sm:$0xff] %v7628_v18  ;;  %v2004_v23 = vmax.f32 %v1962_v8, 0.0  ;;  %v4807_v3 = vadd.f32 %v7137_v49, %v1741_v47  ;;  %v1743_v59 = vpop.f32.mrb[61].mxu0  ;;  %2778 = vmatprep.mubr.f32.mxu1 %v7632_v0  ;;  %8795 = vst [vmem:[#allocation66_spill] sm:$0xff] %v7640_v7  ;;  %v7648_v30 = vsel %vm290_vm0, 0.0, %v7628_v18 }
 0x31c   : > { %3986 = vmatmul.mubr.msk.f32.gmra.mrb[88].mxu1 %vm5481_vm2, %v7588_v20 }
 0x31d   : > { %v2082_v61 = vrot.slane %v2004_v23, 7  ;;  %v7643_v25 = vadd.f32 %v4807_v3, %v7131_v44  ;;  %2783 = vmatprep.mubr.f32.mxu1 %v7640_v7  ;;  %v2412_v44 = vrot.slane %v7648_v30, 1 }
 0x31e   : > { %v1746_v31 = vpop.f32.mrb[62].mxu0 }
 0x31f   : > { %v7652_v8 = vsel %vm290_vm0, %v7628_v18, %v2082_v61  ;;  %v7655_v47 = vsel %vm290_vm0, %v2082_v61, 0.0  ;;  %v4808_v56 = vadd.f32 %v7137_v49, %v1746_v31  ;;  %v1748_v12 = vpop.f32.mrb[63].mxu0  ;;  %v2231_v61 = vld [vmem:[%s8422_s3 + $0x200] sm:$0xff] }
 0x320   : > { %8796 = vst [vmem:[#allocation67_spill] sm:$0xff] %v7652_v8  ;;  %2784 = vmatmul.mubr.f32.gmra.mrb[90].mxu1 %v7618_v54  ;;  %v2413_v23 = vrot.slane %v7652_v8, 1  ;;  %v2415_v3 = vrot.slane %v7655_v47, 1  ;;  %v2234_v12 = vld [vmem:[%s8422_s3 + $0x218] sm:$0xff] }
 0x321   : > { %v7663_v59 = vadd.f32 %v4808_v56, %v7129_v6  ;;  %v2232_v6 = vld [vmem:[%s8422_s3 + $0x208] sm:$0xff]  ;;  %v2233_v56 = vld [vmem:[%s8422_s3 + $0x210] sm:$0xff] }
 0x322   : > { %v7666_v7 = vsel %vm602_vm1, %v2412_v44, %v2413_v23  ;;  %v7673_v49 = vsel %vm602_vm1, %v2413_v23, %v2415_v3  ;;  %v4634_v31 = vpack.c.bf16 %v2232_v6, %v2231_v61  ;;  %v4637_v44 = vpack.c.bf16 %v2234_v12, %v2233_v56  ;;  %v2236_v23 = vld [vmem:[%s8422_s3 + $0x228] sm:$0xff] }
 0x323   : > { %2788 = vmatprep.mubr.f32.mxu1 %v7666_v7  ;;  %v2448_v3 = vrot.slane %v7167_v58, 2  ;;  %v2447_v61 = vrot.slane %v7163_v22, 2  ;;  %v2450_v12 = vrot.slane %v7170_v62, 2 }
 0x324   : > { %3988 = vmatmul.mubr.msk.f32.gmra.mrb[92].mxu1 %vm5481_vm2, %v7628_v18 }
 0x325   : > { %2793 = vmatprep.mubr.f32.mxu1 %v7673_v49  ;;  %v7715_v56 = vsel %vm715_vm3, %v2447_v61, %v2448_v3  ;;  %v2241_v61 = vld [vmem:[%s8422_s3 + $0x250] sm:$0xff] }
 0x328   : > { %2794 = vmatmul.mubr.f32.gmra.mrb[94].mxu1 %v7652_v8 }
 0x329   : > { %3990 = vmatprep.mubr.msk.f32.mxu1 %vm5481_vm2, %v7155_v53  ;;  %v2235_v53 = vld [vmem:[%s8422_s3 + $0x220] sm:$0xff] }
 0x32a   : > { %v4640_v6 = vpack.c.bf16 %v2236_v23, %v2235_v53  ;;  %v2240_v53 = vld [vmem:[%s8422_s3 + $0x248] sm:$0xff]  ;;  %v7728_v23 = vsel %vm715_vm3, %v2448_v3, %v2450_v12 }
 0x32c   : > { %2864 = vmatmul.mubr.f32.vlgmr.msra.gmra.mrb[32].mxu1 %v6054_v9  ;;  %v8808_v9 = vld [vmem:[#allocation27_spill] sm:$0xff] }
 0x32d   : > { %2868 = vmatprep.mubr.f32.mxu1 %v7167_v58  ;;  %4635 = vmatpush1.bf16.msra.mxu1 %v4634_v31  ;;  %v2237_v31 = vld [vmem:[%s8422_s3 + $0x230] sm:$0xff]  ;;  %v2238_v58 = vld [vmem:[%s8422_s3 + $0x238] sm:$0xff] }
 0x32e   : > { %4636 = vmatprep.subr.bf16.mxu1 %v8645_v14  ;;  %v4643_v22 = vpack.c.bf16 %v2238_v58, %v2237_v31  ;;  %v2243_v31 = vld [vmem:[%s8422_s3 + $0x260] sm:$0xff]  ;;  %v2244_v58 = vld [vmem:[%s8422_s3 + $0x268] sm:$0xff] }
 0x32f   : > { %v4652_v12 = vpack.c.bf16 %v2244_v58, %v2243_v31  ;;  %v2250_v31 = vld [vmem:[%s8422_s3 + $0x298] sm:$0xff] }
 0x330   : > { %2869 = vmatmul.mubr.f32.gmra.mrb[34].mxu1 %v6066_v57  ;;  %v8807_v57 = vld [vmem:[#allocation49_spill] sm:$0xff] }
 0x331   : > { %3992 = vmatprep.mubr.msk.f32.mxu1 %vm5481_vm2, %v7176_v29  ;;  %4638 = vmatpush1.bf16.msra.mxu1 %v4637_v44  ;;  %v2239_v44 = vld [vmem:[%s8422_s3 + $0x240] sm:$0xff] }
 0x332   : > { %4639 = vmatprep.subr.bf16.mxu1 %v8645_v14  ;;  %v4646_v62 = vpack.c.bf16 %v2240_v53, %v2239_v44  ;;  %v2246_v44 = vld [vmem:[%s8422_s3 + $0x278] sm:$0xff] }
 0x334   : > { %2874 = vmatmul.mubr.f32.gmra.mrb[36].mxu1 %v7715_v56 }
 0x335   : > { %2878 = vmatprep.mubr.f32.mxu1 %v7196_v50  ;;  %4641 = vmatpush1.bf16.msra.mxu1 %v4640_v6  ;;  %v2242_v6 = vld [vmem:[%s8422_s3 + $0x258] sm:$0xff] }
 0x336   : > { %4642 = vmatprep.subr.bf16.mxu1 %v8645_v14  ;;  %v4649_v3 = vpack.c.bf16 %v2242_v6, %v2241_v61  ;;  %v2248_v61 = vld [vmem:[%s8422_s3 + $0x288] sm:$0xff] }
 0x338   : > { %2879 = vmatmul.mubr.f32.gmra.mrb[38].mxu1 %v7728_v23 }
 0x339   : > { %3994 = vmatprep.mubr.msk.f32.mxu1 %vm5481_vm2, %v7203_v24  ;;  %4644 = vmatpush1.bf16.msra.mxu1 %v4643_v22  ;;  %v2245_v22 = vld [vmem:[%s8422_s3 + $0x270] sm:$0xff] }
 0x33a   : > { %4645 = vmatprep.subr.bf16.mxu1 %v8645_v14  ;;  %v4655_v53 = vpack.c.bf16 %v2246_v44, %v2245_v22  ;;  %v2252_v22 = vld [vmem:[%s8422_s3 + $0x2a8] sm:$0xff] }
 0x33c   : > { %2884 = vmatmul.mubr.f32.gmra.mrb[40].mxu1 %v7210_v52 }
 0x33d   : > { %2888 = vmatprep.mubr.f32.mxu1 %v7231_v13  ;;  %4647 = vmatpush1.bf16.msra.mxu1 %v4646_v62  ;;  %v2247_v62 = vld [vmem:[%s8422_s3 + $0x280] sm:$0xff] }
 0x33e   : > { %4648 = vmatprep.subr.bf16.mxu1 %v8645_v14  ;;  %v4658_v6 = vpack.c.bf16 %v2248_v61, %v2247_v62  ;;  %v2254_v62 = vld [vmem:[%s8422_s3 + $0x2b8] sm:$0xff] }
 0x340   : > { %2889 = vmatmul.mubr.f32.gmra.mrb[42].mxu1 %v7213_v40 }
 0x341   : > { %3996 = vmatprep.mubr.msk.f32.mxu1 %vm5481_vm2, %v7238_v17  ;;  %4650 = vmatpush1.bf16.msra.mxu1 %v4649_v3  ;;  %v2249_v3 = vld [vmem:[%s8422_s3 + $0x290] sm:$0xff] }
 0x342   : > { %4651 = vmatprep.subr.bf16.mxu1 %v8645_v14  ;;  %v4661_v58 = vpack.c.bf16 %v2250_v31, %v2249_v3  ;;  %v2256_v3 = vld [vmem:[%s8422_s3 + $0x2c8] sm:$0xff] }
 0x344   : > { %2894 = vmatmul.mubr.f32.gmra.mrb[44].mxu1 %v7245_v28 }
 0x345   : > { %2898 = vmatprep.mubr.f32.mxu1 %v7266_v26  ;;  %4653 = vmatpush1.bf16.msra.mxu1 %v4652_v12  ;;  %v2251_v12 = vld [vmem:[%s8422_s3 + $0x2a0] sm:$0xff] }
 0x346   : > { %4654 = vmatprep.subr.bf16.mxu1 %v8645_v14  ;;  %v4664_v44 = vpack.c.bf16 %v2252_v22, %v2251_v12  ;;  %v2258_v12 = vld [vmem:[%s8422_s3 + $0x2d8] sm:$0xff]  ;;  %v8797_v22 = vld [vmem:[#allocation18_spill] sm:$0xff] }
 0x348   : > { %2899 = vmatmul.mubr.f32.gmra.mrb[46].mxu1 %v7248_v36 }
 0x349   : > { %3998 = vmatprep.mubr.msk.f32.mxu1 %vm5481_vm2, %v7273_v16  ;;  %4656 = vmatpush1.bf16.msra.mxu1 %v4655_v53  ;;  %v2253_v53 = vld [vmem:[%s8422_s3 + $0x2b0] sm:$0xff] }
 0x34a   : > { %4657 = vmatprep.subr.bf16.mxu1 %v8645_v14  ;;  %v4667_v61 = vpack.c.bf16 %v2254_v62, %v2253_v53  ;;  %v2259_v53 = vld [vmem:[%s8422_s3 + $0x2e0] sm:$0xff]  ;;  %v2260_v62 = vld [vmem:[%s8422_s3 + $0x2e8] sm:$0xff] }
 0x34c   : > { %2904 = vmatmul.mubr.f32.gmra.mrb[48].mxu1 %v7280_v38 }
 0x34d   : > { %2908 = vmatprep.mubr.f32.mxu1 %v7301_v63  ;;  %4659 = vmatpush1.bf16.msra.mxu1 %v4658_v6  ;;  %v2255_v6 = vld [vmem:[%s8422_s3 + $0x2c0] sm:$0xff] }
 0x34e   : > { %4660 = vmatprep.subr.bf16.mxu1 %v8645_v14  ;;  %v4670_v31 = vpack.c.bf16 %v2256_v3, %v2255_v6  ;;  %v4676_v6 = vpack.c.bf16 %v2260_v62, %v2259_v53  ;;  %v2261_v3 = vld [vmem:[%s8422_s3 + $0x2f0] sm:$0xff]  ;;  %v8801_v53 = vld [vmem:[#allocation34_spill] sm:$0xff]  ;;  %v8802_v62 = vld [vmem:[#allocation37_spill] sm:$0xff] }
 0x350   : > { %2909 = vmatmul.mubr.f32.gmra.mrb[50].mxu1 %v7283_v35 }
 0x351   : > { %4000 = vmatprep.mubr.msk.f32.mxu1 %vm5481_vm2, %v7308_v34  ;;  %4662 = vmatpush1.bf16.msra.mxu1 %v4661_v58  ;;  %v2257_v58 = vld [vmem:[%s8422_s3 + $0x2d0] sm:$0xff] }
 0x352   : > { %4663 = vmatprep.subr.bf16.mxu1 %v8645_v14 }
 0x354   : > { %2914 = vmatmul.mubr.f32.gmra.mrb[52].mxu1 %v7315_v11 }
 0x355   : > { %2918 = vmatprep.mubr.f32.mxu1 %v7336_v43  ;;  %4665 = vmatpush1.bf16.msra.mxu1 %v4664_v44  ;;  %v4673_v44 = vpack.c.bf16 %v2258_v12, %v2257_v58  ;;  %v8799_v58 = vld [vmem:[#allocation23_spill] sm:$0xff] }
 0x356   : > { %4666 = vmatprep.subr.bf16.mxu1 %v8645_v14 }
 0x358   : > { %2919 = vmatmul.mubr.f32.gmra.mrb[54].mxu1 %v7318_v41 }
 0x359   : > { %4002 = vmatprep.mubr.msk.f32.mxu1 %vm5481_vm2, %v7343_v51  ;;  %4668 = vmatpush1.bf16.msra.mxu1 %v4667_v61  ;;  %v8798_v61 = vld [vmem:[#allocation19_spill] sm:$0xff] }
 0x35a   : > { %4669 = vmatprep.subr.bf16.mxu1 %v8645_v14 }
 0x35c   : > { %2924 = vmatmul.mubr.f32.gmra.mrb[56].mxu1 %v8797_v22 }
 0x35d   : > { %2928 = vmatprep.mubr.f32.mxu1 %v7371_v42  ;;  %4671 = vmatpush1.bf16.msra.mxu1 %v4670_v31  ;;  %v2262_v31 = vld [vmem:[%s8422_s3 + $0x2f8] sm:$0xff] }
 0x35e   : > { %4672 = vmatprep.subr.bf16.mxu1 %v8645_v14  ;;  %v4679_v12 = vpack.c.bf16 %v2262_v31, %v2261_v3  ;;  %v8804_v3 = vld [vmem:[#allocation51_spill] sm:$0xff]  ;;  %v8805_v31 = vld [vmem:[#allocation32_spill] sm:$0xff] }
 0x360   : > { %2929 = vmatmul.mubr.f32.gmra.mrb[58].mxu1 %v8798_v61 }
 0x361   : > { %4004 = vmatprep.mubr.msk.f32.mxu1 %vm5481_vm2, %v7378_v48  ;;  %4674 = vmatpush1.bf16.msra.mxu1 %v4673_v44  ;;  %v8800_v44 = vld [vmem:[#allocation25_spill] sm:$0xff] }
 0x362   : > { %4675 = vmatprep.subr.bf16.mxu1 %v8645_v14 }
 0x364   : > { %2934 = vmatmul.mubr.f32.gmra.mrb[60].mxu1 %v8799_v58 }
 0x365   : > { %2938 = vmatprep.mubr.f32.mxu1 %v7406_v60  ;;  %4677 = vmatpush1.bf16.msra.mxu1 %v4676_v6  ;;  %v8803_v6 = vld [vmem:[#allocation50_spill] sm:$0xff] }
 0x366   : > { %4678 = vmatprep.subr.bf16.mxu1 %v8645_v14 }
 0x368   : > { %2939 = vmatmul.mubr.f32.gmra.mrb[62].mxu1 %v8800_v44 }
 0x369   : > { %4006 = vmatprep.mubr.msk.f32.mxu1 %vm5481_vm2, %v7413_v21  ;;  %4680 = vmatpush1.bf16.msra.mxu1 %v4679_v12  ;;  %v8806_v12 = vld [vmem:[#allocation36_spill] sm:$0xff] }
 0x36a   : > { %4681 = vmatprep.subr.bf16.mxu1 %v8645_v14 }
 0x36c   : > { %2944 = vmatmul.mubr.f32.gmra.mrb[64].mxu1 %v8801_v53 }
 0x36d   : > { %2948 = vmatprep.mubr.f32.mxu1 %v7441_v55  ;;  %v8818_v55 = vld [vmem:[#allocation7_spill] sm:$0xff] }
 0x370   : > { %2949 = vmatmul.mubr.f32.gmra.mrb[66].mxu1 %v8802_v62 }
 0x371   : > { %4008 = vmatprep.mubr.msk.f32.mxu1 %vm5481_vm2, %v7448_v27 }
 0x374   : > { %2954 = vmatmul.mubr.f32.gmra.mrb[68].mxu1 %v8803_v6 }
 0x375   : > { %2958 = vmatprep.mubr.f32.mxu1 %v7476_v15  ;;  %v8811_v15 = vld [vmem:[#allocation59_spill] sm:$0xff] }
 0x378   : > { %2959 = vmatmul.mubr.f32.gmra.mrb[70].mxu1 %v8804_v3 }
 0x379   : > { %4010 = vmatprep.mubr.msk.f32.mxu1 %vm5481_vm2, %v7483_v37  ;;  %v8809_v37 = vld [vmem:[#allocation58_spill] sm:$0xff] }
 0x37c   : > { %2964 = vmatmul.mubr.f32.gmra.mrb[72].mxu1 %v8805_v31 }
 0x37d   : > { %2968 = vmatprep.mubr.f32.mxu1 %v7511_v32 }
 0x380   : > { %2969 = vmatmul.mubr.f32.gmra.mrb[74].mxu1 %v8806_v12 }
 0x381   : > { %4012 = vmatprep.mubr.msk.f32.mxu1 %vm5481_vm2, %v7518_v2  ;;  %v2515_v2 = vrot.slane %v7621_v39, 2 }
 0x384   : > { %2974 = vmatmul.mubr.f32.gmra.mrb[76].mxu1 %v8807_v57 }
 0x385   : > { %2978 = vmatprep.mubr.f32.mxu1 %v7546_v1 }
 0x388   : > { %2979 = vmatmul.mubr.f32.gmra.mrb[78].mxu1 %v8808_v9 }
 0x389   : > { %4014 = vmatprep.mubr.msk.f32.mxu1 %vm5481_vm2, %v7553_v33  ;;  %v2513_v33 = vrot.slane %v7618_v54, 2 }
 0x38c   : > { %2984 = vmatmul.mubr.f32.gmra.mrb[80].mxu1 %v8809_v37 }
 0x38d   : > { %2988 = vmatprep.mubr.f32.mxu1 %v7581_v5 }
 0x38f   : > { %v7875_v32 = vpop.f32.mrb[64].mxu0 }
 0x390   : > { %8810 = vst [vmem:[#allocation18_spill] sm:$0xff] %v7875_v32  ;;  %2989 = vmatmul.mubr.f32.gmra.mrb[82].mxu1 %v8811_v15  ;;  %v7878_v27 = vpop.f32.mrb[65].mxu0  ;;  %v2512_v32 = vrot.slane %v7614_v19, 2  ;;  %v2518_v19 = vrot.slane %v7652_v8, 2 }
 0x391   : > { %8812 = vst [vmem:[#allocation19_spill] sm:$0xff] %v7878_v27  ;;  %4016 = vmatprep.mubr.msk.f32.mxu1 %vm5481_vm2, %v7588_v20  ;;  %v2005_v27 = vmax.f32 %v7643_v25, 0.0 }
 0x392   : > { %v7897_v20 = vsel %vm715_vm3, %v2512_v32, %v2513_v33 }
 0x394   : > { %2994 = vmatmul.mubr.f32.gmra.mrb[84].mxu1 %v7595_v10 }
 0x395   : > { %2998 = vmatprep.mubr.f32.mxu1 %v7618_v54 }
 0x397   : > { %v7885_v1 = vpop.f32.mrb[66].mxu0 }
 0x398   : > { %8813 = vst [vmem:[#allocation23_spill] sm:$0xff] %v7885_v1  ;;  %2999 = vmatmul.mubr.f32.gmra.mrb[86].mxu1 %v7598_v46  ;;  %v7889_v5 = vpop.f32.mrb[67].mxu0  ;;  %v2006_v1 = vmax.f32 %v7663_v59, 0.0 }
 0x399   : > { %8814 = vst [vmem:[#allocation25_spill] sm:$0xff] %v7889_v5  ;;  %4018 = vmatprep.mubr.msk.f32.mxu1 %vm5481_vm2, %v7628_v18  ;;  %v7903_v5 = vrot.slane %v2005_v27, 7  ;;  %v7908_v18 = vsel %vm715_vm3, %v2513_v33, %v2515_v2  ;;  %v2517_v27 = vrot.slane %v7648_v30, 2  ;;  %v2520_v2 = vrot.slane %v7655_v47, 2  ;;  %v2263_v33 = vld [vmem:[%s8422_s3 + $0x300] sm:$0xff]  ;;  %v2264_v30 = vld [vmem:[%s8422_s3 + $0x308] sm:$0xff] }
 0x39a   : > { %v7911_v25 = vrot.slane %v2006_v1, 7 }
 0x39b   : > { %v7921_v39 = vsel %vm715_vm3, %v2517_v27, %v2518_v19  ;;  %v7940_v47 = vsel %vm715_vm3, %v2518_v19, %v2520_v2  ;;  %v2268_v2 = vld [vmem:[%s8422_s3 + $0x328] sm:$0xff] }
 0x39c   : > { %3004 = vmatmul.mubr.f32.gmra.mrb[88].mxu1 %v7897_v20  ;;  %v7928_v1 = vsel %vm290_vm0, %v7903_v5, %v7911_v25 }
 0x39d   : > { %3008 = vmatprep.mubr.f32.mxu1 %v7652_v8  ;;  %v2266_v8 = vld [vmem:[%s8422_s3 + $0x318] sm:$0xff] }
 0x39f   : > { %v7905_v54 = vpop.f32.mrb[68].mxu0 }
 0x3a0   : > { %8815 = vst [vmem:[#allocation34_spill] sm:$0xff] %v7905_v54  ;;  %3009 = vmatmul.mubr.f32.gmra.mrb[90].mxu1 %v7908_v18  ;;  %v7914_v32 = vpop.f32.mrb[69].mxu0  ;;  %v4682_v54 = vpack.c.bf16 %v2264_v30, %v2263_v33  ;;  %v8820_v30 = vld [vmem:[#allocation8_spill] sm:$0xff] }
 0x3a1   : > { %8816 = vst [vmem:[#allocation37_spill] sm:$0xff] %v7914_v32  ;;  %4020 = vmatprep.mubr.msk.f32.mxu1 %vm5481_vm2, %v7903_v5  ;;  %v2265_v32 = vld [vmem:[%s8422_s3 + $0x310] sm:$0xff] }
 0x3a2   : > { %v4685_v19 = vpack.c.bf16 %v2266_v8, %v2265_v32  ;;  %v2270_v8 = vld [vmem:[%s8422_s3 + $0x338] sm:$0xff] }
 0x3a4   : > { %3014 = vmatmul.mubr.f32.gmra.mrb[92].mxu1 %v7921_v39 }
 0x3a5   : > { %3018 = vmatprep.mubr.f32.mxu1 %v7928_v1 }
 0x3a7   : > { %v7937_v59 = vpop.f32.mrb[70].mxu0 }
 0x3a8   : > { %8817 = vst [vmem:[#allocation50_spill] sm:$0xff] %v7937_v59  ;;  %3019 = vmatmul.mubr.f32.gmra.mrb[94].mxu1 %v7940_v47  ;;  %v7943_v27 = vpop.f32.mrb[71].mxu0 }
 0x3a9   : > { %3088 = vmatprep.mubr.f32.mxu1 %v7715_v56  ;;  %v2267_v56 = vld [vmem:[%s8422_s3 + $0x320] sm:$0xff] }
 0x3ac   : > { %3089 = vmatmul.mubr.f32.vlgmr.msra.gmra.mrb[32].mxu1 %v8818_v55  ;;  %v4688_v55 = vpack.c.bf16 %v2268_v2, %v2267_v56  ;;  %v8824_v2 = vld [vmem:[#allocation10_spill] sm:$0xff] }
 0x3ad   : > { %3093 = vmatprep.mubr.f32.mxu1 %v7728_v23  ;;  %4683 = vmatpush1.bf16.msra.mxu1 %v4682_v54  ;;  %v2269_v54 = vld [vmem:[%s8422_s3 + $0x330] sm:$0xff]  ;;  %v8822_v23 = vld [vmem:[#allocation9_spill] sm:$0xff] }
 0x3ae   : > { %4684 = vmatprep.subr.bf16.mxu1 %v8645_v14  ;;  %v4691_v32 = vpack.c.bf16 %v2270_v8, %v2269_v54  ;;  %v2274_v54 = vld [vmem:[%s8422_s3 + $0x358] sm:$0xff]  ;;  %v8826_v8 = vld [vmem:[#allocation11_spill] sm:$0xff] }
 0x3af   : > { %v7961_v33 = vpop.f32.mrb[72].mxu0 }
 0x3b0   : > { %8819 = vst [vmem:[#allocation51_spill] sm:$0xff] %v7961_v33  ;;  %3094 = vmatmul.mubr.f32.gmra.mrb[34].mxu1 %v8820_v30  ;;  %v7964_v59 = vpop.f32.mrb[73].mxu0 }
 0x3b1   : > { %8821 = vst [vmem:[#allocation32_spill] sm:$0xff] %v7964_v59  ;;  %3098 = vmatprep.mubr.f32.mxu1 %v7210_v52  ;;  %4686 = vmatpush1.bf16.msra.mxu1 %v4685_v19  ;;  %v2271_v52 = vld [vmem:[%s8422_s3 + $0x340] sm:$0xff]  ;;  %v2272_v19 = vld [vmem:[%s8422_s3 + $0x348] sm:$0xff] }
 0x3b2   : > { %4687 = vmatprep.subr.bf16.mxu1 %v8645_v14 }
 0x3b4   : > { %3099 = vmatmul.mubr.f32.gmra.mrb[36].mxu1 %v8822_v23 }
 0x3b5   : > { %3103 = vmatprep.mubr.f32.mxu1 %v7213_v40  ;;  %4689 = vmatpush1.bf16.msra.mxu1 %v4688_v55  ;;  %v4694_v40 = vpack.c.bf16 %v2272_v19, %v2271_v52  ;;  %v2273_v55 = vld [vmem:[%s8422_s3 + $0x350] sm:$0xff] }
 0x3b6   : > { %4690 = vmatprep.subr.bf16.mxu1 %v8645_v14  ;;  %v8828_v19 = vld [vmem:[#allocation12_spill] sm:$0xff] }
 0x3b7   : > { %v7983_v56 = vpop.f32.mrb[74].mxu0 }
 0x3b8   : > { %8823 = vst [vmem:[#allocation36_spill] sm:$0xff] %v7983_v56  ;;  %3104 = vmatmul.mubr.f32.gmra.mrb[38].mxu1 %v8824_v2  ;;  %v7986_v30 = vpop.f32.mrb[75].mxu0  ;;  %v4697_v56 = vpack.c.bf16 %v2274_v54, %v2273_v55  ;;  %v2278_v55 = vld [vmem:[%s8422_s3 + $0x378] sm:$0xff] }
 0x3b9   : > { %8825 = vst [vmem:[#allocation49_spill] sm:$0xff] %v7986_v30  ;;  %3108 = vmatprep.mubr.f32.mxu1 %v7245_v28  ;;  %4692 = vmatpush1.bf16.msra.mxu1 %v4691_v32  ;;  %v2275_v28 = vld [vmem:[%s8422_s3 + $0x360] sm:$0xff]  ;;  %v2276_v32 = vld [vmem:[%s8422_s3 + $0x368] sm:$0xff]  ;;  %v8830_v54 = vld [vmem:[#allocation13_spill] sm:$0xff] }
 0x3ba   : > { %4693 = vmatprep.subr.bf16.mxu1 %v8645_v14 }
 0x3bc   : > { %3109 = vmatmul.mubr.f32.gmra.mrb[40].mxu1 %v8826_v8 }
 0x3bd   : > { %3113 = vmatprep.mubr.f32.mxu1 %v7248_v36  ;;  %4695 = vmatpush1.bf16.msra.mxu1 %v4694_v40  ;;  %v4700_v36 = vpack.c.bf16 %v2276_v32, %v2275_v28  ;;  %v2277_v40 = vld [vmem:[%s8422_s3 + $0x370] sm:$0xff]  ;;  %v8832_v32 = vld [vmem:[#allocation14_spill] sm:$0xff] }
 0x3be   : > { %4696 = vmatprep.subr.bf16.mxu1 %v8645_v14 }
 0x3bf   : > { %v8005_v52 = vpop.f32.mrb[76].mxu0 }
 0x3c0   : > { %8827 = vst [vmem:[#allocation27_spill] sm:$0xff] %v8005_v52  ;;  %3114 = vmatmul.mubr.f32.gmra.mrb[42].mxu1 %v8828_v19  ;;  %v8008_v30 = vpop.f32.mrb[77].mxu0  ;;  %v4703_v52 = vpack.c.bf16 %v2278_v55, %v2277_v40  ;;  %v2282_v40 = vld [vmem:[%s8422_s3 + $0x398] sm:$0xff]  ;;  %v8834_v55 = vld [vmem:[#allocation15_spill] sm:$0xff] }
 0x3c1   : > { %8829 = vst [vmem:[#allocation58_spill] sm:$0xff] %v8008_v30  ;;  %3118 = vmatprep.mubr.f32.mxu1 %v7280_v38  ;;  %4698 = vmatpush1.bf16.msra.mxu1 %v4697_v56  ;;  %v2279_v38 = vld [vmem:[%s8422_s3 + $0x380] sm:$0xff]  ;;  %v2280_v56 = vld [vmem:[%s8422_s3 + $0x388] sm:$0xff] }
 0x3c2   : > { %4699 = vmatprep.subr.bf16.mxu1 %v8645_v14 }
 0x3c4   : > { %3119 = vmatmul.mubr.f32.gmra.mrb[44].mxu1 %v8830_v54 }
 0x3c5   : > { %3123 = vmatprep.mubr.f32.mxu1 %v7283_v35  ;;  %4701 = vmatpush1.bf16.msra.mxu1 %v4700_v36  ;;  %v4706_v35 = vpack.c.bf16 %v2280_v56, %v2279_v38  ;;  %v2281_v36 = vld [vmem:[%s8422_s3 + $0x390] sm:$0xff] }
 0x3c6   : > { %4702 = vmatprep.subr.bf16.mxu1 %v8645_v14  ;;  %v8836_v56 = vld [vmem:[#allocation16_spill] sm:$0xff] }
 0x3c7   : > { %v8027_v28 = vpop.f32.mrb[78].mxu0 }
 0x3c8   : > { %8831 = vst [vmem:[#allocation59_spill] sm:$0xff] %v8027_v28  ;;  %3124 = vmatmul.mubr.f32.gmra.mrb[46].mxu1 %v8832_v32  ;;  %v8030_v30 = vpop.f32.mrb[79].mxu0  ;;  %v4709_v28 = vpack.c.bf16 %v2282_v40, %v2281_v36  ;;  %v2286_v36 = vld [vmem:[%s8422_s3 + $0x3b8] sm:$0xff] }
 0x3c9   : > { %8833 = vst [vmem:[#allocation7_spill] sm:$0xff] %v8030_v30  ;;  %3128 = vmatprep.mubr.f32.mxu1 %v7315_v11  ;;  %4704 = vmatpush1.bf16.msra.mxu1 %v4703_v52  ;;  %v2283_v11 = vld [vmem:[%s8422_s3 + $0x3a0] sm:$0xff]  ;;  %v2284_v52 = vld [vmem:[%s8422_s3 + $0x3a8] sm:$0xff]  ;;  %v8838_v40 = vld [vmem:[#allocation17_spill] sm:$0xff] }
 0x3ca   : > { %4705 = vmatprep.subr.bf16.mxu1 %v8645_v14 }
 0x3cc   : > { %3129 = vmatmul.mubr.f32.gmra.mrb[48].mxu1 %v8834_v55 }
 0x3cd   : > { %3133 = vmatprep.mubr.f32.mxu1 %v7318_v41  ;;  %4707 = vmatpush1.bf16.msra.mxu1 %v4706_v35  ;;  %v4712_v41 = vpack.c.bf16 %v2284_v52, %v2283_v11  ;;  %v2285_v35 = vld [vmem:[%s8422_s3 + $0x3b0] sm:$0xff] }
 0x3ce   : > { %4708 = vmatprep.subr.bf16.mxu1 %v8645_v14  ;;  %v8840_v52 = vld [vmem:[#allocation20_spill] sm:$0xff] }
 0x3cf   : > { %v8049_v38 = vpop.f32.mrb[80].mxu0 }
 0x3d0   : > { %8835 = vst [vmem:[#allocation8_spill] sm:$0xff] %v8049_v38  ;;  %3134 = vmatmul.mubr.f32.gmra.mrb[50].mxu1 %v8836_v56  ;;  %v8052_v30 = vpop.f32.mrb[81].mxu0  ;;  %v4715_v38 = vpack.c.bf16 %v2286_v36, %v2285_v35  ;;  %v2290_v35 = vld [vmem:[%s8422_s3 + $0x3d8] sm:$0xff] }
 0x3d1   : > { %8837 = vst [vmem:[#allocation9_spill] sm:$0xff] %v8052_v30  ;;  %3138 = vmatprep.mubr.f32.mxu1 %v8797_v22  ;;  %4710 = vmatpush1.bf16.msra.mxu1 %v4709_v28  ;;  %v2287_v22 = vld [vmem:[%s8422_s3 + $0x3c0] sm:$0xff]  ;;  %v2288_v28 = vld [vmem:[%s8422_s3 + $0x3c8] sm:$0xff]  ;;  %v8842_v36 = vld [vmem:[#allocation21_spill] sm:$0xff] }
 0x3d2   : > { %4711 = vmatprep.subr.bf16.mxu1 %v8645_v14 }
 0x3d4   : > { %3139 = vmatmul.mubr.f32.gmra.mrb[52].mxu1 %v8838_v40 }
 0x3d5   : > { %3143 = vmatprep.mubr.f32.mxu1 %v8798_v61  ;;  %4713 = vmatpush1.bf16.msra.mxu1 %v4712_v41  ;;  %v4718_v61 = vpack.c.bf16 %v2288_v28, %v2287_v22  ;;  %v2289_v41 = vld [vmem:[%s8422_s3 + $0x3d0] sm:$0xff] }
 0x3d6   : > { %4714 = vmatprep.subr.bf16.mxu1 %v8645_v14  ;;  %v8844_v28 = vld [vmem:[#allocation28_spill] sm:$0xff] }
 0x3d7   : > { %v8071_v11 = vpop.f32.mrb[82].mxu0 }
 0x3d8   : > { %8839 = vst [vmem:[#allocation10_spill] sm:$0xff] %v8071_v11  ;;  %3144 = vmatmul.mubr.f32.gmra.mrb[54].mxu1 %v8840_v52  ;;  %v8074_v30 = vpop.f32.mrb[83].mxu0  ;;  %v4721_v11 = vpack.c.bf16 %v2290_v35, %v2289_v41  ;;  %v2294_v41 = vld [vmem:[%s8422_s3 + $0x3f8] sm:$0xff]  ;;  %v8846_v35 = vld [vmem:[#allocation31_spill] sm:$0xff] }
 0x3d9   : > { %8841 = vst [vmem:[#allocation11_spill] sm:$0xff] %v8074_v30  ;;  %3148 = vmatprep.mubr.f32.mxu1 %v8799_v58  ;;  %4716 = vmatpush1.bf16.msra.mxu1 %v4715_v38  ;;  %v2291_v58 = vld [vmem:[%s8422_s3 + $0x3e0] sm:$0xff]  ;;  %v2292_v38 = vld [vmem:[%s8422_s3 + $0x3e8] sm:$0xff] }
 0x3da   : > { %4717 = vmatprep.subr.bf16.mxu1 %v8645_v14 }
 0x3dc   : > { %3149 = vmatmul.mubr.f32.gmra.mrb[56].mxu1 %v8842_v36 }
 0x3dd   : > { %3153 = vmatprep.mubr.f32.mxu1 %v8800_v44  ;;  %4719 = vmatpush1.bf16.msra.mxu1 %v4718_v61  ;;  %v4724_v44 = vpack.c.bf16 %v2292_v38, %v2291_v58  ;;  %v2293_v61 = vld [vmem:[%s8422_s3 + $0x3f0] sm:$0xff]  ;;  %v8850_v38 = vld [vmem:[#allocation29_spill] sm:$0xff] }
 0x3de   : > { %4720 = vmatprep.subr.bf16.mxu1 %v8645_v14 }
 0x3df   : > { %v8093_v22 = vpop.f32.mrb[84].mxu0 }
 0x3e0   : > { %8843 = vst [vmem:[#allocation12_spill] sm:$0xff] %v8093_v22  ;;  %3154 = vmatmul.mubr.f32.gmra.mrb[58].mxu1 %v8844_v28  ;;  %v8096_v30 = vpop.f32.mrb[85].mxu0  ;;  %v4727_v22 = vpack.c.bf16 %v2294_v41, %v2293_v61 }
 0x3e1   : > { %8845 = vst [vmem:[#allocation13_spill] sm:$0xff] %v8096_v30  ;;  %3158 = vmatprep.mubr.f32.mxu1 %v8801_v53  ;;  %4722 = vmatpush1.bf16.msra.mxu1 %v4721_v11  ;;  %v8848_v11 = vld [vmem:[#allocation40_spill] sm:$0xff] }
 0x3e2   : > { %4723 = vmatprep.subr.bf16.mxu1 %v8645_v14  ;;  %v8851_v30 = vld [vmem:[#allocation48_spill] sm:$0xff] }
 0x3e4   : > { %3159 = vmatmul.mubr.f32.gmra.mrb[60].mxu1 %v8846_v35 }
 0x3e5   : > { %3163 = vmatprep.mubr.f32.mxu1 %v8802_v62  ;;  %4725 = vmatpush1.bf16.msra.mxu1 %v4724_v44  ;;  %v8852_v62 = vld [vmem:[#allocation22_spill] sm:$0xff] }
 0x3e6   : > { %4726 = vmatprep.subr.bf16.mxu1 %v8645_v14  ;;  %v8853_v14 = vld [vmem:[#allocation30_spill] sm:$0xff] }
 0x3e7   : > { %v8109_v53 = vpop.f32.mrb[86].mxu0  ;;  %v8854_v44 = vld [vmem:[#allocation38_spill] sm:$0xff] }
 0x3e8   : > { %8847 = vst [vmem:[#allocation14_spill] sm:$0xff] %v8109_v53  ;;  %3164 = vmatmul.mubr.f32.gmra.mrb[62].mxu1 %v8848_v11  ;;  %v8112_v58 = vpop.f32.mrb[87].mxu0 }
 0x3e9   : > { %8849 = vst [vmem:[#allocation15_spill] sm:$0xff] %v8112_v58  ;;  %3168 = vmatprep.mubr.f32.mxu1 %v8803_v6  ;;  %4728 = vmatpush1.bf16.msra.mxu1 %v4727_v22  ;;  %v8855_v6 = vld [vmem:[#allocation47_spill] sm:$0xff]  ;;  %v8856_v22 = vld [vmem:[#allocation54_spill] sm:$0xff] }
 0x3ea   : > { %4761 = vmatprep.subr.bf16.mxu1 %v8850_v38 }
 0x3ec   : > { %3169 = vmatmul.mubr.f32.gmra.mrb[64].mxu1 %v8851_v30 }
 0x3ed   : > { %3173 = vmatprep.mubr.f32.mxu1 %v8804_v3  ;;  %v8857_v3 = vld [vmem:[#allocation57_spill] sm:$0xff] }
 0x3f0   : > { %3174 = vmatmul.mubr.f32.gmra.mrb[66].mxu1 %v8852_v62 }
 0x3f1   : > { %3178 = vmatprep.mubr.f32.mxu1 %v8805_v31  ;;  %v8858_v31 = vld [vmem:[#allocation60_spill] sm:$0xff] }
 0x3f4   : > { %3179 = vmatmul.mubr.f32.gmra.mrb[68].mxu1 %v8853_v14 }
 0x3f5   : > { %3183 = vmatprep.mubr.f32.mxu1 %v8806_v12  ;;  %v2555_v12 = vrot.slane %v7928_v1, 1 }
 0x3f8   : > { %3184 = vmatmul.mubr.f32.gmra.mrb[70].mxu1 %v8854_v44 }
 0x3f9   : > { %3188 = vmatprep.mubr.f32.mxu1 %v8807_v57  ;;  %v8859_v57 = vld [vmem:[#allocation63_spill] sm:$0xff] }
 0x3fc   : > { %3189 = vmatmul.mubr.f32.gmra.mrb[72].mxu1 %v8855_v6 }
 0x3fd   : > { %3193 = vmatprep.mubr.f32.mxu1 %v8808_v9  ;;  %v8860_v9 = vld [vmem:[#allocation66_spill] sm:$0xff] }
 0x400   : > { %3194 = vmatmul.mubr.f32.gmra.mrb[74].mxu1 %v8856_v22 }
 0x401   : > { %3198 = vmatprep.mubr.f32.mxu1 %v8809_v37  ;;  %v2562_v37 = vrot.slane %v7928_v1, 2 }
 0x404   : > { %3199 = vmatmul.mubr.f32.gmra.mrb[76].mxu1 %v8857_v3 }
 0x405   : > { %3203 = vmatprep.mubr.f32.mxu1 %v8811_v15  ;;  %v2150_v15 = vsel %vm290_vm0, 0.0, %v7903_v5 }
 0x406   : > { %v2554_v53 = vrot.slane %v2150_v15, 1 }
 0x408   : > { %3204 = vmatmul.mubr.f32.gmra.mrb[78].mxu1 %v8858_v31  ;;  %v8154_v58 = vsel %vm602_vm1, %v2554_v53, %v2555_v12  ;;  %v8861_v53 = vld [vmem:[#allocation33_spill] sm:$0xff] }
 0x409   : > { %3208 = vmatprep.mubr.f32.mxu1 %v7595_v10  ;;  %v2166_v10 = vsel %vm290_vm0, %v7911_v25, 0.0 }
 0x40a   : > { %v2564_v41 = vrot.slane %v2166_v10, 2  ;;  %v2557_v33 = vrot.slane %v2166_v10, 1 }
 0x40c   : > { %3209 = vmatmul.mubr.f32.gmra.mrb[80].mxu1 %v7592_v45  ;;  %v8158_v25 = vsel %vm715_vm3, %v2562_v37, %v2564_v41  ;;  %v8162_v59 = vsel %vm602_vm1, %v2555_v12, %v2557_v33  ;;  %v8862_v33 = vld [vmem:[#allocation35_spill] sm:$0xff]  ;;  %v8890_v41 = vld [vmem:[#allocation37_spill] sm:$0xff] }
 0x40d   : > { %3213 = vmatprep.mubr.f32.mxu1 %v7598_v46  ;;  %v2561_v46 = vrot.slane %v2150_v15, 2 }
 0x40f   : > { %v8150_v61 = vsel %vm715_vm3, %v2561_v46, %v2562_v37  ;;  %v5238_v37 = vld [vmem:[%s5438_s8 + $0x18] sm:$0xff] }
 0x410   : > { %3214 = vmatmul.mubr.f32.gmra.mrb[82].mxu1 %v8859_v57 }
 0x411   : > { %3218 = vmatprep.mubr.f32.mxu1 %v7897_v20 }
 0x414   : > { %3219 = vmatmul.mubr.f32.gmra.mrb[84].mxu1 %v7632_v0 }
 0x415   : > { %3223 = vmatprep.mubr.f32.mxu1 %v7908_v18 }
 0x418   : > { %3224 = vmatmul.mubr.f32.gmra.mrb[86].mxu1 %v8860_v9 }
 0x419   : > { %3228 = vmatprep.mubr.f32.mxu1 %v7921_v39 }
 0x41c   : > { %3229 = vmatmul.mubr.f32.gmra.mrb[88].mxu1 %v7666_v7 }
 0x41d   : > { %3233 = vmatprep.mubr.f32.mxu1 %v7940_v47 }
 0x420   : > { %3234 = vmatmul.mubr.f32.gmra.mrb[90].mxu1 %v7673_v49 }
 0x421   : > { %3238 = vmatprep.mubr.f32.mxu1 %v8150_v61 }
 0x424   : > { %3239 = vmatmul.mubr.f32.gmra.mrb[92].mxu1 %v8154_v58 }
 0x425   : > { %3243 = vmatprep.mubr.f32.mxu1 %v8158_v25 }
 0x428   : > { %3244 = vmatmul.mubr.f32.gmra.mrb[94].mxu1 %v8162_v59 }
 0x429   : > { %3313 = vmatprep.mubr.f32.mxu1 %v8822_v23  ;;  %v8878_v23 = vld [vmem:[#allocation64_spill] sm:$0xff] }
 0x42c   : > { %4022 = vmatmul.mubr.msk.f32.vlgmr.msra.gmra.mrb[32].mxu1 %vm5481_vm2, %v7176_v29  ;;  %v8863_v29 = vld [vmem:[#allocation39_spill] sm:$0xff] }
 0x42d   : > { %3318 = vmatprep.mubr.f32.mxu1 %v8824_v2  ;;  %4769 = vmatpush3.bf16.msra.mxu1 %v8850_v38  ;;  %v8880_v2 = vld [vmem:[#allocation67_spill] sm:$0xff]  ;;  %v8888_v38 = vld [vmem:[#allocation25_spill] sm:$0xff] }
 0x42e   : > { %4762 = vmatprep.subr.bf16.mxu1 %v8861_v53 }
 0x430   : > { %3319 = vmatmul.mubr.f32.gmra.mrb[34].mxu1 %v7196_v50  ;;  %v8864_v50 = vld [vmem:[#allocation41_spill] sm:$0xff] }
 0x431   : > { %3323 = vmatprep.mubr.f32.mxu1 %v8826_v8  ;;  %4770 = vmatpush3.bf16.msra.mxu1 %v8861_v53  ;;  %v5235_v8 = vld [vmem:[%s5438_s8] sm:$0xff] }
 0x432   : > { %4763 = vmatprep.subr.bf16.mxu1 %v8862_v33 }
 0x434   : > { %4024 = vmatmul.mubr.msk.f32.gmra.mrb[36].mxu1 %vm5481_vm2, %v7203_v24  ;;  %v8865_v24 = vld [vmem:[#allocation46_spill] sm:$0xff] }
 0x435   : > { %3328 = vmatprep.mubr.f32.mxu1 %v8828_v19  ;;  %4771 = vmatpush3.bf16.msra.mxu1 %v8862_v33  ;;  %v5239_v33 = vld [vmem:[%s5438_s8 + $0x20] sm:$0xff] }
 0x436   : > { %4764 = vmatprep.subr.bf16.mxu1 %v8863_v29 }
 0x438   : > { %3329 = vmatmul.mubr.f32.gmra.mrb[38].mxu1 %v7231_v13  ;;  %v8866_v13 = vld [vmem:[#allocation5_spill] sm:$0xff] }
 0x439   : > { %3333 = vmatprep.mubr.f32.mxu1 %v8830_v54  ;;  %4772 = vmatpush3.bf16.msra.mxu1 %v8863_v29 }
 0x43a   : > { %4765 = vmatprep.subr.bf16.mxu1 %v8864_v50 }
 0x43c   : > { %4026 = vmatmul.mubr.msk.f32.gmra.mrb[40].mxu1 %vm5481_vm2, %v7238_v17  ;;  %v8867_v17 = vld [vmem:[#allocation6_spill] sm:$0xff] }
 0x43d   : > { %3338 = vmatprep.mubr.f32.mxu1 %v8832_v32  ;;  %4773 = vmatpush3.bf16.msra.mxu1 %v8864_v50 }
 0x43e   : > { %4766 = vmatprep.subr.bf16.mxu1 %v8865_v24 }
 0x440   : > { %3339 = vmatmul.mubr.f32.gmra.mrb[42].mxu1 %v7266_v26  ;;  %v8868_v26 = vld [vmem:[#allocation43_spill] sm:$0xff] }
 0x441   : > { %3343 = vmatprep.mubr.f32.mxu1 %v8834_v55  ;;  %4774 = vmatpush3.bf16.msra.mxu1 %v8865_v24 }
 0x442   : > { %4767 = vmatprep.subr.bf16.mxu1 %v8866_v13 }
 0x444   : > { %4028 = vmatmul.mubr.msk.f32.gmra.mrb[44].mxu1 %vm5481_vm2, %v7273_v16  ;;  %v8869_v16 = vld [vmem:[#allocation45_spill] sm:$0xff] }
 0x445   : > { %3348 = vmatprep.mubr.f32.mxu1 %v8836_v56  ;;  %4775 = vmatpush3.bf16.msra.mxu1 %v8866_v13  ;;  %v8887_v56 = vld [vmem:[#allocation18_spill] sm:$0xff] }
 0x446   : > { %4768 = vmatprep.subr.bf16.mxu1 %v8867_v17 }
 0x448   : > { %3349 = vmatmul.mubr.f32.gmra.mrb[46].mxu1 %v7301_v63  ;;  %v8870_v63 = vld [vmem:[#allocation24_spill] sm:$0xff] }
 0x449   : > { %3353 = vmatprep.mubr.f32.mxu1 %v8838_v40  ;;  %4776 = vmatpush3.bf16.msra.mxu1 %v8867_v17  ;;  %v8891_v17 = vld [vmem:[#allocation34_spill] sm:$0xff] }
 0x44c   : > { %4030 = vmatmul.mubr.msk.f32.gmra.mrb[48].mxu1 %vm5481_vm2, %v7308_v34  ;;  %v8871_v34 = vld [vmem:[#allocation26_spill] sm:$0xff] }
 0x44d   : > { %3358 = vmatprep.mubr.f32.mxu1 %v8840_v52 }
 0x450   : > { %3359 = vmatmul.mubr.f32.gmra.mrb[50].mxu1 %v7336_v43  ;;  %v8872_v43 = vld [vmem:[#allocation42_spill] sm:$0xff] }
 0x451   : > { %3363 = vmatprep.mubr.f32.mxu1 %v8842_v36  ;;  %v5236_v36 = vld [vmem:[%s5438_s8 + $0x8] sm:$0xff] }
 0x454   : > { %4032 = vmatmul.mubr.msk.f32.gmra.mrb[52].mxu1 %vm5481_vm2, %v7343_v51  ;;  %v8873_v51 = vld [vmem:[#allocation44_spill] sm:$0xff] }
 0x455   : > { %3368 = vmatprep.mubr.f32.mxu1 %v8844_v28 }
 0x458   : > { %3369 = vmatmul.mubr.f32.gmra.mrb[54].mxu1 %v7371_v42  ;;  %v8874_v42 = vld [vmem:[#allocation55_spill] sm:$0xff] }
 0x459   : > { %3373 = vmatprep.mubr.f32.mxu1 %v8846_v35 }
 0x45c   : > { %4034 = vmatmul.mubr.msk.f32.gmra.mrb[56].mxu1 %vm5481_vm2, %v7378_v48  ;;  %v8875_v48 = vld [vmem:[#allocation56_spill] sm:$0xff] }
 0x45d   : > { %3378 = vmatprep.mubr.f32.mxu1 %v8848_v11 }
 0x460   : > { %3379 = vmatmul.mubr.f32.gmra.mrb[58].mxu1 %v7406_v60  ;;  %v8876_v60 = vld [vmem:[#allocation61_spill] sm:$0xff] }
 0x461   : > { %3383 = vmatprep.mubr.f32.mxu1 %v8851_v30  ;;  %v8883_v30 = vld [vmem:[#allocation4_spill] sm:$0xff] }
 0x464   : > { %4036 = vmatmul.mubr.msk.f32.gmra.mrb[60].mxu1 %vm5481_vm2, %v7413_v21  ;;  %v8877_v21 = vld [vmem:[#allocation62_spill] sm:$0xff] }
 0x465   : > { %3388 = vmatprep.mubr.f32.mxu1 %v8852_v62 }
 0x468   : > { %3389 = vmatmul.mubr.f32.gmra.mrb[62].mxu1 %v8868_v26 }
 0x469   : > { %3393 = vmatprep.mubr.f32.mxu1 %v8853_v14 }
 0x46c   : > { %4038 = vmatmul.mubr.msk.f32.gmra.mrb[64].mxu1 %vm5481_vm2, %v8869_v16 }
 0x46d   : > { %3398 = vmatprep.mubr.f32.mxu1 %v8854_v44  ;;  %v5237_v44 = vld [vmem:[%s5438_s8 + $0x10] sm:$0xff] }
 0x470   : > { %3399 = vmatmul.mubr.f32.gmra.mrb[66].mxu1 %v8870_v63  ;;  %v5240_v63 = vld [vmem:[%s5438_s8 + $0x28] sm:$0xff] }
 0x471   : > { %3403 = vmatprep.mubr.f32.mxu1 %v8855_v6 }
 0x474   : > { %4040 = vmatmul.mubr.msk.f32.gmra.mrb[68].mxu1 %vm5481_vm2, %v8871_v34 }
 0x475   : > { %3408 = vmatprep.mubr.f32.mxu1 %v8856_v22 }
 0x478   : > { %3409 = vmatmul.mubr.f32.gmra.mrb[70].mxu1 %v8872_v43 }
 0x479   : > { %3413 = vmatprep.mubr.f32.mxu1 %v8857_v3 }
 0x47c   : > { %4042 = vmatmul.mubr.msk.f32.gmra.mrb[72].mxu1 %vm5481_vm2, %v8873_v51 }
 0x47d   : > { %3418 = vmatprep.mubr.f32.mxu1 %v8858_v31 }
 0x480   : > { %3419 = vmatmul.mubr.f32.gmra.mrb[74].mxu1 %v8874_v42 }
 0x481   : > { %3423 = vmatprep.mubr.f32.mxu1 %v7592_v45  ;;  %v8879_v45 = vld [vmem:[#allocation65_spill] sm:$0xff] }
 0x484   : > { %4044 = vmatmul.mubr.msk.f32.gmra.mrb[76].mxu1 %vm5481_vm2, %v8875_v48 }
 0x485   : > { %3428 = vmatprep.mubr.f32.mxu1 %v8859_v57  ;;  %v8889_v57 = vld [vmem:[#allocation23_spill] sm:$0xff] }
 0x488   : > { %3429 = vmatmul.mubr.f32.gmra.mrb[78].mxu1 %v8876_v60 }
 0x489   : > { %3433 = vmatprep.mubr.f32.mxu1 %v7632_v0  ;;  %v8881_v0 = vld [vmem:[#allocation3_spill] sm:$0xff] }
 0x48c   : > { %4046 = vmatmul.mubr.msk.f32.gmra.mrb[80].mxu1 %vm5481_vm2, %v8877_v21  ;;  %v5241_v21 = vld [vmem:[%s5438_s8 + $0x30] sm:$0xff] }
 0x48d   : > { %3438 = vmatprep.mubr.f32.mxu1 %v8860_v9 }
 0x490   : > { %3439 = vmatmul.mubr.f32.gmra.mrb[82].mxu1 %v8878_v23 }
 0x491   : > { %3443 = vmatprep.mubr.f32.mxu1 %v7666_v7  ;;  %v8882_v7 = vld [vmem:[#allocation2_spill] sm:$0xff] }
 0x494   : > { %4048 = vmatmul.mubr.msk.f32.gmra.mrb[84].mxu1 %vm5481_vm2, %v8879_v45 }
 0x495   : > { %3448 = vmatprep.mubr.f32.mxu1 %v7673_v49 }
 0x498   : > { %3449 = vmatmul.mubr.f32.gmra.mrb[86].mxu1 %v8880_v2 }
 0x499   : > { %3453 = vmatprep.mubr.f32.mxu1 %v8154_v58 }
 0x49c   : > { %4050 = vmatmul.mubr.msk.f32.gmra.mrb[88].mxu1 %vm5481_vm2, %v7903_v5  ;;  %v8885_v5 = vld [vmem:[#allocation53_spill] sm:$0xff] }
 0x49d   : > { %3458 = vmatprep.mubr.f32.mxu1 %v8162_v59 }
 0x4a0   : > { %3459 = vmatmul.mubr.f32.gmra.mrb[90].mxu1 %v7928_v1  ;;  %v8886_v1 = vld [vmem:[#allocation19_spill] sm:$0xff] }
 0x4a1   : > { %3463 = vmatprep.mubr.f32.mxu1 %v8881_v0 }
 0x4a4   : > { %4052 = vmatmul.mubr.msk.f32.gmra.mrb[92].mxu1 %vm5481_vm2, %v8882_v7 }
 0x4a5   : > { %3468 = vmatprep.mubr.f32.mxu1 %v8883_v30 }
 0x4a8   : > { %3469 = vmatmul.mubr.f32.gmra.mrb[94].mxu1 %v8882_v7  ;;  %v8892_v7 = vld [vmem:[#allocation50_spill] sm:$0xff] }
 0x4a9   : > { %4301 = vmatprep.mubr.f32.mxu1 %v7897_v20  ;;  %v8287_v20 = vld [vmem:[%s8423_s4] ss:$0 sm:$0xff] }
 0x4ac   : > { %4302 = vmatmul.mubr.f32.vlgmr.msra.gmra.mrb[96].mxu1 %v7908_v18 }
 0x4ad   : > { %4304 = vmatprep.mubr.f32.mxu1 %v7921_v39 }
 0x4b0   : > { %4305 = vmatmul.mubr.f32.gmra.mrb[98].mxu1 %v7940_v47 }
 0x4b1   : > { %4307 = vmatprep.mubr.f32.mxu1 %v8150_v61 }
 0x4b4   : > { %4308 = vmatmul.mubr.f32.gmra.mrb[100].mxu1 %v8158_v25 }
 0x4b5   : > { %4310 = vmatprep.mubr.f32.mxu1 %v8884_v4 }
 0x4b8   : > { %4311 = vmatmul.mubr.f32.gmra.mrb[102].mxu1 %v8885_v5  ;;  %v5242_v5 = vld [vmem:[%s5438_s8 + $0x38] sm:$0xff] }
 0x4ff   : > { %v3315_v18 = vpop.f32.mrb[32].mxu1 }
 0x500   : > { %v4809_v49 = vadd.f32 %v8287_v20, %v3315_v18  ;;  %v3317_v39 = vpop.f32.mrb[33].mxu1 }
 0x502   : > { %v3541_v59 = vadd.f32 %v4809_v49, %v8886_v1  ;;  %v8893_v1 = vld [vmem:[#allocation32_spill] sm:$0xff] }
 0x503   : > { %v3320_v47 = vpop.f32.mrb[34].mxu1 }
 0x504   : > { %v3699_v19 = vadd.f32 %v5235_v8, %v3541_v59  ;;  %v4810_v54 = vadd.f32 %v8287_v20, %v3320_v47  ;;  %v3322_v32 = vpop.f32.mrb[35].mxu1  ;;  %v5243_v8 = vld [vmem:[%s5438_s8 + $0x40] sm:$0xff] }
 0x506   : > { %v3731_v55 = vmax.f32 %v3699_v19, 0.0  ;;  %v3546_v40 = vadd.f32 %v4810_v54, %v8887_v56  ;;  %v8894_v56 = vld [vmem:[#allocation51_spill] sm:$0xff] }
 0x507   : > { %v3325_v52 = vpop.f32.mrb[36].mxu1 }
 0x508   : > { %3763 = vst [vmem:[%s8298_s10] sm:$0xff] %v3731_v55  ;;  %v3700_v28 = vadd.f32 %v5236_v36, %v3546_v40  ;;  %v4811_v35 = vadd.f32 %v8287_v20, %v3325_v52  ;;  %v3327_v11 = vpop.f32.mrb[37].mxu1  ;;  %v5244_v36 = vld [vmem:[%s5438_s8 + $0x48] sm:$0xff] }
 0x50a   : > { %v3732_v58 = vmax.f32 %v3700_v28, 0.0  ;;  %v3551_v62 = vadd.f32 %v4811_v35, %v8888_v38  ;;  %v8895_v38 = vld [vmem:[#allocation49_spill] sm:$0xff] }
 0x50b   : > { %v3330_v14 = vpop.f32.mrb[38].mxu1 }
 0x50c   : > { %3764 = vst [vmem:[%s8298_s10 + $0x8] sm:$0xff] %v3732_v58  ;;  %v3701_v6 = vadd.f32 %v5237_v44, %v3551_v62  ;;  %v4812_v22 = vadd.f32 %v8287_v20, %v3330_v14  ;;  %v3332_v3 = vpop.f32.mrb[39].mxu1  ;;  %v5245_v44 = vld [vmem:[%s5438_s8 + $0x50] sm:$0xff] }
 0x50e   : > { %v3733_v31 = vmax.f32 %v3701_v6, 0.0  ;;  %v3556_v9 = vadd.f32 %v4812_v22, %v8889_v57  ;;  %v8896_v57 = vld [vmem:[#allocation36_spill] sm:$0xff] }
 0x50f   : > { %v3335_v15 = vpop.f32.mrb[40].mxu1 }
 0x510   : > { %3765 = vst [vmem:[%s8298_s10 + $0x10] sm:$0xff] %v3733_v31  ;;  %v3702_v10 = vadd.f32 %v5238_v37, %v3556_v9  ;;  %v4813_v46 = vadd.f32 %v8287_v20, %v3335_v15  ;;  %v3337_v12 = vpop.f32.mrb[41].mxu1  ;;  %v5246_v37 = vld [vmem:[%s5438_s8 + $0x58] sm:$0xff] }
 0x512   : > { %v3734_v61 = vmax.f32 %v3702_v10, 0.0  ;;  %v3561_v25 = vadd.f32 %v4813_v46, %v8890_v41  ;;  %v8897_v41 = vld [vmem:[#allocation58_spill] sm:$0xff] }
 0x513   : > { %v3340_v53 = vpop.f32.mrb[42].mxu1 }
 0x514   : > { %3766 = vst [vmem:[%s8298_s10 + $0x18] sm:$0xff] %v3734_v61  ;;  %v3703_v29 = vadd.f32 %v5239_v33, %v3561_v25  ;;  %v4814_v50 = vadd.f32 %v8287_v20, %v3340_v53  ;;  %v3342_v24 = vpop.f32.mrb[43].mxu1  ;;  %v5247_v33 = vld [vmem:[%s5438_s8 + $0x60] sm:$0xff] }
 0x516   : > { %v3735_v13 = vmax.f32 %v3703_v29, 0.0  ;;  %v3566_v26 = vadd.f32 %v4814_v50, %v8891_v17  ;;  %v8898_v17 = vld [vmem:[#allocation27_spill] sm:$0xff] }
 0x517   : > { %v3345_v16 = vpop.f32.mrb[44].mxu1 }
 0x518   : > { %3767 = vst [vmem:[%s8298_s10 + $0x20] sm:$0xff] %v3735_v13  ;;  %v3704_v34 = vadd.f32 %v5240_v63, %v3566_v26  ;;  %v4815_v43 = vadd.f32 %v8287_v20, %v3345_v16  ;;  %v3347_v51 = vpop.f32.mrb[45].mxu1  ;;  %v5248_v63 = vld [vmem:[%s5438_s8 + $0x68] sm:$0xff] }
 0x51a   : > { %v3736_v42 = vmax.f32 %v3704_v34, 0.0  ;;  %v3571_v48 = vadd.f32 %v4815_v43, %v7943_v27 }
 0x51b   : > { %v3350_v60 = vpop.f32.mrb[46].mxu1 }
 0x51c   : > { %3768 = vst [vmem:[%s8298_s10 + $0x28] sm:$0xff] %v3736_v42  ;;  %v3705_v23 = vadd.f32 %v5241_v21, %v3571_v48  ;;  %v4816_v45 = vadd.f32 %v8287_v20, %v3350_v60  ;;  %v3352_v2 = vpop.f32.mrb[47].mxu1  ;;  %v8899_v48 = vld [vmem:[#allocation7_spill] sm:$0xff] }
 0x51e   : > { %v3737_v0 = vmax.f32 %v3705_v23, 0.0  ;;  %v3576_v30 = vadd.f32 %v4816_v45, %v8892_v7  ;;  %v5249_v23 = vld [vmem:[%s5438_s8 + $0x70] sm:$0xff] }
 0x51f   : > { %v3355_v4 = vpop.f32.mrb[48].mxu1 }
 0x520   : > { %3769 = vst [vmem:[%s8298_s10 + $0x30] sm:$0xff] %v3737_v0  ;;  %v3706_v18 = vadd.f32 %v5242_v5, %v3576_v30  ;;  %v4817_v27 = vadd.f32 %v8287_v20, %v3355_v4  ;;  %v3357_v49 = vpop.f32.mrb[49].mxu1  ;;  %v8900_v30 = vld [vmem:[#allocation59_spill] sm:$0xff] }
 0x522   : > { %v3738_v39 = vmax.f32 %v3706_v18, 0.0  ;;  %v3581_v59 = vadd.f32 %v4817_v27, %v8893_v1  ;;  %v5250_v18 = vld [vmem:[%s5438_s8 + $0x78] sm:$0xff] }
 0x523   : > { %v3360_v47 = vpop.f32.mrb[50].mxu1 }
 0x524   : > { %3770 = vst [vmem:[%s8298_s10 + $0x38] sm:$0xff] %v3738_v39  ;;  %v3707_v19 = vadd.f32 %v5243_v8, %v3581_v59  ;;  %v4818_v54 = vadd.f32 %v8287_v20, %v3360_v47  ;;  %v3362_v32 = vpop.f32.mrb[51].mxu1  ;;  %v8901_v59 = vld [vmem:[#allocation9_spill] sm:$0xff] }
 0x526   : > { %v3739_v55 = vmax.f32 %v3707_v19, 0.0  ;;  %v3586_v40 = vadd.f32 %v4818_v54, %v8894_v56  ;;  %v5251_v19 = vld [vmem:[%s5438_s8 + $0x80] sm:$0xff] }
 0x527   : > { %v3365_v52 = vpop.f32.mrb[52].mxu1 }
 0x528   : > { %3771 = vst [vmem:[%s8298_s10 + $0x40] sm:$0xff] %v3739_v55  ;;  %v3708_v28 = vadd.f32 %v5244_v36, %v3586_v40  ;;  %v4819_v35 = vadd.f32 %v8287_v20, %v3365_v52  ;;  %v3367_v11 = vpop.f32.mrb[53].mxu1  ;;  %v8902_v40 = vld [vmem:[#allocation8_spill] sm:$0xff] }
 0x52a   : > { %v3740_v58 = vmax.f32 %v3708_v28, 0.0  ;;  %v3591_v62 = vadd.f32 %v4819_v35, %v8895_v38  ;;  %v5252_v28 = vld [vmem:[%s5438_s8 + $0x88] sm:$0xff] }
 0x52b   : > { %v3370_v14 = vpop.f32.mrb[54].mxu1 }
 0x52c   : > { %3772 = vst [vmem:[%s8298_s10 + $0x48] sm:$0xff] %v3740_v58  ;;  %v3709_v6 = vadd.f32 %v5245_v44, %v3591_v62  ;;  %v4820_v22 = vadd.f32 %v8287_v20, %v3370_v14  ;;  %v3372_v3 = vpop.f32.mrb[55].mxu1  ;;  %v8903_v62 = vld [vmem:[#allocation11_spill] sm:$0xff] }
 0x52e   : > { %v3741_v31 = vmax.f32 %v3709_v6, 0.0  ;;  %v3596_v9 = vadd.f32 %v4820_v22, %v8896_v57  ;;  %v5253_v6 = vld [vmem:[%s5438_s8 + $0x90] sm:$0xff] }
 0x52f   : > { %v3375_v15 = vpop.f32.mrb[56].mxu1 }
 0x530   : > { %3773 = vst [vmem:[%s8298_s10 + $0x50] sm:$0xff] %v3741_v31  ;;  %v3710_v10 = vadd.f32 %v5246_v37, %v3596_v9  ;;  %v4821_v46 = vadd.f32 %v8287_v20, %v3375_v15  ;;  %v3377_v12 = vpop.f32.mrb[57].mxu1  ;;  %v8904_v9 = vld [vmem:[#allocation10_spill] sm:$0xff] }
 0x532   : > { %v3742_v61 = vmax.f32 %v3710_v10, 0.0  ;;  %v3601_v25 = vadd.f32 %v4821_v46, %v8897_v41  ;;  %v5254_v10 = vld [vmem:[%s5438_s8 + $0x98] sm:$0xff] }
 0x533   : > { %v3380_v53 = vpop.f32.mrb[58].mxu1 }
 0x534   : > { %3774 = vst [vmem:[%s8298_s10 + $0x58] sm:$0xff] %v3742_v61  ;;  %v3711_v29 = vadd.f32 %v5247_v33, %v3601_v25  ;;  %v4822_v50 = vadd.f32 %v8287_v20, %v3380_v53  ;;  %v3382_v24 = vpop.f32.mrb[59].mxu1  ;;  %v8905_v25 = vld [vmem:[#allocation13_spill] sm:$0xff] }
 0x536   : > { %v3743_v13 = vmax.f32 %v3711_v29, 0.0  ;;  %v3606_v26 = vadd.f32 %v4822_v50, %v8898_v17  ;;  %v5255_v29 = vld [vmem:[%s5438_s8 + $0xa0] sm:$0xff] }
 0x537   : > { %v3385_v16 = vpop.f32.mrb[60].mxu1 }
 0x538   : > { %3775 = vst [vmem:[%s8298_s10 + $0x60] sm:$0xff] %v3743_v13  ;;  %v3712_v34 = vadd.f32 %v5248_v63, %v3606_v26  ;;  %v4823_v43 = vadd.f32 %v8287_v20, %v3385_v16  ;;  %v3387_v51 = vpop.f32.mrb[61].mxu1  ;;  %v8906_v26 = vld [vmem:[#allocation12_spill] sm:$0xff] }
 0x53a   : > { %v3744_v42 = vmax.f32 %v3712_v34, 0.0  ;;  %v3611_v60 = vadd.f32 %v4823_v43, %v8899_v48  ;;  %v5256_v34 = vld [vmem:[%s5438_s8 + $0xa8] sm:$0xff] }
 0x53b   : > { %v3390_v21 = vpop.f32.mrb[62].mxu1 }
 0x53c   : > { %3776 = vst [vmem:[%s8298_s10 + $0x68] sm:$0xff] %v3744_v42  ;;  %v3713_v45 = vadd.f32 %v5249_v23, %v3611_v60  ;;  %v4824_v2 = vadd.f32 %v8287_v20, %v3390_v21  ;;  %v3392_v0 = vpop.f32.mrb[63].mxu1  ;;  %v8907_v60 = vld [vmem:[#allocation15_spill] sm:$0xff] }
 0x53e   : > { %v3745_v7 = vmax.f32 %v3713_v45, 0.0  ;;  %v3616_v4 = vadd.f32 %v4824_v2, %v8900_v30  ;;  %v5257_v45 = vld [vmem:[%s5438_s8 + $0xb0] sm:$0xff] }
 0x53f   : > { %v3395_v5 = vpop.f32.mrb[64].mxu1 }
 0x540   : > { %3777 = vst [vmem:[%s8298_s10 + $0x70] sm:$0xff] %v3745_v7  ;;  %v3714_v27 = vadd.f32 %v5250_v18, %v3616_v4  ;;  %v4825_v49 = vadd.f32 %v8287_v20, %v3395_v5  ;;  %v3397_v39 = vpop.f32.mrb[65].mxu1  ;;  %v8908_v4 = vld [vmem:[#allocation14_spill] sm:$0xff] }
 0x542   : > { %v3746_v1 = vmax.f32 %v3714_v27, 0.0  ;;  %v3621_v47 = vadd.f32 %v4825_v49, %v8901_v59  ;;  %v5258_v27 = vld [vmem:[%s5438_s8 + $0xb8] sm:$0xff] }
 0x543   : > { %v3400_v8 = vpop.f32.mrb[66].mxu1 }
 0x544   : > { %3778 = vst [vmem:[%s8298_s10 + $0x78] sm:$0xff] %v3746_v1  ;;  %v3715_v54 = vadd.f32 %v5251_v19, %v3621_v47  ;;  %v4826_v32 = vadd.f32 %v8287_v20, %v3400_v8  ;;  %v3402_v55 = vpop.f32.mrb[67].mxu1 }
 0x546   : > { %v3747_v56 = vmax.f32 %v3715_v54, 0.0  ;;  %v3626_v52 = vadd.f32 %v4826_v32, %v8902_v40 }
 0x547   : > { %v3405_v36 = vpop.f32.mrb[68].mxu1 }
 0x548   : > { %3779 = vst [vmem:[%s8298_s10 + $0x80] sm:$0xff] %v3747_v56  ;;  %v3716_v35 = vadd.f32 %v5252_v28, %v3626_v52  ;;  %v4827_v11 = vadd.f32 %v8287_v20, %v3405_v36  ;;  %v3407_v58 = vpop.f32.mrb[69].mxu1 }
 0x54a   : > { %v3748_v38 = vmax.f32 %v3716_v35, 0.0  ;;  %v3631_v14 = vadd.f32 %v4827_v11, %v8903_v62 }
 0x54b   : > { %v3410_v44 = vpop.f32.mrb[70].mxu1 }
 0x54c   : > { %3780 = vst [vmem:[%s8298_s10 + $0x88] sm:$0xff] %v3748_v38  ;;  %v3717_v22 = vadd.f32 %v5253_v6, %v3631_v14  ;;  %v4828_v3 = vadd.f32 %v8287_v20, %v3410_v44  ;;  %v3412_v31 = vpop.f32.mrb[71].mxu1 }
 0x54e   : > { %v3749_v57 = vmax.f32 %v3717_v22, 0.0  ;;  %v3636_v15 = vadd.f32 %v4828_v3, %v8904_v9  ;;  %v5259_v3 = vld [vmem:[%s5438_s8 + $0xc8] sm:$0xff]  ;;  %v5260_v9 = vld [vmem:[%s5438_s8 + $0xc0] sm:$0xff] }
 0x54f   : > { %v3415_v37 = vpop.f32.mrb[72].mxu1 }
 0x550   : > { %3781 = vst [vmem:[%s8298_s10 + $0x90] sm:$0xff] %v3749_v57  ;;  %v3718_v46 = vadd.f32 %v5254_v10, %v3636_v15  ;;  %v4829_v12 = vadd.f32 %v8287_v20, %v3415_v37  ;;  %v3417_v61 = vpop.f32.mrb[73].mxu1 }
 0x552   : > { %v3750_v41 = vmax.f32 %v3718_v46, 0.0  ;;  %v3641_v53 = vadd.f32 %v4829_v12, %v8905_v25 }
 0x553   : > { %v3420_v33 = vpop.f32.mrb[74].mxu1 }
 0x554   : > { %3782 = vst [vmem:[%s8298_s10 + $0x98] sm:$0xff] %v3750_v41  ;;  %v3719_v50 = vadd.f32 %v5255_v29, %v3641_v53  ;;  %v4830_v24 = vadd.f32 %v8287_v20, %v3420_v33  ;;  %v3422_v13 = vpop.f32.mrb[75].mxu1  ;;  %v5261_v53 = vld [vmem:[%s5438_s8 + $0xd8] sm:$0xff] }
 0x556   : > { %v3751_v17 = vmax.f32 %v3719_v50, 0.0  ;;  %v3646_v16 = vadd.f32 %v4830_v24, %v8906_v26  ;;  %v5262_v50 = vld [vmem:[%s5438_s8 + $0xd0] sm:$0xff] }
 0x557   : > { %v3425_v63 = vpop.f32.mrb[76].mxu1 }
 0x558   : > { %3783 = vst [vmem:[%s8298_s10 + $0xa0] sm:$0xff] %v3751_v17  ;;  %v3720_v43 = vadd.f32 %v5256_v34, %v3646_v16  ;;  %v4831_v51 = vadd.f32 %v8287_v20, %v3425_v63  ;;  %v3427_v42 = vpop.f32.mrb[77].mxu1 }
 0x55a   : > { %v3752_v48 = vmax.f32 %v3720_v43, 0.0  ;;  %v3651_v21 = vadd.f32 %v4831_v51, %v8907_v60  ;;  %v5263_v51 = vld [vmem:[%s5438_s8 + $0xe8] sm:$0xff]  ;;  %v5264_v60 = vld [vmem:[%s5438_s8 + $0xe0] sm:$0xff] }
 0x55b   : > { %v3430_v23 = vpop.f32.mrb[78].mxu1 }
 0x55c   : > { %3784 = vst [vmem:[%s8298_s10 + $0xa8] sm:$0xff] %v3752_v48  ;;  %v3721_v2 = vadd.f32 %v5257_v45, %v3651_v21  ;;  %v4832_v0 = vadd.f32 %v8287_v20, %v3430_v23  ;;  %v3432_v7 = vpop.f32.mrb[79].mxu1 }
 0x55e   : > { %v3753_v30 = vmax.f32 %v3721_v2, 0.0  ;;  %v3656_v5 = vadd.f32 %v4832_v0, %v8908_v4  ;;  %v5265_v4 = vld [vmem:[%s5438_s8 + $0xf8] sm:$0xff] }
 0x55f   : > { %v3435_v18 = vpop.f32.mrb[80].mxu1 }
 0x560   : > { %3785 = vst [vmem:[%s8298_s10 + $0xb0] sm:$0xff] %v3753_v30  ;;  %v3722_v49 = vadd.f32 %v5258_v27, %v3656_v5  ;;  %v3437_v39 = vpop.f32.mrb[81].mxu1  ;;  %v4833_v38 = vadd.f32 %v8287_v20, %v3435_v18  ;;  %v5266_v18 = vld [vmem:[%s5438_s8 + $0xf0] sm:$0xff] }
 0x562   : > { %v3754_v1 = vmax.f32 %v3722_v49, 0.0 }
 0x563   : > { %v3440_v59 = vpop.f32.mrb[82].mxu1 }
 0x564   : > { %3786 = vst [vmem:[%s8298_s10 + $0xb8] sm:$0xff] %v3754_v1  ;;  %v3442_v47 = vpop.f32.mrb[83].mxu1  ;;  %v4834_v58 = vadd.f32 %v8287_v20, %v3440_v59 }
 0x567   : > { %v3445_v8 = vpop.f32.mrb[84].mxu1 }
 0x568   : > { %v3447_v19 = vpop.f32.mrb[85].mxu1  ;;  %v4835_v57 = vadd.f32 %v8287_v20, %v3445_v8 }
 0x56b   : > { %v3450_v54 = vpop.f32.mrb[86].mxu1 }
 0x56c   : > { %v3452_v32 = vpop.f32.mrb[87].mxu1  ;;  %v4836_v22 = vadd.f32 %v8287_v20, %v3450_v54 }
 0x56f   : > { %v3455_v55 = vpop.f32.mrb[88].mxu1 }
 0x570   : > { %v3457_v56 = vpop.f32.mrb[89].mxu1  ;;  %v4837_v29 = vadd.f32 %v8287_v20, %v3455_v55 }
 0x573   : > { %v3460_v40 = vpop.f32.mrb[90].mxu1 }
 0x574   : > { %v3462_v52 = vpop.f32.mrb[91].mxu1  ;;  %v4838_v25 = vadd.f32 %v8287_v20, %v3460_v40 }
 0x577   : > { %v3465_v36 = vpop.f32.mrb[92].mxu1 }
 0x578   : > { %v3467_v28 = vpop.f32.mrb[93].mxu1  ;;  %v4839_v48 = vadd.f32 %v8287_v20, %v3465_v36 }
 0x57b   : > { %v3470_v35 = vpop.f32.mrb[94].mxu1 }
 0x57c   : > { %v3472_v11 = vpop.f32.mrb[95].mxu1  ;;  %v4840_v43 = vadd.f32 %v8287_v20, %v3470_v35 }
 0x57f   : > { %v4303_v62 = vpop.f32.mrb[96].mxu1 }
 0x580   : > { %v3666_v14 = vadd.f32 %v4834_v58, %v4303_v62  ;;  %v3660_v44 = vpop.f32.mrb[97].mxu1 }
 0x581   : > { %v3661_v6 = vadd.f32 %v4833_v38, %v3660_v44 }
 0x582   : > { %v3724_v31 = vadd.f32 %v5259_v3, %v3666_v14 }
 0x583   : > { %v3723_v15 = vadd.f32 %v5260_v9, %v3661_v6  ;;  %v4306_v37 = vpop.f32.mrb[98].mxu1 }
 0x584   : > { %v3756_v10 = vmax.f32 %v3724_v31, 0.0  ;;  %v3676_v46 = vadd.f32 %v4836_v22, %v4306_v37  ;;  %v3670_v12 = vpop.f32.mrb[99].mxu1 }
 0x585   : > { %v3755_v61 = vmax.f32 %v3723_v15, 0.0  ;;  %v3671_v41 = vadd.f32 %v4835_v57, %v3670_v12 }
 0x586   : > { %3788 = vst [vmem:[%s8298_s10 + $0xc8] sm:$0xff] %v3756_v10  ;;  %v3726_v33 = vadd.f32 %v5261_v53, %v3676_v46 }
 0x587   : > { %3787 = vst [vmem:[%s8298_s10 + $0xc0] sm:$0xff] %v3755_v61  ;;  %v3725_v24 = vadd.f32 %v5262_v50, %v3671_v41  ;;  %v4309_v13 = vpop.f32.mrb[100].mxu1 }
 0x588   : > { %v3758_v17 = vmax.f32 %v3726_v33, 0.0  ;;  %v3686_v26 = vadd.f32 %v4838_v25, %v4309_v13  ;;  %v3680_v16 = vpop.f32.mrb[101].mxu1 }
 0x589   : > { %v3757_v63 = vmax.f32 %v3725_v24, 0.0  ;;  %v3681_v34 = vadd.f32 %v4837_v29, %v3680_v16 }
 0x58a   : > { %3790 = vst [vmem:[%s8298_s10 + $0xd8] sm:$0xff] %v3758_v17  ;;  %v3728_v42 = vadd.f32 %v5263_v51, %v3686_v26 }
 0x58b   : > { %3789 = vst [vmem:[%s8298_s10 + $0xd0] sm:$0xff] %v3757_v63  ;;  %v3727_v21 = vadd.f32 %v5264_v60, %v3681_v34  ;;  %v4312_v23 = vpop.f32.mrb[102].mxu1 }
 0x58c   : > { %v3760_v45 = vmax.f32 %v3728_v42, 0.0  ;;  %v3696_v2 = vadd.f32 %v4840_v43, %v4312_v23  ;;  %v3690_v0 = vpop.f32.mrb[103].mxu1 }
 0x58d   : > { %v3759_v7 = vmax.f32 %v3727_v21, 0.0  ;;  %v3691_v30 = vadd.f32 %v4839_v48, %v3690_v0 }
 0x58e   : > { %3792 = vst [vmem:[%s8298_s10 + $0xe8] sm:$0xff] %v3760_v45  ;;  %v3730_v5 = vadd.f32 %v5265_v4, %v3696_v2 }
 0x58f   : > { %3791 = vst [vmem:[%s8298_s10 + $0xe0] sm:$0xff] %v3759_v7  ;;  %v3729_v27 = vadd.f32 %v5266_v18, %v3691_v30 }
 0x590   : > { %v3762_v49 = vmax.f32 %v3730_v5, 0.0 }
 0x591   : > { %v3761_v39 = vmax.f32 %v3729_v27, 0.0 }
 0x592   : > { %3794 = vst [vmem:[%s8298_s10 + $0xf8] sm:$0xff] %v3762_v49 }
 0x593   : > { %3793 = vst [vmem:[%s8298_s10 + $0xf0] sm:$0xff] %v3761_v39 }
 0x594 PF: > { %s15_s18 = sadd.s32 1, %s5273_s18  }
 0x595   : > { %p12_p4 = scmp.ge.s32.totalorder %s15_s18, 4  }
 0x597   :  { %14 = sbr.rel (!%p12_p4) target bundleno = 1 (0x1), region = 70 }

</bundles_post_ra>
